<compile_context>
chip_gen: v7x
topology: tpu7x:2x2x1
jax: 0.10.0
libtpu: 0.0.40
codegen_flags: <defaults>
</compile_context>

<pallas_src>
import math

import jax
import jax.numpy as jnp
from jax import lax
from jax.experimental import pallas as pl
from jax.experimental.pallas import tpu as pltpu


def _gaze_kernel(x_ref, w_ref, b_ref, o_ref):
    """Fused global-average-pool + linear.

    x_ref: (N, C, HW) f32  -- NCHW activations, spatial dims flattened
    w_ref: (OUT, C)   f32  -- fc weight (PyTorch layout), pre-scaled by 1/HW
    b_ref: (1, OUT)   f32  -- fc bias
    o_ref: (N, OUT)   f32
    """
    # Spatial sum over the (lane) HW axis -> (N, C), C stays lane-dense.
    pooled = jnp.sum(x_ref[...], axis=-1)
    # (N, C) x (OUT, C)^T -> (N, OUT) on the MXU, f32 accumulation.
    y = lax.dot_general(
        pooled, w_ref[...],
        dimension_numbers=(((1,), (1,)), ((), ())),
        preferred_element_type=jnp.float32)
    o_ref[...] = (y + b_ref[...]).astype(o_ref.dtype)


def res_gaze_es_forward(x_nchw, w, b):
    """x_nchw: (N, 2048, H, W); w: (2, 2048) (PyTorch Linear layout); b: (2,)."""
    N, C, H, W = x_nchw.shape
    OUT = w.shape[0]
    hw = H * W

    x3 = x_nchw.reshape(N, C, hw)                        # free, contiguous
    w_scaled = (w * (1.0 / hw)).astype(jnp.float32)      # fold avg-pool scale
    b2 = b.reshape(1, OUT).astype(jnp.float32)

    return pl.pallas_call(
        _gaze_kernel,
        out_shape=jax.ShapeDtypeStruct((N, OUT), jnp.float32),
        grid_spec=pltpu.PrefetchScalarGridSpec(
            num_scalar_prefetch=0,
            grid=(1,),
            in_specs=[
                pl.BlockSpec((N, C, hw), lambda i: (0, 0, 0)),
                pl.BlockSpec((OUT, C), lambda i: (0, 0)),
                pl.BlockSpec((1, OUT), lambda i: (0, 0)),
            ],
            out_specs=pl.BlockSpec((N, OUT), lambda i: (0, 0)),
        ),
        compiler_params=pltpu.CompilerParams(
            dimension_semantics=("arbitrary",)),
    )(x3, w_scaled, b2)


if __name__ == "__main__":
    key = jax.random.PRNGKey(0)
    kx, kw, kb = jax.random.split(key, 3)

    # The forward implies C=2048 (fc = Linear(2048, 2)); spatial kept small.
    N, C, H, W, OUT = 2, 2048, 7, 7, 2
    x = jax.random.normal(kx, (N, C, H, W), jnp.float32)
    bound = 1.0 / math.sqrt(C)                 # nn.Linear default init scale
    w = jax.random.uniform(kw, (OUT, C), jnp.float32, minval=-bound, maxval=bound)
    b = jax.random.uniform(kb, (OUT,), jnp.float32, minval=-bound, maxval=bound)

    fwd = jax.jit(res_gaze_es_forward)
    out = fwd(x, w, b)
    jax.block_until_ready(out)

    # Pure-JAX reference: avgpool -> flatten -> fc
    ref = jnp.mean(x, axis=(2, 3)) @ w.T + b

    assert out.shape == (N, OUT), out.shape
    assert bool(jnp.all(jnp.isfinite(out)))
    max_err = float(jnp.max(jnp.abs(out - ref)))
    assert bool(jnp.allclose(out, ref, atol=1e-2, rtol=1e-2)), max_err
    print("KERNEL_OK")
</pallas_src>

<mosaic_0001>
module attributes {stable_mosaic.version = 11 : i64} {
  func.func @_gaze_kernel(%arg0: i32, %arg1: memref<2x2048x49xf32, #tpu.memory_space<vmem>>, %arg2: memref<2x2048xf32, #tpu.memory_space<vmem>>, %arg3: memref<1x2xf32, #tpu.memory_space<vmem>>, %arg4: memref<2x2xf32, #tpu.memory_space<vmem>>) attributes {dimension_semantics = [#tpu.dimension_semantics<arbitrary>], iteration_bounds = array<i64: 1>, scalar_prefetch = 0 : i64, scratch_operands = 0 : i64, tpu.core_type = #tpu.core_type<tc>, window_params = [{pipeline_mode = #tpu.pipeline_mode<synchronous>, transform_indices = @transform_0, window_bounds = array<i64: 2, 2048, 49>}, {pipeline_mode = #tpu.pipeline_mode<synchronous>, transform_indices = @transform_1, window_bounds = array<i64: 2, 2048>}, {pipeline_mode = #tpu.pipeline_mode<synchronous>, transform_indices = @transform_2, window_bounds = array<i64: 1, 2>}, {pipeline_mode = #tpu.pipeline_mode<synchronous>, transform_indices = @transform_3, window_bounds = array<i64: 2, 2>}]} {
    %c0 = arith.constant 0 : index
    %c0_0 = arith.constant 0 : index
    %c0_1 = arith.constant 0 : index
    %0 = vector.load %arg1[%c0, %c0_0, %c0_1] : memref<2x2048x49xf32, #tpu.memory_space<vmem>>, vector<2x2048x49xf32>
    %cst = arith.constant dense<0.000000e+00> : vector<2x2048xf32>
    %1 = vector.multi_reduction <add>, %0, %cst [2] : vector<2x2048x49xf32> to vector<2x2048xf32>
    %c0_2 = arith.constant 0 : index
    %c0_3 = arith.constant 0 : index
    %2 = vector.load %arg2[%c0_2, %c0_3] : memref<2x2048xf32, #tpu.memory_space<vmem>>, vector<2x2048xf32>
    %cst_4 = arith.constant dense<0.000000e+00> : vector<2x2xf32>
    %3 = tpu.matmul %1, %2, %cst_4 {dimension_numbers = #tpu.dot_dimension_numbers<[1], [1], [0], [0], [0, 0, 1, 0], [], []>} : vector<2x2048xf32>, vector<2x2048xf32>, vector<2x2xf32> -> vector<2x2xf32>
    %c0_5 = arith.constant 0 : index
    %c0_6 = arith.constant 0 : index
    %4 = vector.load %arg3[%c0_5, %c0_6] : memref<1x2xf32, #tpu.memory_space<vmem>>, vector<1x2xf32>
    %5 = vector.broadcast %4 : vector<1x2xf32> to vector<2x2xf32>
    %6 = arith.addf %3, %5 : vector<2x2xf32>
    %c0_7 = arith.constant 0 : index
    %c0_8 = arith.constant 0 : index
    %7 = vector.load %arg4[%c0_7, %c0_8] : memref<2x2xf32, #tpu.memory_space<vmem>>, vector<2x2xf32>
    tpu.vector_store %arg4[%c0_7, %c0_8], %6 {strides = array<i32>} : memref<2x2xf32, #tpu.memory_space<vmem>>, vector<2x2xf32>,
    return
  }
  func.func @transform_0(%arg0: i32) -> (i32, i32, i32) {
    %c0_i32 = arith.constant 0 : i32
    %c0_i32_0 = arith.constant 0 : i32
    %c0_i32_1 = arith.constant 0 : i32
    %c0_i32_2 = arith.constant 0 : i32
    return %c0_i32, %c0_i32_0, %c0_i32_1 : i32, i32, i32
  }
  func.func @transform_1(%arg0: i32) -> (i32, i32) {
    %c0_i32 = arith.constant 0 : i32
    %c0_i32_0 = arith.constant 0 : i32
    %c0_i32_1 = arith.constant 0 : i32
    return %c0_i32, %c0_i32_0 : i32, i32
  }
  func.func @transform_2(%arg0: i32) -> (i32, i32) {
    %c0_i32 = arith.constant 0 : i32
    %c0_i32_0 = arith.constant 0 : i32
    %c0_i32_1 = arith.constant 0 : i32
    return %c0_i32, %c0_i32_0 : i32, i32
  }
  func.func @transform_3(%arg0: i32) -> (i32, i32) {
    %c0_i32 = arith.constant 0 : i32
    %c0_i32_0 = arith.constant 0 : i32
    %c0_i32_1 = arith.constant 0 : i32
    return %c0_i32, %c0_i32_0 : i32, i32
  }
}

</mosaic_0001>

<bundles_post_ra>
// kernel: res_gaze_es_forward.1
= control target key start
LH: loop header
LB: loop body
LE: loop exit
PB: predicated region body
PF: predicated region fallthrough
CT: control target
= control target key end

     0   :  { %vm527_vm0 = vcmask 400384   ;;  %s9469_s0 = inlined_call_operand.vmem [shape: f32[2,2048,49], index: 0, kind: input, shape index: {}]   ;;  %s9470_s1 = inlined_call_operand.vmem [shape: f32[2,2048], index: 1, kind: input, shape index: {}]   ;;  %s9471_s2 = inlined_call_operand.vmem [shape: f32[1,2], index: 2, kind: input, shape index: {}]   ;;  %s9472_s3 = inlined_call_operand.hbm [shape: f32[2,2], index: 3, kind: output, shape index: {}]  }
   0x1   :  { %v17_v0 = vld [vmem:[%s9469_s0 + $0x10] sm:$0xff]  ;;  %v15_v1 = vld [vmem:[%s9469_s0] sm:$0xff]  ;;  %v18_v2 = vld [vmem:[%s9469_s0 + $0x18] sm:$0xff] }
   0x2   :  { %v534_v3 = vsel %vm527_vm0, %v17_v0, 0.0  ;;  %v528_v4 = vsel %vm527_vm0, %v15_v1, 0.0  ;;  %v16_v5 = vld [vmem:[%s9469_s0 + $0x8] sm:$0xff]  ;;  %v537_v6 = vsel %vm527_vm0, %v18_v2, 0.0  ;;  %v19_v9 = vld [vmem:[%s9469_s0 + $0x20] sm:$0xff]  ;;  %v22_v12 = vld [vmem:[%s9469_s0 + $0x38] sm:$0xff] }
   0x3   :  { %535 = vadd.xlane.f32.xlu1 %v534_v3  ;;  %529 = vadd.xlane.f32.xlu0 %v528_v4  ;;  %v531_v7 = vsel %vm527_vm0, %v16_v5, 0.0  ;;  %v20_v8 = vld [vmem:[%s9469_s0 + $0x28] sm:$0xff]  ;;  %v540_v11 = vsel %vm527_vm0, %v19_v9, 0.0  ;;  %v21_v13 = vld [vmem:[%s9469_s0 + $0x30] sm:$0xff]  ;;  %v549_v14 = vsel %vm527_vm0, %v22_v12, 0.0  ;;  %v23_v17 = vld [vmem:[%s9469_s0 + $0x40] sm:$0xff] }
   0x4   :  { %v543_v10 = vsel %vm527_vm0, %v20_v8, 0.0  ;;  %v546_v15 = vsel %vm527_vm0, %v21_v13, 0.0  ;;  %v24_v16 = vld [vmem:[%s9469_s0 + $0x48] sm:$0xff]  ;;  %v552_v19 = vsel %vm527_vm0, %v23_v17, 0.0  ;;  %v26_v20 = vld [vmem:[%s9469_s0 + $0x58] sm:$0xff]  ;;  %v25_v21 = vld [vmem:[%s9469_s0 + $0x50] sm:$0xff] }
   0x5   :  { %v555_v18 = vsel %vm527_vm0, %v24_v16, 0.0  ;;  %v561_v22 = vsel %vm527_vm0, %v26_v20, 0.0  ;;  %v558_v23 = vsel %vm527_vm0, %v25_v21, 0.0  ;;  %v28_v24 = vld [vmem:[%s9469_s0 + $0x68] sm:$0xff]  ;;  %v27_v25 = vld [vmem:[%s9469_s0 + $0x60] sm:$0xff]  ;;  %v30_v28 = vld [vmem:[%s9469_s0 + $0x78] sm:$0xff] }
   0x6   :  { %v567_v26 = vsel %vm527_vm0, %v28_v24, 0.0  ;;  %v564_v27 = vsel %vm527_vm0, %v27_v25, 0.0  ;;  %v29_v29 = vld [vmem:[%s9469_s0 + $0x70] sm:$0xff]  ;;  %v573_v30 = vsel %vm527_vm0, %v30_v28, 0.0 }
   0x7   :  { %538 = vadd.xlane.f32.xlu1 %v537_v6  ;;  %532 = vadd.xlane.f32.xlu0 %v531_v7  ;;  %v570_v31 = vsel %vm527_vm0, %v29_v29, 0.0 }
   0xb   :  { %544 = vadd.xlane.f32.xlu1 %v543_v10  ;;  %541 = vadd.xlane.f32.xlu0 %v540_v11 }
   0xf   :  { %550 = vadd.xlane.f32.xlu1 %v549_v14  ;;  %547 = vadd.xlane.f32.xlu0 %v546_v15 }
  0x13   :  { %556 = vadd.xlane.f32.xlu1 %v555_v18  ;;  %553 = vadd.xlane.f32.xlu0 %v552_v19 }
  0x17   :  { %562 = vadd.xlane.f32.xlu1 %v561_v22  ;;  %559 = vadd.xlane.f32.xlu0 %v558_v23 }
  0x1b   :  { %568 = vadd.xlane.f32.xlu1 %v567_v26  ;;  %565 = vadd.xlane.f32.xlu0 %v564_v27 }
  0x1c   :  { %8 = vsyncpa [#allocation3], 0  ;;  %v32_v32 = vld [vmem:[%s9469_s0 + $0x88] sm:$0xff]  ;;  %v31_v33 = vld [vmem:[%s9469_s0 + $0x80] sm:$0xff]  ;;  %vm2598_vm1 = vcmask 130112   ;;  %vm2605_vm2 = vcmask 195712  }
  0x1d   :  { %v579_v34 = vsel %vm527_vm0, %v32_v32, 0.0  ;;  %v576_v35 = vsel %vm527_vm0, %v31_v33, 0.0  ;;  %v34_v36 = vld [vmem:[%s9469_s0 + $0x98] sm:$0xff]  ;;  %v33_v37 = vld [vmem:[%s9469_s0 + $0x90] sm:$0xff]  ;;  %v36_v40 = vld [vmem:[%s9469_s0 + $0xa8] sm:$0xff]  ;;  %vm2612_vm3 = vcmask 261312  }
  0x1e   :  { %v585_v38 = vsel %vm527_vm0, %v34_v36, 0.0  ;;  %v582_v39 = vsel %vm527_vm0, %v33_v37, 0.0  ;;  %v35_v41 = vld [vmem:[%s9469_s0 + $0xa0] sm:$0xff]  ;;  %v591_v42 = vsel %vm527_vm0, %v36_v40, 0.0  ;;  %v38_v44 = vld [vmem:[%s9469_s0 + $0xb8] sm:$0xff]  ;;  %v37_v45 = vld [vmem:[%s9469_s0 + $0xb0] sm:$0xff] }
  0x1f   :  { %574 = vadd.xlane.f32.xlu1 %v573_v30  ;;  %571 = vadd.xlane.f32.xlu0 %v570_v31  ;;  %v588_v43 = vsel %vm527_vm0, %v35_v41, 0.0  ;;  %v597_v46 = vsel %vm527_vm0, %v38_v44, 0.0  ;;  %v594_v47 = vsel %vm527_vm0, %v37_v45, 0.0  ;;  %v40_v48 = vld [vmem:[%s9469_s0 + $0xc8] sm:$0xff]  ;;  %v39_v49 = vld [vmem:[%s9469_s0 + $0xc0] sm:$0xff]  ;;  %v42_v52 = vld [vmem:[%s9469_s0 + $0xd8] sm:$0xff] }
  0x20   :  { %v603_v50 = vsel %vm527_vm0, %v40_v48, 0.0  ;;  %v600_v51 = vsel %vm527_vm0, %v39_v49, 0.0  ;;  %v41_v53 = vld [vmem:[%s9469_s0 + $0xd0] sm:$0xff]  ;;  %v609_v54 = vsel %vm527_vm0, %v42_v52, 0.0  ;;  %v44_v56 = vld [vmem:[%s9469_s0 + $0xe8] sm:$0xff]  ;;  %v43_v57 = vld [vmem:[%s9469_s0 + $0xe0] sm:$0xff] }
  0x21   :  { %v606_v55 = vsel %vm527_vm0, %v41_v53, 0.0  ;;  %v615_v58 = vsel %vm527_vm0, %v44_v56, 0.0  ;;  %v612_v59 = vsel %vm527_vm0, %v43_v57, 0.0  ;;  %v46_v60 = vld [vmem:[%s9469_s0 + $0xf8] sm:$0xff]  ;;  %v45_v61 = vld [vmem:[%s9469_s0 + $0xf0] sm:$0xff]  ;;  %v48_v0 = vld [vmem:[%s9469_s0 + $0x108] sm:$0xff] }
  0x22   :  { %v621_v62 = vsel %vm527_vm0, %v46_v60, 0.0  ;;  %v618_v63 = vsel %vm527_vm0, %v45_v61, 0.0  ;;  %v47_v1 = vld [vmem:[%s9469_s0 + $0x100] sm:$0xff]  ;;  %v627_v2 = vsel %vm527_vm0, %v48_v0, 0.0  ;;  %v50_v4 = vld [vmem:[%s9469_s0 + $0x118] sm:$0xff]  ;;  %v49_v5 = vld [vmem:[%s9469_s0 + $0x110] sm:$0xff] }
  0x23   :  { %580 = vadd.xlane.f32.xlu1 %v579_v34  ;;  %577 = vadd.xlane.f32.xlu0 %v576_v35  ;;  %v624_v3 = vsel %vm527_vm0, %v47_v1, 0.0  ;;  %v633_v6 = vsel %vm527_vm0, %v50_v4, 0.0  ;;  %v630_v7 = vsel %vm527_vm0, %v49_v5, 0.0  ;;  %v52_v8 = vld [vmem:[%s9469_s0 + $0x128] sm:$0xff]  ;;  %v51_v9 = vld [vmem:[%s9469_s0 + $0x120] sm:$0xff]  ;;  %v54_v12 = vld [vmem:[%s9469_s0 + $0x138] sm:$0xff] }
  0x24   :  { %v639_v10 = vsel %vm527_vm0, %v52_v8, 0.0  ;;  %v636_v11 = vsel %vm527_vm0, %v51_v9, 0.0  ;;  %v53_v13 = vld [vmem:[%s9469_s0 + $0x130] sm:$0xff]  ;;  %v645_v14 = vsel %vm527_vm0, %v54_v12, 0.0  ;;  %v56_v16 = vld [vmem:[%s9469_s0 + $0x148] sm:$0xff]  ;;  %v55_v17 = vld [vmem:[%s9469_s0 + $0x140] sm:$0xff] }
  0x25   :  { %v642_v15 = vsel %vm527_vm0, %v53_v13, 0.0  ;;  %v651_v18 = vsel %vm527_vm0, %v56_v16, 0.0  ;;  %v648_v19 = vsel %vm527_vm0, %v55_v17, 0.0  ;;  %v58_v20 = vld [vmem:[%s9469_s0 + $0x158] sm:$0xff]  ;;  %v57_v21 = vld [vmem:[%s9469_s0 + $0x150] sm:$0xff]  ;;  %v60_v24 = vld [vmem:[%s9469_s0 + $0x168] sm:$0xff] }
  0x26   :  { %v657_v22 = vsel %vm527_vm0, %v58_v20, 0.0  ;;  %v654_v23 = vsel %vm527_vm0, %v57_v21, 0.0  ;;  %v59_v25 = vld [vmem:[%s9469_s0 + $0x160] sm:$0xff]  ;;  %v663_v26 = vsel %vm527_vm0, %v60_v24, 0.0  ;;  %v62_v28 = vld [vmem:[%s9469_s0 + $0x178] sm:$0xff]  ;;  %v61_v29 = vld [vmem:[%s9469_s0 + $0x170] sm:$0xff] }
  0x27   :  { %586 = vadd.xlane.f32.xlu1 %v585_v38  ;;  %583 = vadd.xlane.f32.xlu0 %v582_v39  ;;  %v660_v27 = vsel %vm527_vm0, %v59_v25, 0.0  ;;  %v669_v30 = vsel %vm527_vm0, %v62_v28, 0.0  ;;  %v666_v31 = vsel %vm527_vm0, %v61_v29, 0.0  ;;  %v64_v32 = vld [vmem:[%s9469_s0 + $0x188] sm:$0xff]  ;;  %v63_v33 = vld [vmem:[%s9469_s0 + $0x180] sm:$0xff]  ;;  %v66_v36 = vld [vmem:[%s9469_s0 + $0x198] sm:$0xff] }
  0x28   :  { %v675_v34 = vsel %vm527_vm0, %v64_v32, 0.0  ;;  %v672_v35 = vsel %vm527_vm0, %v63_v33, 0.0  ;;  %v65_v37 = vld [vmem:[%s9469_s0 + $0x190] sm:$0xff]  ;;  %v681_v38 = vsel %vm527_vm0, %v66_v36, 0.0  ;;  %v68_v40 = vld [vmem:[%s9469_s0 + $0x1a8] sm:$0xff]  ;;  %v67_v41 = vld [vmem:[%s9469_s0 + $0x1a0] sm:$0xff] }
  0x29   :  { %v678_v39 = vsel %vm527_vm0, %v65_v37, 0.0  ;;  %v70_v44 = vld [vmem:[%s9469_s0 + $0x1b8] sm:$0xff]  ;;  %v69_v45 = vld [vmem:[%s9469_s0 + $0x1b0] sm:$0xff]  ;;  %v72_v48 = vld [vmem:[%s9469_s0 + $0x1c8] sm:$0xff]  ;;  %vm2619_vm4 = vcmask 326912   ;;  %vm9476_vm5 = vcmask 392512  }
  0x2a   :  { %v71_v49 = vld [vmem:[%s9469_s0 + $0x1c0] sm:$0xff]  ;;  %v74_v52 = vld [vmem:[%s9469_s0 + $0x1d8] sm:$0xff]  ;;  %v73_v53 = vld [vmem:[%s9469_s0 + $0x1d0] sm:$0xff]  ;;  %vm2633_vm6 = vcmask 458112   ;;  %vm2640_vm7 = vcmask 523712   ;;  %vm9474_vm8 = vcmask 589312  }
  0x2b   :  { %592 = vadd.xlane.f32.xlu1 %v591_v42  ;;  %589 = vadd.xlane.f32.xlu0 %v588_v43  ;;  %v687_v42 = vsel %vm527_vm0, %v68_v40, 0.0  ;;  %v684_v43 = vsel %vm527_vm0, %v67_v41, 0.0  ;;  %v76_v56 = vld [vmem:[%s9469_s0 + $0x1e8] sm:$0xff]  ;;  %v75_v57 = vld [vmem:[%s9469_s0 + $0x1e0] sm:$0xff]  ;;  %v78_v60 = vld [vmem:[%s9469_s0 + $0x1f8] sm:$0xff]  ;;  %vm2654_vm9 = vcmask 654912  }
  0x2c   :  { %v77_v61 = vld [vmem:[%s9469_s0 + $0x1f0] sm:$0xff]  ;;  %v80_v0 = vld [vmem:[%s9469_s0 + $0x208] sm:$0xff]  ;;  %v79_v1 = vld [vmem:[%s9469_s0 + $0x200] sm:$0xff]  ;;  %vm9475_vm10 = vcmask 720512   ;;  %vm2668_vm11 = vcmask 786112   ;;  %vm9473_vm12 = vcmask 851712  }
  0x2d   :  { %v82_v4 = vld [vmem:[%s9469_s0 + $0x218] sm:$0xff]  ;;  %v81_v5 = vld [vmem:[%s9469_s0 + $0x210] sm:$0xff]  ;;  %v84_v8 = vld [vmem:[%s9469_s0 + $0x228] sm:$0xff]  ;;  %vm2682_vm13 = vcmask 917312   ;;  %vm2689_vm14 = vcmask 982912   ;;  %vm2696_vm15 = vcmask 1048512  }
  0x2e   :  { %v83_v9 = vld [vmem:[%s9469_s0 + $0x220] sm:$0xff]  ;;  %v86_v13 = vld [vmem:[%s9469_s0 + $0x238] sm:$0xff]  ;;  %v89_v33 = vld [vmem:[%s9469_s0 + $0x250] sm:$0xff]  ;;  %s5890_s17 = smov [#allocation2]  }
  0x2f   :  { %598 = vadd.xlane.f32.xlu1 %v597_v46  ;;  %595 = vadd.xlane.f32.xlu0 %v594_v47  ;;  %v693_v46 = vsel %vm527_vm0, %v70_v44, 0.0  ;;  %v690_v47 = vsel %vm527_vm0, %v69_v45, 0.0  ;;  %v732_v12 = vsel %vm527_vm0, %v83_v9, 0.0  ;;  %v741_v16 = vsel %vm527_vm0, %v86_v13, 0.0  ;;  %v87_v20 = vld [vmem:[%s9469_s0 + $0x240] sm:$0xff]  ;;  %v90_v28 = vld [vmem:[%s9469_s0 + $0x258] sm:$0xff] }
  0x30   :  { %v753_v36 = vsel %vm527_vm0, %v90_v28, 0.0  ;;  %v92_v41 = vld [vmem:[%s9469_s0 + $0x268] sm:$0xff]  ;;  %v95_v9 = vld [vmem:[%s9469_s0 + $0x280] sm:$0xff]  ;;  %s5836_s18 = sshll.u32 %s5890_s17, 4  ;;  %s5837_s18 = int_to_ptr.vmem [resolvable:$true] %s5836_s18 }
  0x31   :  { %s5865_s19 = scalar_lea.vmem %s5837_s18, 32  ;;  %p5870_p1 = scmp.lt.s32.totalorder %s5837_s18, %s5837_s18 }
  0x32   :  { %p5866_p0 = scmp.ne.s32.totalorder %s5837_s18, %s5865_s19  ;;  %p5871_p2 = scmp.lt.s32.totalorder %s5865_s19, %s5865_s19 }
  0x33   :  { %604 = vadd.xlane.f32.xlu1 %v603_v50  ;;  %601 = vadd.xlane.f32.xlu0 %v600_v51  ;;  %v699_v50 = vsel %vm527_vm0, %v72_v48, 0.0  ;;  %v696_v51 = vsel %vm527_vm0, %v71_v49, 0.0 }
  0x34   :  { %p5872_p3 = por %p5871_p2, %p5870_p1 }
  0x36   :  { %p5873_p4 = pnand %p5872_p3, %p5866_p0 }
  0x37   :  { %610 = vadd.xlane.f32.xlu1 %v609_v54  ;;  %607 = vadd.xlane.f32.xlu0 %v606_v55  ;;  %v705_v54 = vsel %vm527_vm0, %v74_v52, 0.0  ;;  %v702_v55 = vsel %vm527_vm0, %v73_v53, 0.0 }
  0x3b   :  { %616 = vadd.xlane.f32.xlu1 %v615_v58  ;;  %613 = vadd.xlane.f32.xlu0 %v612_v59  ;;  %v711_v58 = vsel %vm527_vm0, %v76_v56, 0.0  ;;  %v708_v59 = vsel %vm527_vm0, %v75_v57, 0.0 }
  0x3f   :  { %622 = vadd.xlane.f32.xlu1 %v621_v62  ;;  %619 = vadd.xlane.f32.xlu0 %v618_v63  ;;  %v717_v62 = vsel %vm527_vm0, %v78_v60, 0.0  ;;  %v714_v63 = vsel %vm527_vm0, %v77_v61, 0.0 }
  0x43   :  { %628 = vadd.xlane.f32.xlu1 %v627_v2  ;;  %625 = vadd.xlane.f32.xlu0 %v624_v3  ;;  %v723_v2 = vsel %vm527_vm0, %v80_v0, 0.0  ;;  %v720_v3 = vsel %vm527_vm0, %v79_v1, 0.0 }
  0x47   :  { %634 = vadd.xlane.f32.xlu1 %v633_v6  ;;  %631 = vadd.xlane.f32.xlu0 %v630_v7  ;;  %v729_v6 = vsel %vm527_vm0, %v82_v4, 0.0  ;;  %v726_v7 = vsel %vm527_vm0, %v81_v5, 0.0 }
  0x4b   :  { %640 = vadd.xlane.f32.xlu1 %v639_v10  ;;  %637 = vadd.xlane.f32.xlu0 %v636_v11  ;;  %v2587_v10 = vlaneseq  ;;  %v735_v11 = vsel %vm527_vm0, %v84_v8, 0.0  ;;  %v96_v8 = vld [vmem:[%s9469_s0 + $0x288] sm:$0xff] }
  0x4f   :  { %646 = vadd.xlane.f32.xlu1 %v645_v14  ;;  %643 = vadd.xlane.f32.xlu0 %v642_v15  ;;  %v85_v14 = vld [vmem:[%s9469_s0 + $0x230] sm:$0xff]  ;;  %v6197_v15 = vand.u32 127, %v2587_v10 }
  0x50   :  { %v738_v17 = vsel %vm527_vm0, %v85_v14, 0.0 }
  0x51   :  { %v2607_v21 = vadd.s32 4294967272, %v6197_v15  ;;  %v2621_v29 = vadd.s32 4294967256, %v6197_v15  ;;  %v2628_v44 = vadd.s32 4294967248, %v6197_v15  ;;  %v2649_v60 = vadd.s32 4294967224, %v6197_v15 }
  0x52   :  { %v2642_v0 = vadd.s32 4294967232, %v6197_v15  ;;  %v2656_v14 = vadd.s32 4294967216, %v6197_v15 }
  0x53   :  { %652 = vadd.xlane.f32.xlu1 %v651_v18  ;;  %649 = vadd.xlane.f32.xlu0 %v648_v19  ;;  %v6201_v18 = vshrl.u32 %v2587_v10, 7  ;;  %v88_v19 = vld [vmem:[%s9469_s0 + $0x248] sm:$0xff]  ;;  %v2663_v10 = vadd.s32 4294967208, %v6197_v15 }
  0x55   :  { %v6238_v40 = vsub.s32 %v2621_v29, %v6201_v18  ;;  %v6263_v57 = vsub.s32 %v2628_v44, %v6201_v18  ;;  %v6293_v13 = vsub.s32 %v2642_v0, %v6201_v18  ;;  %v6313_v29 = vsub.s32 %v2656_v14, %v6201_v18 }
  0x57   :  { %658 = vadd.xlane.f32.xlu1 %v657_v22  ;;  %655 = vadd.xlane.f32.xlu0 %v654_v23  ;;  %v2593_v22 = vadd.s32 4294967288, %v6197_v15  ;;  %v2600_v23 = vadd.s32 4294967280, %v6197_v15 }
  0x59   :  { %v6226_v32 = vsub.s32 %v2593_v22, %v6201_v18 }
  0x5b   :  { %664 = vadd.xlane.f32.xlu1 %v663_v26  ;;  %661 = vadd.xlane.f32.xlu0 %v660_v27  ;;  %v747_v26 = vsel %vm527_vm0, %v88_v19, 0.0  ;;  %v744_v27 = vsel %vm527_vm0, %v87_v20, 0.0  ;;  %v768_v19 = vsel %vm527_vm0, %v95_v9, 0.0  ;;  %v104_v9 = vld [vmem:[%s9469_s0 + $0x2c8] sm:$0xff] }
  0x5f   :  { %670 = vadd.xlane.f32.xlu1 %v669_v30  ;;  %667 = vadd.xlane.f32.xlu0 %v666_v31  ;;  %v6220_v30 = vsub.s32 %v6197_v15, %v6201_v18  ;;  %v6223_v31 = vsub.s32 %v2607_v21, %v6201_v18 }
  0x63   :  { %676 = vadd.xlane.f32.xlu1 %v675_v34  ;;  %673 = vadd.xlane.f32.xlu0 %v672_v35  ;;  %v2614_v34 = vadd.s32 4294967264, %v6197_v15  ;;  %v6233_v35 = vsub.s32 %v2600_v23, %v6201_v18  ;;  %v6301_v23 = vsub.s32 %v2663_v10, %v6201_v18  ;;  %v103_v10 = vld [vmem:[%s9469_s0 + $0x2c0] sm:$0xff] }
  0x65   :  { %v6252_v48 = vsub.s32 %v2614_v34, %v6201_v18 }
  0x67   :  { %682 = vadd.xlane.f32.xlu1 %v681_v38  ;;  %679 = vadd.xlane.f32.xlu0 %v678_v39  ;;  %v750_v39 = vsel %vm527_vm0, %v89_v33, 0.0  ;;  %v2677_v33 = vadd.s32 4294967192, %v6197_v15 }
  0x6b   :  { %688 = vadd.xlane.f32.xlu1 %v687_v42  ;;  %685 = vadd.xlane.f32.xlu0 %v684_v43  ;;  %v91_v42 = vld [vmem:[%s9469_s0 + $0x260] sm:$0xff]  ;;  %v2635_v43 = vadd.s32 4294967240, %v6197_v15 }
  0x6c   :  { %v756_v52 = vsel %vm527_vm0, %v91_v42, 0.0 }
  0x6d   :  { %v6260_v56 = vsub.s32 %v2635_v43, %v6201_v18  ;;  %v2684_v43 = vadd.s32 4294967184, %v6197_v15 }
  0x6f   :  { %694 = vadd.xlane.f32.xlu1 %v693_v46  ;;  %691 = vadd.xlane.f32.xlu0 %v690_v47 }
  0x73   :  { %700 = vadd.xlane.f32.xlu1 %v699_v50  ;;  %697 = vadd.xlane.f32.xlu0 %v696_v51  ;;  %v759_v51 = vsel %vm527_vm0, %v92_v41, 0.0 }
  0x77   :  { %706 = vadd.xlane.f32.xlu1 %v705_v54  ;;  %703 = vadd.xlane.f32.xlu0 %v702_v55 }
  0x7b   :  { %712 = vadd.xlane.f32.xlu1 %v711_v58  ;;  %709 = vadd.xlane.f32.xlu0 %v708_v59  ;;  %v94_v58 = vld [vmem:[%s9469_s0 + $0x278] sm:$0xff]  ;;  %v93_v59 = vld [vmem:[%s9469_s0 + $0x270] sm:$0xff] }
  0x7f   :  { %718 = vadd.xlane.f32.xlu1 %v717_v62  ;;  %715 = vadd.xlane.f32.xlu0 %v714_v63 }
  0x83   :  { %724 = vadd.xlane.f32.xlu1 %v723_v2  ;;  %721 = vadd.xlane.f32.xlu0 %v720_v3  ;;  %v765_v2 = vsel %vm527_vm0, %v94_v58, 0.0  ;;  %v762_v3 = vsel %vm527_vm0, %v93_v59, 0.0  ;;  %v6341_v59 = vsub.s32 %v2684_v43, %v6201_v18 }
  0x87   :  { %730 = vadd.xlane.f32.xlu1 %v729_v6  ;;  %727 = vadd.xlane.f32.xlu0 %v726_v7  ;;  %v6281_v7 = vsub.s32 %v2649_v60, %v6201_v18 }
  0x8b   :  { %736 = vadd.xlane.f32.xlu1 %v735_v11  ;;  %733 = vadd.xlane.f32.xlu0 %v732_v12 }
  0x8f   :  { %742 = vadd.xlane.f32.xlu1 %v741_v16  ;;  %739 = vadd.xlane.f32.xlu0 %v738_v17  ;;  %v771_v17 = vsel %vm527_vm0, %v96_v8, 0.0 }
  0x90   :  { %v536_v24 = vpop.xlane.xlu1 %535  ;;  %v530_v25 = vpop.xlane.xlu0 %529 }
  0x91   :  { %v2592_v45 = vrot.slane %v530_v25, %v6220_v30  ;;  %v2604_v49 = vrot.slane %v536_v24, %v6233_v35  ;;  %v98_v24 = vld [vmem:[%s9469_s0 + $0x298] sm:$0xff]  ;;  %v97_v25 = vld [vmem:[%s9469_s0 + $0x290] sm:$0xff] }
  0x93   :  { %748 = vadd.xlane.f32.xlu1 %v747_v26  ;;  %745 = vadd.xlane.f32.xlu0 %v744_v27  ;;  %v2670_v26 = vadd.s32 4294967200, %v6197_v15 }
  0x94   :  { %v539_v37 = vpop.xlane.xlu1 %538  ;;  %v533_v38 = vpop.xlane.xlu0 %532 }
  0x95   :  { %v2611_v46 = vrot.slane %v539_v37, %v6223_v31  ;;  %v2597_v47 = vrot.slane %v533_v38, %v6226_v32  ;;  %v774_v37 = vsel %vm527_vm0, %v97_v25, 0.0  ;;  %v6321_v42 = vsub.s32 %v2670_v26, %v6201_v18 }
  0x97   :  { %v2599_v50 = vsel %vm2598_vm1, %v2597_v47, %v2592_v45  ;;  %754 = vadd.xlane.f32.xlu1 %v753_v36  ;;  %751 = vadd.xlane.f32.xlu0 %v750_v39  ;;  %v777_v36 = vsel %vm527_vm0, %v98_v24, 0.0  ;;  %v100_v47 = vld [vmem:[%s9469_s0 + $0x2a8] sm:$0xff]  ;;  %v105_v24 = vld [vmem:[%s9469_s0 + $0x2d0] sm:$0xff] }
  0x98   :  { %v2606_v53 = vsel %vm2605_vm2, %v2604_v49, %v2599_v50  ;;  %v545_v54 = vpop.xlane.xlu1 %544  ;;  %v542_v55 = vpop.xlane.xlu0 %541  ;;  %v99_v49 = vld [vmem:[%s9469_s0 + $0x2a0] sm:$0xff]  ;;  %v2691_v50 = vadd.s32 4294967176, %v6197_v15 }
  0x99   :  { %v2625_v61 = vrot.slane %v545_v54, %v6238_v40  ;;  %v2613_v62 = vsel %vm2612_vm3, %v2611_v46, %v2606_v53  ;;  %v2618_v63 = vrot.slane %v542_v55, %v6252_v48  ;;  %v6327_v46 = vsub.s32 %v2677_v33, %v6201_v18 }
  0x9a   :  { %v783_v55 = vsel %vm527_vm0, %v100_v47, 0.0  ;;  %v780_v58 = vsel %vm527_vm0, %v99_v49, 0.0  ;;  %v798_v33 = vsel %vm527_vm0, %v105_v24, 0.0 }
  0x9b   :  { %v2620_v1 = vsel %vm2619_vm4, %v2618_v63, %v2613_v62  ;;  %760 = vadd.xlane.f32.xlu1 %v759_v51  ;;  %757 = vadd.xlane.f32.xlu0 %v756_v52  ;;  %v102_v62 = vld [vmem:[%s9469_s0 + $0x2b8] sm:$0xff]  ;;  %v101_v63 = vld [vmem:[%s9469_s0 + $0x2b0] sm:$0xff] }
  0x9c   :  { %v551_v4 = vpop.xlane.xlu1 %550  ;;  %v2627_v5 = vsel %vm9476_vm5, %v2625_v61, %v2620_v1  ;;  %v548_v6 = vpop.xlane.xlu0 %547  ;;  %v6346_v61 = vsub.s32 %v2691_v50, %v6201_v18 }
  0x9d   :  { %v2639_v11 = vrot.slane %v551_v4, %v6260_v56  ;;  %v2632_v12 = vrot.slane %v548_v6, %v6263_v57  ;;  %v786_v4 = vsel %vm527_vm0, %v101_v63, 0.0 }
  0x9f   :  { %v2634_v16 = vsel %vm2633_vm6, %v2632_v12, %v2627_v5  ;;  %766 = vadd.xlane.f32.xlu1 %v765_v2  ;;  %763 = vadd.xlane.f32.xlu0 %v762_v3  ;;  %v789_v3 = vsel %vm527_vm0, %v102_v62, 0.0 }
  0xa0   :  { %v557_v20 = vpop.xlane.xlu1 %556  ;;  %v2641_v21 = vsel %vm2640_vm7, %v2639_v11, %v2634_v16  ;;  %v554_v22 = vpop.xlane.xlu0 %553  ;;  %v795_v16 = vsel %vm527_vm0, %v104_v9, 0.0 }
  0xa1   :  { %v2653_v27 = vrot.slane %v557_v20, %v6281_v7  ;;  %v2646_v28 = vrot.slane %v554_v22, %v6293_v13  ;;  %v106_v22 = vld [vmem:[%s9469_s0 + $0x2d8] sm:$0xff] }
  0xa3   :  { %v2648_v34 = vsel %vm9474_vm8, %v2646_v28, %v2641_v21  ;;  %772 = vadd.xlane.f32.xlu1 %v771_v17  ;;  %769 = vadd.xlane.f32.xlu0 %v768_v19  ;;  %v792_v17 = vsel %vm527_vm0, %v103_v10, 0.0  ;;  %v801_v28 = vsel %vm527_vm0, %v106_v22, 0.0 }
  0xa4   :  { %v563_v38 = vpop.xlane.xlu1 %562  ;;  %v2655_v39 = vsel %vm2654_vm9, %v2653_v27, %v2648_v34  ;;  %v560_v41 = vpop.xlane.xlu0 %559 }
  0xa5   :  { %v2667_v44 = vrot.slane %v563_v38, %v6301_v23  ;;  %v2660_v45 = vrot.slane %v560_v41, %v6313_v29  ;;  %v107_v38 = vld [vmem:[%s9469_s0 + $0x2e0] sm:$0xff] }
  0xa6   :  { %v804_v47 = vsel %vm527_vm0, %v107_v38, 0.0 }
  0xa7   :  { %v2662_v51 = vsel %vm9475_vm10, %v2660_v45, %v2655_v39  ;;  %778 = vadd.xlane.f32.xlu1 %v777_v36  ;;  %775 = vadd.xlane.f32.xlu0 %v774_v37  ;;  %v108_v37 = vld [vmem:[%s9469_s0 + $0x2e8] sm:$0xff] }
  0xa8   :  { %v569_v52 = vpop.xlane.xlu1 %568  ;;  %v2669_v53 = vsel %vm2668_vm11, %v2667_v44, %v2662_v51  ;;  %v566_v54 = vpop.xlane.xlu0 %565  ;;  %v807_v45 = vsel %vm527_vm0, %v108_v37, 0.0  ;;  %v110_v51 = vld [vmem:[%s9469_s0 + $0x2f8] sm:$0xff] }
  0xa9   :  { %v2681_v60 = vrot.slane %v569_v52, %v6327_v46  ;;  %v2674_v15 = vrot.slane %v566_v54, %v6321_v42  ;;  %v109_v52 = vld [vmem:[%s9469_s0 + $0x2f0] sm:$0xff] }
  0xab   :  { %v2676_v0 = vsel %vm9473_vm12, %v2674_v15, %v2669_v53  ;;  %784 = vadd.xlane.f32.xlu1 %v783_v55  ;;  %781 = vadd.xlane.f32.xlu0 %v780_v58  ;;  %v810_v15 = vsel %vm527_vm0, %v109_v52, 0.0 }
  0xac   :  { %v575_v1 = vpop.xlane.xlu1 %574  ;;  %v572_v2 = vpop.xlane.xlu0 %571  ;;  %v2683_v5 = vsel %vm2682_vm13, %v2681_v60, %v2676_v0  ;;  %v813_v60 = vsel %vm527_vm0, %v110_v51, 0.0  ;;  %v112_v0 = vld [vmem:[%s9469_s0 + $0x308] sm:$0xff] }
  0xad   :  { %v2695_v6 = vrot.slane %v575_v1, %v6346_v61  ;;  %v2688_v8 = vrot.slane %v572_v2, %v6341_v59  ;;  %v111_v1 = vld [vmem:[%s9469_s0 + $0x300] sm:$0xff] }
  0xaf   :  { %790 = vadd.xlane.f32.xlu1 %v789_v3  ;;  %787 = vadd.xlane.f32.xlu0 %v786_v4  ;;  %v2690_v11 = vsel %vm2689_vm14, %v2688_v8, %v2683_v5  ;;  %v816_v8 = vsel %vm527_vm0, %v111_v1, 0.0 }
  0xb0   :  { %v581_v12 = vpop.xlane.xlu1 %580  ;;  %v578_v14 = vpop.xlane.xlu0 %577  ;;  %v6370_v19 = vsel %vm2696_vm15, %v2695_v6, %v2690_v11  ;;  %v819_v6 = vsel %vm527_vm0, %v112_v0, 0.0  ;;  %v114_v11 = vld [vmem:[%s9469_s0 + $0x318] sm:$0xff] }
  0xb1   :  { %v2705_v20 = vrot.slane %v581_v12, %v6226_v32  ;;  %v2701_v21 = vrot.slane %v578_v14, %v6220_v30  ;;  %v113_v12 = vld [vmem:[%s9469_s0 + $0x310] sm:$0xff] }
  0xb2   :  { %v822_v22 = vsel %vm527_vm0, %v113_v12, 0.0 }
  0xb3   :  { %v2706_v25 = vsel %vm2598_vm1, %v2705_v20, %v2701_v21  ;;  %796 = vadd.xlane.f32.xlu1 %v795_v16  ;;  %793 = vadd.xlane.f32.xlu0 %v792_v17  ;;  %v825_v21 = vsel %vm527_vm0, %v114_v11, 0.0 }
  0xb4   :  { %v587_v26 = vpop.xlane.xlu1 %586  ;;  %v584_v27 = vpop.xlane.xlu0 %583 }
  0xb5   :  { %v2715_v34 = vrot.slane %v587_v26, %v6223_v31  ;;  %v2710_v36 = vrot.slane %v584_v27, %v6233_v35  ;;  %v116_v26 = vld [vmem:[%s9469_s0 + $0x328] sm:$0xff]  ;;  %v115_v27 = vld [vmem:[%s9469_s0 + $0x320] sm:$0xff] }
  0xb6   :  { %v831_v37 = vsel %vm527_vm0, %v116_v26, 0.0  ;;  %v828_v38 = vsel %vm527_vm0, %v115_v27, 0.0 }
  0xb7   :  { %v2711_v39 = vsel %vm2605_vm2, %v2710_v36, %v2706_v25  ;;  %802 = vadd.xlane.f32.xlu1 %v801_v28  ;;  %799 = vadd.xlane.f32.xlu0 %v798_v33 }
  0xb8   :  { %v593_v41 = vpop.xlane.xlu1 %592  ;;  %v2716_v43 = vsel %vm2612_vm3, %v2715_v34, %v2711_v39  ;;  %v590_v44 = vpop.xlane.xlu0 %589 }
  0xb9   :  { %v2725_v49 = vrot.slane %v593_v41, %v6238_v40  ;;  %v2720_v50 = vrot.slane %v590_v44, %v6252_v48  ;;  %v117_v44 = vld [vmem:[%s9469_s0 + $0x330] sm:$0xff] }
  0xba   :  { %v834_v51 = vsel %vm527_vm0, %v117_v44, 0.0 }
  0xbb   :  { %v2721_v53 = vsel %vm2619_vm4, %v2720_v50, %v2716_v43  ;;  %808 = vadd.xlane.f32.xlu1 %v807_v45  ;;  %805 = vadd.xlane.f32.xlu0 %v804_v47  ;;  %v118_v43 = vld [vmem:[%s9469_s0 + $0x338] sm:$0xff] }
  0xbc   :  { %v599_v54 = vpop.xlane.xlu1 %598  ;;  %v2726_v55 = vsel %vm9476_vm5, %v2725_v49, %v2721_v53  ;;  %v596_v58 = vpop.xlane.xlu0 %595  ;;  %v837_v50 = vsel %vm527_vm0, %v118_v43, 0.0 }
  0xbd   :  { %v2735_v62 = vrot.slane %v599_v54, %v6260_v56  ;;  %v2730_v63 = vrot.slane %v596_v58, %v6263_v57  ;;  %v119_v58 = vld [vmem:[%s9469_s0 + $0x340] sm:$0xff] }
  0xbe   :  { %v840_v0 = vsel %vm527_vm0, %v119_v58, 0.0 }
  0xbf   :  { %v2731_v2 = vsel %vm2633_vm6, %v2730_v63, %v2726_v55  ;;  %814 = vadd.xlane.f32.xlu1 %v813_v60  ;;  %811 = vadd.xlane.f32.xlu0 %v810_v15  ;;  %v120_v55 = vld [vmem:[%s9469_s0 + $0x348] sm:$0xff] }
  0xc0   :  { %v605_v3 = vpop.xlane.xlu1 %604  ;;  %v2736_v4 = vsel %vm2640_vm7, %v2735_v62, %v2731_v2  ;;  %v602_v5 = vpop.xlane.xlu0 %601  ;;  %v843_v63 = vsel %vm527_vm0, %v120_v55, 0.0 }
  0xc1   :  { %v2745_v9 = vrot.slane %v605_v3, %v6281_v7  ;;  %v2740_v10 = vrot.slane %v602_v5, %v6293_v13  ;;  %v121_v5 = vld [vmem:[%s9469_s0 + $0x350] sm:$0xff] }
  0xc2   :  { %v846_v11 = vsel %vm527_vm0, %v121_v5, 0.0 }
  0xc3   :  { %v2741_v14 = vsel %vm9474_vm8, %v2740_v10, %v2736_v4  ;;  %820 = vadd.xlane.f32.xlu1 %v819_v6  ;;  %817 = vadd.xlane.f32.xlu0 %v816_v8  ;;  %v122_v4 = vld [vmem:[%s9469_s0 + $0x358] sm:$0xff] }
  0xc4   :  { %v611_v16 = vpop.xlane.xlu1 %610  ;;  %v2746_v17 = vsel %vm2654_vm9, %v2745_v9, %v2741_v14  ;;  %v608_v20 = vpop.xlane.xlu0 %607  ;;  %v849_v10 = vsel %vm527_vm0, %v122_v4, 0.0 }
  0xc5   :  { %v2755_v24 = vrot.slane %v611_v16, %v6301_v23  ;;  %v2750_v25 = vrot.slane %v608_v20, %v6313_v29  ;;  %v124_v16 = vld [vmem:[%s9469_s0 + $0x368] sm:$0xff] }
  0xc7   :  { %v2751_v28 = vsel %vm9475_vm10, %v2750_v25, %v2746_v17  ;;  %826 = vadd.xlane.f32.xlu1 %v825_v21  ;;  %823 = vadd.xlane.f32.xlu0 %v822_v22  ;;  %v123_v17 = vld [vmem:[%s9469_s0 + $0x360] sm:$0xff]  ;;  %v855_v25 = vsel %vm527_vm0, %v124_v16, 0.0 }
  0xc8   :  { %v617_v33 = vpop.xlane.xlu1 %616  ;;  %v2756_v34 = vsel %vm2668_vm11, %v2755_v24, %v2751_v28  ;;  %v614_v36 = vpop.xlane.xlu0 %613  ;;  %v852_v26 = vsel %vm527_vm0, %v123_v17, 0.0 }
  0xc9   :  { %v2765_v39 = vrot.slane %v617_v33, %v6327_v46  ;;  %v2760_v41 = vrot.slane %v614_v36, %v6321_v42  ;;  %v126_v33 = vld [vmem:[%s9469_s0 + $0x378] sm:$0xff] }
  0xcb   :  { %v2761_v45 = vsel %vm9473_vm12, %v2760_v41, %v2756_v34  ;;  %832 = vadd.xlane.f32.xlu1 %v831_v37  ;;  %829 = vadd.xlane.f32.xlu0 %v828_v38  ;;  %v125_v34 = vld [vmem:[%s9469_s0 + $0x370] sm:$0xff]  ;;  %v861_v41 = vsel %vm527_vm0, %v126_v33, 0.0 }
  0xcc   :  { %v623_v47 = vpop.xlane.xlu1 %622  ;;  %v620_v49 = vpop.xlane.xlu0 %619  ;;  %v2766_v52 = vsel %vm2682_vm13, %v2765_v39, %v2761_v45  ;;  %v858_v43 = vsel %vm527_vm0, %v125_v34, 0.0 }
  0xcd   :  { %v2775_v53 = vrot.slane %v623_v47, %v6346_v61  ;;  %v2770_v54 = vrot.slane %v620_v49, %v6341_v59  ;;  %v128_v47 = vld [vmem:[%s9469_s0 + $0x388] sm:$0xff]  ;;  %v127_v49 = vld [vmem:[%s9469_s0 + $0x380] sm:$0xff] }
  0xce   :  { %v864_v55 = vsel %vm527_vm0, %v127_v49, 0.0 }
  0xcf   :  { %838 = vadd.xlane.f32.xlu1 %v837_v50  ;;  %835 = vadd.xlane.f32.xlu0 %v834_v51  ;;  %v2771_v60 = vsel %vm2689_vm14, %v2770_v54, %v2766_v52  ;;  %v867_v54 = vsel %vm527_vm0, %v128_v47, 0.0 }
  0xd0   :  { %v629_v15 = vpop.xlane.xlu1 %628  ;;  %v626_v62 = vpop.xlane.xlu0 %625  ;;  %v6467_v1 = vsel %vm2696_vm15, %v2775_v53, %v2771_v60 }
  0xd1   :  { %v2784_v2 = vrot.slane %v629_v15, %v6226_v32  ;;  %v2780_v3 = vrot.slane %v626_v62, %v6220_v30  ;;  %v130_v15 = vld [vmem:[%s9469_s0 + $0x398] sm:$0xff]  ;;  %v129_v62 = vld [vmem:[%s9469_s0 + $0x390] sm:$0xff] }
  0xd2   :  { %v873_v4 = vsel %vm527_vm0, %v130_v15, 0.0  ;;  %v870_v5 = vsel %vm527_vm0, %v129_v62, 0.0 }
  0xd3   :  { %v2785_v6 = vsel %vm2598_vm1, %v2784_v2, %v2780_v3  ;;  %844 = vadd.xlane.f32.xlu1 %v843_v63  ;;  %841 = vadd.xlane.f32.xlu0 %v840_v0 }
  0xd4   :  { %v635_v8 = vpop.xlane.xlu1 %634  ;;  %v632_v9 = vpop.xlane.xlu0 %631 }
  0xd5   :  { %v2794_v12 = vrot.slane %v635_v8, %v6223_v31  ;;  %v2789_v14 = vrot.slane %v632_v9, %v6233_v35  ;;  %v132_v9 = vld [vmem:[%s9469_s0 + $0x3a8] sm:$0xff] }
  0xd6   :  { %v879_v17 = vsel %vm527_vm0, %v132_v9, 0.0 }
  0xd7   :  { %v2790_v20 = vsel %vm2605_vm2, %v2789_v14, %v2785_v6  ;;  %850 = vadd.xlane.f32.xlu1 %v849_v10  ;;  %847 = vadd.xlane.f32.xlu0 %v846_v11  ;;  %v131_v10 = vld [vmem:[%s9469_s0 + $0x3a0] sm:$0xff] }
  0xd8   :  { %v641_v21 = vpop.xlane.xlu1 %640  ;;  %v2795_v22 = vsel %vm2612_vm3, %v2794_v12, %v2790_v20  ;;  %v638_v24 = vpop.xlane.xlu0 %637  ;;  %v876_v20 = vsel %vm527_vm0, %v131_v10, 0.0 }
  0xd9   :  { %v2804_v27 = vrot.slane %v641_v21, %v6238_v40  ;;  %v2799_v28 = vrot.slane %v638_v24, %v6252_v48  ;;  %v134_v24 = vld [vmem:[%s9469_s0 + $0x3b8] sm:$0xff] }
  0xda   :  { %v885_v34 = vsel %vm527_vm0, %v134_v24, 0.0 }
  0xdb   :  { %v2800_v36 = vsel %vm2619_vm4, %v2799_v28, %v2795_v22  ;;  %856 = vadd.xlane.f32.xlu1 %v855_v25  ;;  %853 = vadd.xlane.f32.xlu0 %v852_v26  ;;  %v133_v25 = vld [vmem:[%s9469_s0 + $0x3b0] sm:$0xff] }
  0xdc   :  { %v647_v37 = vpop.xlane.xlu1 %646  ;;  %v2805_v38 = vsel %vm9476_vm5, %v2804_v27, %v2800_v36  ;;  %v644_v39 = vpop.xlane.xlu0 %643  ;;  %v882_v36 = vsel %vm527_vm0, %v133_v25, 0.0 }
  0xdd   :  { %v2814_v44 = vrot.slane %v647_v37, %v6260_v56  ;;  %v2809_v45 = vrot.slane %v644_v39, %v6263_v57  ;;  %v136_v39 = vld [vmem:[%s9469_s0 + $0x3c8] sm:$0xff] }
  0xde   :  { %v891_v47 = vsel %vm527_vm0, %v136_v39, 0.0 }
  0xdf   :  { %v2810_v50 = vsel %vm2633_vm6, %v2809_v45, %v2805_v38  ;;  %862 = vadd.xlane.f32.xlu1 %v861_v41  ;;  %859 = vadd.xlane.f32.xlu0 %v858_v43  ;;  %v135_v41 = vld [vmem:[%s9469_s0 + $0x3c0] sm:$0xff] }
  0xe0   :  { %v653_v51 = vpop.xlane.xlu1 %652  ;;  %v2815_v52 = vsel %vm2640_vm7, %v2814_v44, %v2810_v50  ;;  %v650_v53 = vpop.xlane.xlu0 %649  ;;  %v888_v49 = vsel %vm527_vm0, %v135_v41, 0.0 }
  0xe1   :  { %v2824_v58 = vrot.slane %v653_v51, %v6281_v7  ;;  %v2819_v60 = vrot.slane %v650_v53, %v6293_v13  ;;  %v138_v53 = vld [vmem:[%s9469_s0 + $0x3d8] sm:$0xff] }
  0xe2   :  { %v897_v15 = vsel %vm527_vm0, %v138_v53, 0.0 }
  0xe3   :  { %v2820_v63 = vsel %vm9474_vm8, %v2819_v60, %v2815_v52  ;;  %868 = vadd.xlane.f32.xlu1 %v867_v54  ;;  %865 = vadd.xlane.f32.xlu0 %v864_v55  ;;  %v137_v54 = vld [vmem:[%s9469_s0 + $0x3d0] sm:$0xff] }
  0xe4   :  { %v659_v0 = vpop.xlane.xlu1 %658  ;;  %v2825_v2 = vsel %vm2654_vm9, %v2824_v58, %v2820_v63  ;;  %v656_v3 = vpop.xlane.xlu0 %655  ;;  %v894_v62 = vsel %vm527_vm0, %v137_v54, 0.0 }
  0xe5   :  { %v2834_v6 = vrot.slane %v659_v0, %v6301_v23  ;;  %v2829_v8 = vrot.slane %v656_v3, %v6313_v29  ;;  %v139_v3 = vld [vmem:[%s9469_s0 + $0x3e0] sm:$0xff] }
  0xe6   :  { %v900_v10 = vsel %vm527_vm0, %v139_v3, 0.0 }
  0xe7   :  { %v2830_v11 = vsel %vm9475_vm10, %v2829_v8, %v2825_v2  ;;  %874 = vadd.xlane.f32.xlu1 %v873_v4  ;;  %871 = vadd.xlane.f32.xlu0 %v870_v5  ;;  %v140_v2 = vld [vmem:[%s9469_s0 + $0x3e8] sm:$0xff] }
  0xe8   :  { %v665_v12 = vpop.xlane.xlu1 %664  ;;  %v2835_v14 = vsel %vm2668_vm11, %v2834_v6, %v2830_v11  ;;  %v662_v16 = vpop.xlane.xlu0 %661  ;;  %v903_v9 = vsel %vm527_vm0, %v140_v2, 0.0 }
  0xe9   :  { %v2844_v21 = vrot.slane %v665_v12, %v6327_v46  ;;  %v2839_v22 = vrot.slane %v662_v16, %v6321_v42  ;;  %v141_v16 = vld [vmem:[%s9469_s0 + $0x3f0] sm:$0xff] }
  0xea   :  { %v906_v25 = vsel %vm527_vm0, %v141_v16, 0.0 }
  0xeb   :  { %v2840_v26 = vsel %vm9473_vm12, %v2839_v22, %v2835_v14  ;;  %880 = vadd.xlane.f32.xlu1 %v879_v17  ;;  %877 = vadd.xlane.f32.xlu0 %v876_v20  ;;  %v142_v14 = vld [vmem:[%s9469_s0 + $0x3f8] sm:$0xff] }
  0xec   :  { %v671_v27 = vpop.xlane.xlu1 %670  ;;  %v2845_v28 = vsel %vm2682_vm13, %v2844_v21, %v2840_v26  ;;  %v668_v33 = vpop.xlane.xlu0 %667  ;;  %v909_v24 = vsel %vm527_vm0, %v142_v14, 0.0 }
  0xed   :  { %v2854_v37 = vrot.slane %v671_v27, %v6346_v61  ;;  %v2849_v38 = vrot.slane %v668_v33, %v6341_v59  ;;  %v143_v33 = vld [vmem:[%s9469_s0 + $0x400] sm:$0xff] }
  0xee   :  { %v912_v41 = vsel %vm527_vm0, %v143_v33, 0.0 }
  0xef   :  { %v2850_v43 = vsel %vm2689_vm14, %v2849_v38, %v2845_v28  ;;  %886 = vadd.xlane.f32.xlu1 %v885_v34  ;;  %883 = vadd.xlane.f32.xlu0 %v882_v36  ;;  %v144_v28 = vld [vmem:[%s9469_s0 + $0x408] sm:$0xff] }
  0xf0   :  { %v677_v44 = vpop.xlane.xlu1 %676  ;;  %v674_v45 = vpop.xlane.xlu0 %673  ;;  %v6564_v50 = vsel %vm2696_vm15, %v2854_v37, %v2850_v43  ;;  %v915_v39 = vsel %vm527_vm0, %v144_v28, 0.0 }
  0xf1   :  { %v2863_v51 = vrot.slane %v677_v44, %v6226_v32  ;;  %v2859_v52 = vrot.slane %v674_v45, %v6220_v30  ;;  %v146_v45 = vld [vmem:[%s9469_s0 + $0x418] sm:$0xff] }
  0xf2   :  { %v921_v54 = vsel %vm527_vm0, %v146_v45, 0.0 }
  0xf3   :  { %v2864_v55 = vsel %vm2598_vm1, %v2863_v51, %v2859_v52  ;;  %892 = vadd.xlane.f32.xlu1 %v891_v47  ;;  %889 = vadd.xlane.f32.xlu0 %v888_v49  ;;  %v145_v47 = vld [vmem:[%s9469_s0 + $0x410] sm:$0xff] }
  0xf4   :  { %v683_v58 = vpop.xlane.xlu1 %682  ;;  %v680_v60 = vpop.xlane.xlu0 %679 }
  0xf5   :  { %v2873_v63 = vrot.slane %v683_v58, %v6223_v31  ;;  %v2868_v0 = vrot.slane %v680_v60, %v6233_v35 }
  0xf7   :  { %v2869_v4 = vsel %vm2605_vm2, %v2868_v0, %v2864_v55  ;;  %898 = vadd.xlane.f32.xlu1 %v897_v15  ;;  %895 = vadd.xlane.f32.xlu0 %v894_v62  ;;  %v918_v55 = vsel %vm527_vm0, %v145_v47, 0.0  ;;  %v148_v15 = vld [vmem:[%s9469_s0 + $0x428] sm:$0xff]  ;;  %v147_v62 = vld [vmem:[%s9469_s0 + $0x420] sm:$0xff] }
  0xf8   :  { %v689_v5 = vpop.xlane.xlu1 %688  ;;  %v2874_v6 = vsel %vm2612_vm3, %v2873_v63, %v2869_v4  ;;  %v686_v8 = vpop.xlane.xlu0 %685  ;;  %v927_v4 = vsel %vm527_vm0, %v148_v15, 0.0 }
  0xf9   :  { %v2883_v11 = vrot.slane %v689_v5, %v6238_v40  ;;  %v2878_v12 = vrot.slane %v686_v8, %v6252_v48  ;;  %v924_v5 = vsel %vm527_vm0, %v147_v62, 0.0 }
  0xfb   :  { %v2879_v17 = vsel %vm2619_vm4, %v2878_v12, %v2874_v6  ;;  %904 = vadd.xlane.f32.xlu1 %v903_v9  ;;  %901 = vadd.xlane.f32.xlu0 %v900_v10  ;;  %v150_v9 = vld [vmem:[%s9469_s0 + $0x438] sm:$0xff]  ;;  %v149_v10 = vld [vmem:[%s9469_s0 + $0x430] sm:$0xff] }
  0xfc   :  { %v695_v20 = vpop.xlane.xlu1 %694  ;;  %v2884_v21 = vsel %vm9476_vm5, %v2883_v11, %v2879_v17  ;;  %v692_v22 = vpop.xlane.xlu0 %691  ;;  %v933_v16 = vsel %vm527_vm0, %v150_v9, 0.0  ;;  %v930_v17 = vsel %vm527_vm0, %v149_v10, 0.0 }
  0xfd   :  { %v2893_v26 = vrot.slane %v695_v20, %v6260_v56  ;;  %v2888_v27 = vrot.slane %v692_v22, %v6263_v57 }
  0xff   :  { %v2889_v34 = vsel %vm2633_vm6, %v2888_v27, %v2884_v21  ;;  %910 = vadd.xlane.f32.xlu1 %v909_v24  ;;  %907 = vadd.xlane.f32.xlu0 %v906_v25  ;;  %v152_v24 = vld [vmem:[%s9469_s0 + $0x448] sm:$0xff]  ;;  %v151_v25 = vld [vmem:[%s9469_s0 + $0x440] sm:$0xff] }
 0x100   :  { %v701_v36 = vpop.xlane.xlu1 %700  ;;  %v2894_v37 = vsel %vm2640_vm7, %v2893_v26, %v2889_v34  ;;  %v698_v38 = vpop.xlane.xlu0 %697  ;;  %v939_v33 = vsel %vm527_vm0, %v152_v24, 0.0  ;;  %v936_v34 = vsel %vm527_vm0, %v151_v25, 0.0 }
 0x101   :  { %v2903_v43 = vrot.slane %v701_v36, %v6281_v7  ;;  %v2898_v44 = vrot.slane %v698_v38, %v6293_v13 }
 0x103   :  { %v2899_v49 = vsel %vm9474_vm8, %v2898_v44, %v2894_v37  ;;  %916 = vadd.xlane.f32.xlu1 %v915_v39  ;;  %913 = vadd.xlane.f32.xlu0 %v912_v41  ;;  %v154_v39 = vld [vmem:[%s9469_s0 + $0x458] sm:$0xff]  ;;  %v153_v41 = vld [vmem:[%s9469_s0 + $0x450] sm:$0xff] }
 0x104   :  { %v707_v51 = vpop.xlane.xlu1 %706  ;;  %v2904_v52 = vsel %vm2654_vm9, %v2903_v43, %v2899_v49  ;;  %v704_v53 = vpop.xlane.xlu0 %703  ;;  %v945_v47 = vsel %vm527_vm0, %v154_v39, 0.0  ;;  %v942_v49 = vsel %vm527_vm0, %v153_v41, 0.0 }
 0x105   :  { %v2913_v58 = vrot.slane %v707_v51, %v6301_v23  ;;  %v2908_v60 = vrot.slane %v704_v53, %v6313_v29  ;;  %v156_v53 = vld [vmem:[%s9469_s0 + $0x468] sm:$0xff] }
 0x106   :  { %v951_v62 = vsel %vm527_vm0, %v156_v53, 0.0 }
 0x107   :  { %v2909_v63 = vsel %vm9475_vm10, %v2908_v60, %v2904_v52  ;;  %922 = vadd.xlane.f32.xlu1 %v921_v54  ;;  %919 = vadd.xlane.f32.xlu0 %v918_v55  ;;  %v155_v54 = vld [vmem:[%s9469_s0 + $0x460] sm:$0xff] }
 0x108   :  { %v713_v0 = vpop.xlane.xlu1 %712  ;;  %v2914_v2 = vsel %vm2668_vm11, %v2913_v58, %v2909_v63  ;;  %v710_v3 = vpop.xlane.xlu0 %709  ;;  %v948_v63 = vsel %vm527_vm0, %v155_v54, 0.0 }
 0x109   :  { %v2923_v6 = vrot.slane %v713_v0, %v6327_v46  ;;  %v2918_v8 = vrot.slane %v710_v3, %v6321_v42  ;;  %v158_v3 = vld [vmem:[%s9469_s0 + $0x478] sm:$0xff] }
 0x10a   :  { %v957_v10 = vsel %vm527_vm0, %v158_v3, 0.0 }
 0x10b   :  { %v2919_v11 = vsel %vm9473_vm12, %v2918_v8, %v2914_v2  ;;  %928 = vadd.xlane.f32.xlu1 %v927_v4  ;;  %925 = vadd.xlane.f32.xlu0 %v924_v5  ;;  %v157_v4 = vld [vmem:[%s9469_s0 + $0x470] sm:$0xff] }
 0x10c   :  { %v719_v12 = vpop.xlane.xlu1 %718  ;;  %v716_v14 = vpop.xlane.xlu0 %715  ;;  %v2924_v20 = vsel %vm2682_vm13, %v2923_v6, %v2919_v11  ;;  %v954_v11 = vsel %vm527_vm0, %v157_v4, 0.0 }
 0x10d   :  { %v2933_v21 = vrot.slane %v719_v12, %v6346_v61  ;;  %v2928_v22 = vrot.slane %v716_v14, %v6341_v59 }
 0x10f   :  { %934 = vadd.xlane.f32.xlu1 %v933_v16  ;;  %931 = vadd.xlane.f32.xlu0 %v930_v17  ;;  %v2929_v26 = vsel %vm2689_vm14, %v2928_v22, %v2924_v20  ;;  %v160_v16 = vld [vmem:[%s9469_s0 + $0x488] sm:$0xff]  ;;  %v159_v17 = vld [vmem:[%s9469_s0 + $0x480] sm:$0xff] }
 0x110   :  { %v725_v27 = vpop.xlane.xlu1 %724  ;;  %v722_v28 = vpop.xlane.xlu0 %721  ;;  %v6661_v36 = vsel %vm2696_vm15, %v2933_v21, %v2929_v26  ;;  %v963_v25 = vsel %vm527_vm0, %v160_v16, 0.0  ;;  %v960_v26 = vsel %vm527_vm0, %v159_v17, 0.0 }
 0x111   :  { %v2942_v37 = vrot.slane %v725_v27, %v6226_v32  ;;  %v2938_v38 = vrot.slane %v722_v28, %v6220_v30 }
 0x113   :  { %v2943_v43 = vsel %vm2598_vm1, %v2942_v37, %v2938_v38  ;;  %940 = vadd.xlane.f32.xlu1 %v939_v33  ;;  %937 = vadd.xlane.f32.xlu0 %v936_v34  ;;  %v162_v33 = vld [vmem:[%s9469_s0 + $0x498] sm:$0xff]  ;;  %v161_v34 = vld [vmem:[%s9469_s0 + $0x490] sm:$0xff] }
 0x114   :  { %v731_v44 = vpop.xlane.xlu1 %730  ;;  %v728_v45 = vpop.xlane.xlu0 %727 }
 0x115   :  { %v2952_v51 = vrot.slane %v731_v44, %v6223_v31  ;;  %v2947_v52 = vrot.slane %v728_v45, %v6233_v35  ;;  %v966_v44 = vsel %vm527_vm0, %v161_v34, 0.0 }
 0x117   :  { %v2948_v55 = vsel %vm2605_vm2, %v2947_v52, %v2943_v43  ;;  %946 = vadd.xlane.f32.xlu1 %v945_v47  ;;  %943 = vadd.xlane.f32.xlu0 %v942_v49  ;;  %v969_v43 = vsel %vm527_vm0, %v162_v33, 0.0  ;;  %v164_v49 = vld [vmem:[%s9469_s0 + $0x4a8] sm:$0xff] }
 0x118   :  { %v737_v58 = vpop.xlane.xlu1 %736  ;;  %v2953_v60 = vsel %vm2612_vm3, %v2952_v51, %v2948_v55  ;;  %v734_v15 = vpop.xlane.xlu0 %733  ;;  %v163_v51 = vld [vmem:[%s9469_s0 + $0x4a0] sm:$0xff] }
 0x119   :  { %v2962_v0 = vrot.slane %v737_v58, %v6238_v40  ;;  %v2957_v2 = vrot.slane %v734_v15, %v6252_v48  ;;  %v975_v58 = vsel %vm527_vm0, %v164_v49, 0.0 }
 0x11b   :  { %v2958_v5 = vsel %vm2619_vm4, %v2957_v2, %v2953_v60  ;;  %952 = vadd.xlane.f32.xlu1 %v951_v62  ;;  %949 = vadd.xlane.f32.xlu0 %v948_v63  ;;  %v972_v60 = vsel %vm527_vm0, %v163_v51, 0.0  ;;  %v166_v63 = vld [vmem:[%s9469_s0 + $0x4b8] sm:$0xff] }
 0x11c   :  { %v743_v6 = vpop.xlane.xlu1 %742  ;;  %v2963_v8 = vsel %vm9476_vm5, %v2962_v0, %v2958_v5  ;;  %v740_v9 = vpop.xlane.xlu0 %739  ;;  %v165_v0 = vld [vmem:[%s9469_s0 + $0x4b0] sm:$0xff] }
 0x11d   :  { %v2972_v12 = vrot.slane %v743_v6, %v6260_v56  ;;  %v2967_v14 = vrot.slane %v740_v9, %v6263_v57  ;;  %v981_v6 = vsel %vm527_vm0, %v166_v63, 0.0 }
 0x11f   :  { %v2968_v20 = vsel %vm2633_vm6, %v2967_v14, %v2963_v8  ;;  %958 = vadd.xlane.f32.xlu1 %v957_v10  ;;  %955 = vadd.xlane.f32.xlu0 %v954_v11  ;;  %v978_v8 = vsel %vm527_vm0, %v165_v0, 0.0  ;;  %v168_v11 = vld [vmem:[%s9469_s0 + $0x4c8] sm:$0xff] }
 0x120   :  { %v749_v21 = vpop.xlane.xlu1 %748  ;;  %v2973_v22 = vsel %vm2640_vm7, %v2972_v12, %v2968_v20  ;;  %v746_v24 = vpop.xlane.xlu0 %745  ;;  %v167_v12 = vld [vmem:[%s9469_s0 + $0x4c0] sm:$0xff]  ;;  %v987_v20 = vsel %vm527_vm0, %v168_v11, 0.0 }
 0x121   :  { %v2982_v27 = vrot.slane %v749_v21, %v6281_v7  ;;  %v2977_v28 = vrot.slane %v746_v24, %v6293_v13  ;;  %v984_v21 = vsel %vm527_vm0, %v167_v12, 0.0 }
 0x123   :  { %v2978_v37 = vsel %vm9474_vm8, %v2977_v28, %v2973_v22  ;;  %964 = vadd.xlane.f32.xlu1 %v963_v25  ;;  %961 = vadd.xlane.f32.xlu0 %v960_v26  ;;  %v170_v26 = vld [vmem:[%s9469_s0 + $0x4d8] sm:$0xff] }
 0x124   :  { %v755_v38 = vpop.xlane.xlu1 %754  ;;  %v2983_v39 = vsel %vm2654_vm9, %v2982_v27, %v2978_v37  ;;  %v752_v41 = vpop.xlane.xlu0 %751  ;;  %v169_v27 = vld [vmem:[%s9469_s0 + $0x4d0] sm:$0xff]  ;;  %v993_v37 = vsel %vm527_vm0, %v170_v26, 0.0 }
 0x125   :  { %v2992_v45 = vrot.slane %v755_v38, %v6301_v23  ;;  %v2987_v47 = vrot.slane %v752_v41, %v6313_v29  ;;  %v990_v38 = vsel %vm527_vm0, %v169_v27, 0.0 }
 0x127   :  { %v2988_v52 = vsel %vm9475_vm10, %v2987_v47, %v2983_v39  ;;  %970 = vadd.xlane.f32.xlu1 %v969_v43  ;;  %967 = vadd.xlane.f32.xlu0 %v966_v44  ;;  %v172_v43 = vld [vmem:[%s9469_s0 + $0x4e8] sm:$0xff]  ;;  %v171_v44 = vld [vmem:[%s9469_s0 + $0x4e0] sm:$0xff] }
 0x128   :  { %v761_v53 = vpop.xlane.xlu1 %760  ;;  %v2993_v54 = vsel %vm2668_vm11, %v2992_v45, %v2988_v52  ;;  %v758_v55 = vpop.xlane.xlu0 %757  ;;  %v999_v52 = vsel %vm527_vm0, %v172_v43, 0.0 }
 0x129   :  { %v3002_v15 = vrot.slane %v761_v53, %v6327_v46  ;;  %v2997_v62 = vrot.slane %v758_v55, %v6321_v42  ;;  %v996_v53 = vsel %vm527_vm0, %v171_v44, 0.0 }
 0x12b   :  { %v2998_v2 = vsel %vm9473_vm12, %v2997_v62, %v2993_v54  ;;  %976 = vadd.xlane.f32.xlu1 %v975_v58  ;;  %973 = vadd.xlane.f32.xlu0 %v972_v60  ;;  %v174_v58 = vld [vmem:[%s9469_s0 + $0x4f8] sm:$0xff]  ;;  %v173_v60 = vld [vmem:[%s9469_s0 + $0x4f0] sm:$0xff] }
 0x12c   :  { %v767_v3 = vpop.xlane.xlu1 %766  ;;  %v3003_v4 = vsel %vm2682_vm13, %v3002_v15, %v2998_v2  ;;  %v764_v5 = vpop.xlane.xlu0 %763  ;;  %v1005_v2 = vsel %vm527_vm0, %v174_v58, 0.0 }
 0x12d   :  { %v3012_v9 = vrot.slane %v767_v3, %v6346_v61  ;;  %v3007_v10 = vrot.slane %v764_v5, %v6341_v59  ;;  %v1002_v3 = vsel %vm527_vm0, %v173_v60, 0.0 }
 0x12f   :  { %v3008_v14 = vsel %vm2689_vm14, %v3007_v10, %v3003_v4  ;;  %982 = vadd.xlane.f32.xlu1 %v981_v6  ;;  %979 = vadd.xlane.f32.xlu0 %v978_v8  ;;  %v176_v6 = vld [vmem:[%s9469_s0 + $0x508] sm:$0xff]  ;;  %v175_v8 = vld [vmem:[%s9469_s0 + $0x500] sm:$0xff] }
 0x130   :  { %v773_v16 = vpop.xlane.xlu1 %772  ;;  %v770_v17 = vpop.xlane.xlu0 %769  ;;  %v6758_v22 = vsel %vm2696_vm15, %v3012_v9, %v3008_v14  ;;  %v1011_v14 = vsel %vm527_vm0, %v176_v6, 0.0 }
 0x131   :  { %v3021_v24 = vrot.slane %v773_v16, %v6226_v32  ;;  %v3017_v25 = vrot.slane %v770_v17, %v6220_v30  ;;  %v1008_v16 = vsel %vm527_vm0, %v175_v8, 0.0 }
 0x133   :  { %v3022_v28 = vsel %vm2598_vm1, %v3021_v24, %v3017_v25  ;;  %988 = vadd.xlane.f32.xlu1 %v987_v20  ;;  %985 = vadd.xlane.f32.xlu0 %v984_v21  ;;  %v178_v21 = vld [vmem:[%s9469_s0 + $0x518] sm:$0xff]  ;;  %v177_v24 = vld [vmem:[%s9469_s0 + $0x510] sm:$0xff] }
 0x134   :  { %v779_v33 = vpop.xlane.xlu1 %778  ;;  %v776_v34 = vpop.xlane.xlu0 %775 }
 0x135   :  { %v3031_v39 = vrot.slane %v779_v33, %v6223_v31  ;;  %v3026_v41 = vrot.slane %v776_v34, %v6233_v35  ;;  %v1017_v33 = vsel %vm527_vm0, %v178_v21, 0.0  ;;  %v1014_v34 = vsel %vm527_vm0, %v177_v24, 0.0 }
 0x137   :  { %v3027_v45 = vsel %vm2605_vm2, %v3026_v41, %v3022_v28  ;;  %994 = vadd.xlane.f32.xlu1 %v993_v37  ;;  %991 = vadd.xlane.f32.xlu0 %v990_v38  ;;  %v179_v41 = vld [vmem:[%s9469_s0 + $0x520] sm:$0xff] }
 0x138   :  { %v785_v47 = vpop.xlane.xlu1 %784  ;;  %v3032_v49 = vsel %vm2612_vm3, %v3031_v39, %v3027_v45  ;;  %v782_v51 = vpop.xlane.xlu0 %781  ;;  %v180_v39 = vld [vmem:[%s9469_s0 + $0x528] sm:$0xff] }
 0x139   :  { %v3041_v54 = vrot.slane %v785_v47, %v6238_v40  ;;  %v3036_v55 = vrot.slane %v782_v51, %v6252_v48  ;;  %v1020_v51 = vsel %vm527_vm0, %v179_v41, 0.0 }
 0x13b   :  { %v3037_v15 = vsel %vm2619_vm4, %v3036_v55, %v3032_v49  ;;  %1000 = vadd.xlane.f32.xlu1 %v999_v52  ;;  %997 = vadd.xlane.f32.xlu0 %v996_v53  ;;  %v1023_v49 = vsel %vm527_vm0, %v180_v39, 0.0  ;;  %v181_v55 = vld [vmem:[%s9469_s0 + $0x530] sm:$0xff] }
 0x13c   :  { %v791_v62 = vpop.xlane.xlu1 %790  ;;  %v3042_v63 = vsel %vm9476_vm5, %v3041_v54, %v3037_v15  ;;  %v788_v0 = vpop.xlane.xlu0 %787  ;;  %v182_v54 = vld [vmem:[%s9469_s0 + $0x538] sm:$0xff] }
 0x13d   :  { %v3051_v4 = vrot.slane %v791_v62, %v6260_v56  ;;  %v3046_v5 = vrot.slane %v788_v0, %v6263_v57  ;;  %v1029_v62 = vsel %vm527_vm0, %v182_v54, 0.0 }
 0x13f   :  { %v3047_v9 = vsel %vm2633_vm6, %v3046_v5, %v3042_v63  ;;  %1006 = vadd.xlane.f32.xlu1 %v1005_v2  ;;  %1003 = vadd.xlane.f32.xlu0 %v1002_v3  ;;  %v1026_v63 = vsel %vm527_vm0, %v181_v55, 0.0  ;;  %v183_v5 = vld [vmem:[%s9469_s0 + $0x540] sm:$0xff] }
 0x140   :  { %v797_v10 = vpop.xlane.xlu1 %796  ;;  %v3052_v11 = vsel %vm2640_vm7, %v3051_v4, %v3047_v9  ;;  %v794_v12 = vpop.xlane.xlu0 %793  ;;  %v184_v4 = vld [vmem:[%s9469_s0 + $0x548] sm:$0xff] }
 0x141   :  { %v3061_v17 = vrot.slane %v797_v10, %v6281_v7  ;;  %v3056_v20 = vrot.slane %v794_v12, %v6293_v13  ;;  %v1035_v10 = vsel %vm527_vm0, %v184_v4, 0.0 }
 0x143   :  { %v3057_v25 = vsel %vm9474_vm8, %v3056_v20, %v3052_v11  ;;  %1012 = vadd.xlane.f32.xlu1 %v1011_v14  ;;  %1009 = vadd.xlane.f32.xlu0 %v1008_v16  ;;  %v1032_v11 = vsel %vm527_vm0, %v183_v5, 0.0  ;;  %v185_v20 = vld [vmem:[%s9469_s0 + $0x550] sm:$0xff] }
 0x144   :  { %v803_v26 = vpop.xlane.xlu1 %802  ;;  %v3062_v27 = vsel %vm2654_vm9, %v3061_v17, %v3057_v25  ;;  %v800_v28 = vpop.xlane.xlu0 %799  ;;  %v186_v17 = vld [vmem:[%s9469_s0 + $0x558] sm:$0xff] }
 0x145   :  { %v3071_v37 = vrot.slane %v803_v26, %v6301_v23  ;;  %v3066_v38 = vrot.slane %v800_v28, %v6313_v29  ;;  %v1041_v26 = vsel %vm527_vm0, %v186_v17, 0.0 }
 0x147   :  { %v3067_v43 = vsel %vm9475_vm10, %v3066_v38, %v3062_v27  ;;  %1018 = vadd.xlane.f32.xlu1 %v1017_v33  ;;  %1015 = vadd.xlane.f32.xlu0 %v1014_v34  ;;  %v1038_v27 = vsel %vm527_vm0, %v185_v20, 0.0  ;;  %v188_v34 = vld [vmem:[%s9469_s0 + $0x568] sm:$0xff] }
 0x148   :  { %v809_v44 = vpop.xlane.xlu1 %808  ;;  %v3072_v45 = vsel %vm2668_vm11, %v3071_v37, %v3067_v43  ;;  %v806_v47 = vpop.xlane.xlu0 %805  ;;  %v187_v37 = vld [vmem:[%s9469_s0 + $0x560] sm:$0xff] }
 0x149   :  { %v3081_v52 = vrot.slane %v809_v44, %v6327_v46  ;;  %v3076_v53 = vrot.slane %v806_v47, %v6321_v42  ;;  %v1047_v44 = vsel %vm527_vm0, %v188_v34, 0.0  ;;  %v195_v34 = vld [vmem:[%s9469_s0 + $0x5a0] sm:$0xff] }
 0x14b   :  { %v3077_v58 = vsel %vm9473_vm12, %v3076_v53, %v3072_v45  ;;  %1024 = vadd.xlane.f32.xlu1 %v1023_v49  ;;  %1021 = vadd.xlane.f32.xlu0 %v1020_v51  ;;  %v1044_v45 = vsel %vm527_vm0, %v187_v37, 0.0  ;;  %v190_v51 = vld [vmem:[%s9469_s0 + $0x578] sm:$0xff] }
 0x14c   :  { %v815_v60 = vpop.xlane.xlu1 %814  ;;  %v812_v15 = vpop.xlane.xlu0 %811  ;;  %v3082_v0 = vsel %vm2682_vm13, %v3081_v52, %v3077_v58  ;;  %v189_v52 = vld [vmem:[%s9469_s0 + $0x570] sm:$0xff] }
 0x14d   :  { %v3091_v2 = vrot.slane %v815_v60, %v6346_v61  ;;  %v3086_v3 = vrot.slane %v812_v15, %v6341_v59  ;;  %v1053_v60 = vsel %vm527_vm0, %v190_v51, 0.0  ;;  %v1050_v15 = vsel %vm527_vm0, %v189_v52, 0.0  ;;  %v197_v51 = vld [vmem:[%s9469_s0 + $0x5b0] sm:$0xff] }
 0x14f   :  { %1030 = vadd.xlane.f32.xlu1 %v1029_v62  ;;  %1027 = vadd.xlane.f32.xlu0 %v1026_v63  ;;  %v3087_v6 = vsel %vm2689_vm14, %v3086_v3, %v3082_v0  ;;  %v192_v0 = vld [vmem:[%s9469_s0 + $0x588] sm:$0xff] }
 0x150   :  { %v821_v8 = vpop.xlane.xlu1 %820  ;;  %v818_v9 = vpop.xlane.xlu0 %817  ;;  %v6855_v12 = vsel %vm2696_vm15, %v3091_v2, %v3087_v6  ;;  %v191_v2 = vld [vmem:[%s9469_s0 + $0x580] sm:$0xff] }
 0x151   :  { %v3100_v14 = vrot.slane %v821_v8, %v6226_v32  ;;  %v3096_v16 = vrot.slane %v818_v9, %v6220_v30  ;;  %v1059_v8 = vsel %vm527_vm0, %v192_v0, 0.0  ;;  %v1056_v9 = vsel %vm527_vm0, %v191_v2, 0.0  ;;  %v199_v0 = vld [vmem:[%s9469_s0 + $0x5c0] sm:$0xff] }
 0x153   :  { %v3101_v21 = vsel %vm2598_vm1, %v3100_v14, %v3096_v16  ;;  %1036 = vadd.xlane.f32.xlu1 %v1035_v10  ;;  %1033 = vadd.xlane.f32.xlu0 %v1032_v11  ;;  %v194_v14 = vld [vmem:[%s9469_s0 + $0x598] sm:$0xff]  ;;  %v193_v16 = vld [vmem:[%s9469_s0 + $0x590] sm:$0xff] }
 0x154   :  { %v827_v24 = vpop.xlane.xlu1 %826  ;;  %v824_v25 = vpop.xlane.xlu0 %823 }
 0x155   :  { %v3110_v28 = vrot.slane %v827_v24, %v6223_v31  ;;  %v3105_v33 = vrot.slane %v824_v25, %v6233_v35  ;;  %v1065_v25 = vsel %vm527_vm0, %v194_v14, 0.0  ;;  %v201_v14 = vld [vmem:[%s9469_s0 + $0x5d0] sm:$0xff] }
 0x157   :  { %v3106_v38 = vsel %vm2605_vm2, %v3105_v33, %v3101_v21  ;;  %1042 = vadd.xlane.f32.xlu1 %v1041_v26  ;;  %1039 = vadd.xlane.f32.xlu0 %v1038_v27  ;;  %v1062_v26 = vsel %vm527_vm0, %v193_v16, 0.0  ;;  %v196_v33 = vld [vmem:[%s9469_s0 + $0x5a8] sm:$0xff] }
 0x158   :  { %v833_v39 = vpop.xlane.xlu1 %832  ;;  %v3111_v41 = vsel %vm2612_vm3, %v3110_v28, %v3106_v38  ;;  %v830_v43 = vpop.xlane.xlu0 %829 }
 0x159   :  { %v3120_v47 = vrot.slane %v833_v39, %v6238_v40  ;;  %v3115_v49 = vrot.slane %v830_v43, %v6252_v48  ;;  %v1071_v43 = vsel %vm527_vm0, %v196_v33, 0.0 }
 0x15b   :  { %v3116_v53 = vsel %vm2619_vm4, %v3115_v49, %v3111_v41  ;;  %1048 = vadd.xlane.f32.xlu1 %v1047_v44  ;;  %1045 = vadd.xlane.f32.xlu0 %v1044_v45  ;;  %v1068_v44 = vsel %vm527_vm0, %v195_v34, 0.0  ;;  %v198_v49 = vld [vmem:[%s9469_s0 + $0x5b8] sm:$0xff] }
 0x15c   :  { %v839_v54 = vpop.xlane.xlu1 %838  ;;  %v3121_v55 = vsel %vm9476_vm5, %v3120_v47, %v3116_v53  ;;  %v836_v58 = vpop.xlane.xlu0 %835 }
 0x15d   :  { %v3130_v62 = vrot.slane %v839_v54, %v6260_v56  ;;  %v3125_v63 = vrot.slane %v836_v58, %v6263_v57  ;;  %v1077_v58 = vsel %vm527_vm0, %v198_v49, 0.0 }
 0x15f   :  { %v3126_v3 = vsel %vm2633_vm6, %v3125_v63, %v3121_v55  ;;  %1054 = vadd.xlane.f32.xlu1 %v1053_v60  ;;  %1051 = vadd.xlane.f32.xlu0 %v1050_v15  ;;  %v1074_v60 = vsel %vm527_vm0, %v197_v51, 0.0  ;;  %v200_v63 = vld [vmem:[%s9469_s0 + $0x5c8] sm:$0xff] }
 0x160   :  { %v845_v4 = vpop.xlane.xlu1 %844  ;;  %v3131_v5 = vsel %vm2640_vm7, %v3130_v62, %v3126_v3  ;;  %v842_v6 = vpop.xlane.xlu0 %841 }
 0x161   :  { %v3140_v10 = vrot.slane %v845_v4, %v6281_v7  ;;  %v3135_v11 = vrot.slane %v842_v6, %v6293_v13  ;;  %v1080_v6 = vsel %vm527_vm0, %v199_v0, 0.0 }
 0x163   :  { %v3136_v17 = vsel %vm9474_vm8, %v3135_v11, %v3131_v5  ;;  %1060 = vadd.xlane.f32.xlu1 %v1059_v8  ;;  %1057 = vadd.xlane.f32.xlu0 %v1056_v9  ;;  %v1083_v5 = vsel %vm527_vm0, %v200_v63, 0.0  ;;  %v202_v11 = vld [vmem:[%s9469_s0 + $0x5d8] sm:$0xff] }
 0x164   :  { %v851_v20 = vpop.xlane.xlu1 %850  ;;  %v3141_v21 = vsel %vm2654_vm9, %v3140_v10, %v3136_v17  ;;  %v848_v24 = vpop.xlane.xlu0 %847 }
 0x165   :  { %v3150_v27 = vrot.slane %v851_v20, %v6301_v23  ;;  %v3145_v28 = vrot.slane %v848_v24, %v6313_v29  ;;  %v1086_v24 = vsel %vm527_vm0, %v201_v14, 0.0 }
 0x167   :  { %v3146_v37 = vsel %vm9475_vm10, %v3145_v28, %v3141_v21  ;;  %1066 = vadd.xlane.f32.xlu1 %v1065_v25  ;;  %1063 = vadd.xlane.f32.xlu0 %v1062_v26  ;;  %v1089_v21 = vsel %vm527_vm0, %v202_v11, 0.0  ;;  %v203_v28 = vld [vmem:[%s9469_s0 + $0x5e0] sm:$0xff]  ;;  %v209_v11 = vld [vmem:[%s9469_s0 + $0x610] sm:$0xff] }
 0x168   :  { %v857_v38 = vpop.xlane.xlu1 %856  ;;  %v3151_v39 = vsel %vm2668_vm11, %v3150_v27, %v3146_v37  ;;  %v854_v41 = vpop.xlane.xlu0 %853  ;;  %v204_v27 = vld [vmem:[%s9469_s0 + $0x5e8] sm:$0xff] }
 0x169   :  { %v3160_v45 = vrot.slane %v857_v38, %v6327_v46  ;;  %v3155_v47 = vrot.slane %v854_v41, %v6321_v42  ;;  %v1092_v41 = vsel %vm527_vm0, %v203_v28, 0.0  ;;  %v211_v28 = vld [vmem:[%s9469_s0 + $0x620] sm:$0xff] }
 0x16b   :  { %v3156_v52 = vsel %vm9473_vm12, %v3155_v47, %v3151_v39  ;;  %1072 = vadd.xlane.f32.xlu1 %v1071_v43  ;;  %1069 = vadd.xlane.f32.xlu0 %v1068_v44  ;;  %v1095_v39 = vsel %vm527_vm0, %v204_v27, 0.0  ;;  %v205_v47 = vld [vmem:[%s9469_s0 + $0x5f0] sm:$0xff]  ;;  %v212_v27 = vld [vmem:[%s9469_s0 + $0x628] sm:$0xff] }
 0x16c   :  { %v863_v53 = vpop.xlane.xlu1 %862  ;;  %v3161_v54 = vsel %vm2682_vm13, %v3160_v45, %v3156_v52  ;;  %v860_v55 = vpop.xlane.xlu0 %859  ;;  %v206_v45 = vld [vmem:[%s9469_s0 + $0x5f8] sm:$0xff] }
 0x16d   :  { %v3170_v15 = vrot.slane %v863_v53, %v6346_v61  ;;  %v3165_v62 = vrot.slane %v860_v55, %v6341_v59  ;;  %v1098_v55 = vsel %vm527_vm0, %v205_v47, 0.0  ;;  %v213_v47 = vld [vmem:[%s9469_s0 + $0x630] sm:$0xff] }
 0x16f   :  { %v3166_v2 = vsel %vm2689_vm14, %v3165_v62, %v3161_v54  ;;  %1078 = vadd.xlane.f32.xlu1 %v1077_v58  ;;  %1075 = vadd.xlane.f32.xlu0 %v1074_v60  ;;  %v1101_v54 = vsel %vm527_vm0, %v206_v45, 0.0  ;;  %v207_v62 = vld [vmem:[%s9469_s0 + $0x600] sm:$0xff]  ;;  %v214_v45 = vld [vmem:[%s9469_s0 + $0x638] sm:$0xff] }
 0x170   :  { %v869_v3 = vpop.xlane.xlu1 %868  ;;  %v866_v4 = vpop.xlane.xlu0 %865  ;;  %v6952_v8 = vsel %vm2696_vm15, %v3170_v15, %v3166_v2  ;;  %v208_v15 = vld [vmem:[%s9469_s0 + $0x608] sm:$0xff] }
 0x171   :  { %9477 = vst [vmem:[#allocation5_spill] sm:$0xff] %v6952_v8  ;;  %v3179_v9 = vrot.slane %v869_v3, %v6226_v32  ;;  %v3175_v10 = vrot.slane %v866_v4, %v6220_v30  ;;  %v1107_v4 = vsel %vm527_vm0, %v208_v15, 0.0  ;;  %v216_v15 = vld [vmem:[%s9469_s0 + $0x648] sm:$0xff]  ;;  %v491_v8 = vld [vmem:[%s9469_s0 + $0xee0] sm:$0xff] }
 0x173   :  { %v3180_v16 = vsel %vm2598_vm1, %v3179_v9, %v3175_v10  ;;  %1084 = vadd.xlane.f32.xlu1 %v1083_v5  ;;  %1081 = vadd.xlane.f32.xlu0 %v1080_v6  ;;  %v1104_v5 = vsel %vm527_vm0, %v207_v62, 0.0  ;;  %v210_v10 = vld [vmem:[%s9469_s0 + $0x618] sm:$0xff]  ;;  %v215_v62 = vld [vmem:[%s9469_s0 + $0x640] sm:$0xff] }
 0x174   :  { %v875_v17 = vpop.xlane.xlu1 %874  ;;  %v872_v20 = vpop.xlane.xlu0 %871 }
 0x175   :  { %v3189_v25 = vrot.slane %v875_v17, %v6223_v31  ;;  %v3184_v26 = vrot.slane %v872_v20, %v6233_v35 }
 0x177   :  { %v3185_v33 = vsel %vm2605_vm2, %v3184_v26, %v3180_v16  ;;  %1090 = vadd.xlane.f32.xlu1 %v1089_v21  ;;  %1087 = vadd.xlane.f32.xlu0 %v1086_v24  ;;  %v1113_v21 = vsel %vm527_vm0, %v210_v10, 0.0  ;;  %v1110_v24 = vsel %vm527_vm0, %v209_v11, 0.0  ;;  %v218_v10 = vld [vmem:[%s9469_s0 + $0x658] sm:$0xff]  ;;  %v217_v11 = vld [vmem:[%s9469_s0 + $0x650] sm:$0xff] }
 0x178   :  { %v881_v34 = vpop.xlane.xlu1 %880  ;;  %v3190_v37 = vsel %vm2612_vm3, %v3189_v25, %v3185_v33  ;;  %v878_v38 = vpop.xlane.xlu0 %877 }
 0x179   :  { %v3199_v43 = vrot.slane %v881_v34, %v6238_v40  ;;  %v3194_v44 = vrot.slane %v878_v38, %v6252_v48 }
 0x17b   :  { %v3195_v49 = vsel %vm2619_vm4, %v3194_v44, %v3190_v37  ;;  %1096 = vadd.xlane.f32.xlu1 %v1095_v39  ;;  %1093 = vadd.xlane.f32.xlu0 %v1092_v41  ;;  %v1119_v39 = vsel %vm527_vm0, %v212_v27, 0.0  ;;  %v1116_v41 = vsel %vm527_vm0, %v211_v28, 0.0  ;;  %v219_v27 = vld [vmem:[%s9469_s0 + $0x660] sm:$0xff] }
 0x17c   :  { %v887_v51 = vpop.xlane.xlu1 %886  ;;  %v3200_v52 = vsel %vm9476_vm5, %v3199_v43, %v3195_v49  ;;  %v884_v53 = vpop.xlane.xlu0 %883 }
 0x17d   :  { %v3209_v58 = vrot.slane %v887_v51, %v6260_v56  ;;  %v3204_v60 = vrot.slane %v884_v53, %v6263_v57  ;;  %v1125_v53 = vsel %vm527_vm0, %v214_v45, 0.0  ;;  %v221_v45 = vld [vmem:[%s9469_s0 + $0x670] sm:$0xff] }
 0x17f   :  { %v3205_v63 = vsel %vm2633_vm6, %v3204_v60, %v3200_v52  ;;  %1102 = vadd.xlane.f32.xlu1 %v1101_v54  ;;  %1099 = vadd.xlane.f32.xlu0 %v1098_v55  ;;  %v1122_v54 = vsel %vm527_vm0, %v213_v47, 0.0 }
 0x180   :  { %v893_v0 = vpop.xlane.xlu1 %892  ;;  %v3210_v2 = vsel %vm2640_vm7, %v3209_v58, %v3205_v63  ;;  %v890_v3 = vpop.xlane.xlu0 %889 }
 0x181   :  { %v3219_v6 = vrot.slane %v893_v0, %v6281_v7  ;;  %v3214_v9 = vrot.slane %v890_v3, %v6293_v13  ;;  %v1131_v3 = vsel %vm527_vm0, %v216_v15, 0.0  ;;  %v223_v15 = vld [vmem:[%s9469_s0 + $0x680] sm:$0xff] }
 0x183   :  { %v3215_v14 = vsel %vm9474_vm8, %v3214_v9, %v3210_v2  ;;  %1108 = vadd.xlane.f32.xlu1 %v1107_v4  ;;  %1105 = vadd.xlane.f32.xlu0 %v1104_v5  ;;  %v1128_v4 = vsel %vm527_vm0, %v215_v62, 0.0 }
 0x184   :  { %v899_v16 = vpop.xlane.xlu1 %898  ;;  %v3220_v17 = vsel %vm2654_vm9, %v3219_v6, %v3215_v14  ;;  %v896_v20 = vpop.xlane.xlu0 %895 }
 0x185   :  { %v3229_v25 = vrot.slane %v899_v16, %v6301_v23  ;;  %v3224_v26 = vrot.slane %v896_v20, %v6313_v29  ;;  %v1137_v20 = vsel %vm527_vm0, %v218_v10, 0.0  ;;  %v226_v10 = vld [vmem:[%s9469_s0 + $0x698] sm:$0xff] }
 0x187   :  { %v3225_v33 = vsel %vm9475_vm10, %v3224_v26, %v3220_v17  ;;  %1114 = vadd.xlane.f32.xlu1 %v1113_v21  ;;  %1111 = vadd.xlane.f32.xlu0 %v1110_v24  ;;  %v1134_v21 = vsel %vm527_vm0, %v217_v11, 0.0  ;;  %v220_v26 = vld [vmem:[%s9469_s0 + $0x668] sm:$0xff]  ;;  %v225_v11 = vld [vmem:[%s9469_s0 + $0x690] sm:$0xff] }
 0x188   :  { %v905_v34 = vpop.xlane.xlu1 %904  ;;  %v3230_v37 = vsel %vm2668_vm11, %v3229_v25, %v3225_v33  ;;  %v902_v38 = vpop.xlane.xlu0 %901 }
 0x189   :  { %v3239_v43 = vrot.slane %v905_v34, %v6327_v46  ;;  %v3234_v44 = vrot.slane %v902_v38, %v6321_v42  ;;  %v1143_v38 = vsel %vm527_vm0, %v220_v26, 0.0 }
 0x18b   :  { %v3235_v49 = vsel %vm9473_vm12, %v3234_v44, %v3230_v37  ;;  %1120 = vadd.xlane.f32.xlu1 %v1119_v39  ;;  %1117 = vadd.xlane.f32.xlu0 %v1116_v41  ;;  %v1140_v39 = vsel %vm527_vm0, %v219_v27, 0.0  ;;  %v222_v44 = vld [vmem:[%s9469_s0 + $0x678] sm:$0xff]  ;;  %v228_v27 = vld [vmem:[%s9469_s0 + $0x6a8] sm:$0xff] }
 0x18c   :  { %v911_v51 = vpop.xlane.xlu1 %910  ;;  %v908_v52 = vpop.xlane.xlu0 %907  ;;  %v3240_v55 = vsel %vm2682_vm13, %v3239_v43, %v3235_v49 }
 0x18d   :  { %v3249_v58 = vrot.slane %v911_v51, %v6346_v61  ;;  %v3244_v60 = vrot.slane %v908_v52, %v6341_v59 }
 0x18f   :  { %1126 = vadd.xlane.f32.xlu1 %v1125_v53  ;;  %1123 = vadd.xlane.f32.xlu0 %v1122_v54  ;;  %v3245_v63 = vsel %vm2689_vm14, %v3244_v60, %v3240_v55  ;;  %v1149_v53 = vsel %vm527_vm0, %v222_v44, 0.0  ;;  %v1146_v54 = vsel %vm527_vm0, %v221_v45, 0.0  ;;  %v224_v60 = vld [vmem:[%s9469_s0 + $0x688] sm:$0xff]  ;;  %v230_v45 = vld [vmem:[%s9469_s0 + $0x6b8] sm:$0xff] }
 0x190   :  { %v917_v0 = vpop.xlane.xlu1 %916  ;;  %v914_v2 = vpop.xlane.xlu0 %913  ;;  %v7049_v5 = vsel %vm2696_vm15, %v3249_v58, %v3245_v63 }
 0x191   :  { %9478 = vst [vmem:[#allocation6_spill] sm:$0xff] %v7049_v5  ;;  %v3258_v6 = vrot.slane %v917_v0, %v6226_v32  ;;  %v3254_v9 = vrot.slane %v914_v2, %v6220_v30 }
 0x193   :  { %v3259_v14 = vsel %vm2598_vm1, %v3258_v6, %v3254_v9  ;;  %1132 = vadd.xlane.f32.xlu1 %v1131_v3  ;;  %1129 = vadd.xlane.f32.xlu0 %v1128_v4  ;;  %v1155_v3 = vsel %vm527_vm0, %v224_v60, 0.0  ;;  %v1152_v4 = vsel %vm527_vm0, %v223_v15, 0.0  ;;  %v232_v15 = vld [vmem:[%s9469_s0 + $0x6c8] sm:$0xff] }
 0x194   :  { %v923_v16 = vpop.xlane.xlu1 %922  ;;  %v920_v17 = vpop.xlane.xlu0 %919 }
 0x195   :  { %v3268_v24 = vrot.slane %v923_v16, %v6223_v31  ;;  %v3263_v25 = vrot.slane %v920_v17, %v6233_v35 }
 0x197   :  { %v3264_v28 = vsel %vm2605_vm2, %v3263_v25, %v3259_v14  ;;  %1138 = vadd.xlane.f32.xlu1 %v1137_v20  ;;  %1135 = vadd.xlane.f32.xlu0 %v1134_v21  ;;  %v1161_v21 = vsel %vm527_vm0, %v226_v10, 0.0 }
 0x198   :  { %v929_v33 = vpop.xlane.xlu1 %928  ;;  %v3269_v34 = vsel %vm2612_vm3, %v3268_v24, %v3264_v28  ;;  %v926_v37 = vpop.xlane.xlu0 %925  ;;  %v1158_v24 = vsel %vm527_vm0, %v225_v11, 0.0  ;;  %v227_v28 = vld [vmem:[%s9469_s0 + $0x6a0] sm:$0xff]  ;;  %v234_v11 = vld [vmem:[%s9469_s0 + $0x6d8] sm:$0xff] }
 0x199   :  { %v3278_v41 = vrot.slane %v929_v33, %v6238_v40  ;;  %v3273_v43 = vrot.slane %v926_v37, %v6252_v48 }
 0x19b   :  { %v3274_v47 = vsel %vm2619_vm4, %v3273_v43, %v3269_v34  ;;  %1144 = vadd.xlane.f32.xlu1 %v1143_v38  ;;  %1141 = vadd.xlane.f32.xlu0 %v1140_v39  ;;  %v1167_v39 = vsel %vm527_vm0, %v228_v27, 0.0  ;;  %v236_v27 = vld [vmem:[%s9469_s0 + $0x6e8] sm:$0xff] }
 0x19c   :  { %v935_v49 = vpop.xlane.xlu1 %934  ;;  %v3279_v51 = vsel %vm9476_vm5, %v3278_v41, %v3274_v47  ;;  %v932_v52 = vpop.xlane.xlu0 %931  ;;  %v1164_v41 = vsel %vm527_vm0, %v227_v28, 0.0  ;;  %v229_v47 = vld [vmem:[%s9469_s0 + $0x6b0] sm:$0xff]  ;;  %v235_v28 = vld [vmem:[%s9469_s0 + $0x6e0] sm:$0xff] }
 0x19d   :  { %v3288_v55 = vrot.slane %v935_v49, %v6260_v56  ;;  %v3283_v58 = vrot.slane %v932_v52, %v6263_v57 }
 0x19f   :  { %v3284_v62 = vsel %vm2633_vm6, %v3283_v58, %v3279_v51  ;;  %1150 = vadd.xlane.f32.xlu1 %v1149_v53  ;;  %1147 = vadd.xlane.f32.xlu0 %v1146_v54  ;;  %v1173_v53 = vsel %vm527_vm0, %v230_v45, 0.0  ;;  %v1170_v54 = vsel %vm527_vm0, %v229_v47, 0.0  ;;  %v238_v45 = vld [vmem:[%s9469_s0 + $0x6f8] sm:$0xff]  ;;  %v237_v47 = vld [vmem:[%s9469_s0 + $0x6f0] sm:$0xff] }
 0x1a0   :  { %v941_v63 = vpop.xlane.xlu1 %940  ;;  %v3289_v0 = vsel %vm2640_vm7, %v3288_v55, %v3284_v62  ;;  %v938_v2 = vpop.xlane.xlu0 %937  ;;  %v231_v62 = vld [vmem:[%s9469_s0 + $0x6c0] sm:$0xff] }
 0x1a1   :  { %v3298_v6 = vrot.slane %v941_v63, %v6281_v7  ;;  %v3293_v9 = vrot.slane %v938_v2, %v6293_v13 }
 0x1a3   :  { %v3294_v14 = vsel %vm9474_vm8, %v3293_v9, %v3289_v0  ;;  %1156 = vadd.xlane.f32.xlu1 %v1155_v3  ;;  %1153 = vadd.xlane.f32.xlu0 %v1152_v4  ;;  %v1179_v3 = vsel %vm527_vm0, %v232_v15, 0.0  ;;  %v1176_v4 = vsel %vm527_vm0, %v231_v62, 0.0  ;;  %v240_v15 = vld [vmem:[%s9469_s0 + $0x708] sm:$0xff]  ;;  %v239_v62 = vld [vmem:[%s9469_s0 + $0x700] sm:$0xff] }
 0x1a4   :  { %v947_v16 = vpop.xlane.xlu1 %946  ;;  %v3299_v17 = vsel %vm2654_vm9, %v3298_v6, %v3294_v14  ;;  %v944_v20 = vpop.xlane.xlu0 %943  ;;  %v233_v14 = vld [vmem:[%s9469_s0 + $0x6d0] sm:$0xff] }
 0x1a5   :  { %v3308_v25 = vrot.slane %v947_v16, %v6301_v23  ;;  %v3303_v26 = vrot.slane %v944_v20, %v6313_v29 }
 0x1a7   :  { %v3304_v33 = vsel %vm9475_vm10, %v3303_v26, %v3299_v17  ;;  %1162 = vadd.xlane.f32.xlu1 %v1161_v21  ;;  %1159 = vadd.xlane.f32.xlu0 %v1158_v24  ;;  %v1185_v21 = vsel %vm527_vm0, %v234_v11, 0.0  ;;  %v1182_v24 = vsel %vm527_vm0, %v233_v14, 0.0  ;;  %v242_v14 = vld [vmem:[%s9469_s0 + $0x718] sm:$0xff] }
 0x1a8   :  { %v953_v34 = vpop.xlane.xlu1 %952  ;;  %v3309_v37 = vsel %vm2668_vm11, %v3308_v25, %v3304_v33  ;;  %v950_v38 = vpop.xlane.xlu0 %949 }
 0x1a9   :  { %v3318_v43 = vrot.slane %v953_v34, %v6327_v46  ;;  %v3313_v44 = vrot.slane %v950_v38, %v6321_v42 }
 0x1ab   :  { %v3314_v49 = vsel %vm9473_vm12, %v3313_v44, %v3309_v37  ;;  %1168 = vadd.xlane.f32.xlu1 %v1167_v39  ;;  %1165 = vadd.xlane.f32.xlu0 %v1164_v41  ;;  %v1191_v39 = vsel %vm527_vm0, %v236_v27, 0.0  ;;  %v1188_v41 = vsel %vm527_vm0, %v235_v28, 0.0 }
 0x1ac   :  { %v959_v51 = vpop.xlane.xlu1 %958  ;;  %v956_v52 = vpop.xlane.xlu0 %955  ;;  %v3319_v55 = vsel %vm2682_vm13, %v3318_v43, %v3314_v49 }
 0x1ad   :  { %v3328_v58 = vrot.slane %v959_v51, %v6346_v61  ;;  %v3323_v60 = vrot.slane %v956_v52, %v6341_v59 }
 0x1af   :  { %1174 = vadd.xlane.f32.xlu1 %v1173_v53  ;;  %1171 = vadd.xlane.f32.xlu0 %v1170_v54  ;;  %v3324_v63 = vsel %vm2689_vm14, %v3323_v60, %v3319_v55  ;;  %v1197_v54 = vsel %vm527_vm0, %v238_v45, 0.0  ;;  %v1194_v55 = vsel %vm527_vm0, %v237_v47, 0.0 }
 0x1b0   :  { %v965_v0 = vpop.xlane.xlu1 %964  ;;  %v962_v2 = vpop.xlane.xlu0 %961  ;;  %v7146_v6 = vsel %vm2696_vm15, %v3328_v58, %v3324_v63 }
 0x1b1   :  { %v3337_v9 = vrot.slane %v965_v0, %v6226_v32  ;;  %v3333_v10 = vrot.slane %v962_v2, %v6220_v30 }
 0x1b3   :  { %v3338_v16 = vsel %vm2598_vm1, %v3337_v9, %v3333_v10  ;;  %1180 = vadd.xlane.f32.xlu1 %v1179_v3  ;;  %1177 = vadd.xlane.f32.xlu0 %v1176_v4  ;;  %v1203_v4 = vsel %vm527_vm0, %v240_v15, 0.0  ;;  %v1200_v9 = vsel %vm527_vm0, %v239_v62, 0.0 }
 0x1b4   :  { %v971_v17 = vpop.xlane.xlu1 %970  ;;  %v968_v20 = vpop.xlane.xlu0 %967 }
 0x1b5   :  { %v3347_v25 = vrot.slane %v971_v17, %v6223_v31  ;;  %v3342_v26 = vrot.slane %v968_v20, %v6233_v35 }
 0x1b7   :  { %v3343_v33 = vsel %vm2605_vm2, %v3342_v26, %v3338_v16  ;;  %1186 = vadd.xlane.f32.xlu1 %v1185_v21  ;;  %1183 = vadd.xlane.f32.xlu0 %v1182_v24  ;;  %v241_v16 = vld [vmem:[%s9469_s0 + $0x710] sm:$0xff] }
 0x1b8   :  { %v977_v34 = vpop.xlane.xlu1 %976  ;;  %v3348_v37 = vsel %vm2612_vm3, %v3347_v25, %v3343_v33  ;;  %v974_v38 = vpop.xlane.xlu0 %973  ;;  %v1209_v25 = vsel %vm527_vm0, %v242_v14, 0.0  ;;  %v1206_v26 = vsel %vm527_vm0, %v241_v16, 0.0  ;;  %v244_v33 = vld [vmem:[%s9469_s0 + $0x728] sm:$0xff] }
 0x1b9   :  { %v3357_v43 = vrot.slane %v977_v34, %v6238_v40  ;;  %v3352_v44 = vrot.slane %v974_v38, %v6252_v48  ;;  %v243_v34 = vld [vmem:[%s9469_s0 + $0x720] sm:$0xff] }
 0x1bb   :  { %v3353_v49 = vsel %vm2619_vm4, %v3352_v44, %v3348_v37  ;;  %1192 = vadd.xlane.f32.xlu1 %v1191_v39  ;;  %1189 = vadd.xlane.f32.xlu0 %v1188_v41  ;;  %v1212_v44 = vsel %vm527_vm0, %v243_v34, 0.0  ;;  %v252_v34 = vld [vmem:[%s9469_s0 + $0x768] sm:$0xff] }
 0x1bc   :  { %v983_v51 = vpop.xlane.xlu1 %982  ;;  %v3358_v52 = vsel %vm9476_vm5, %v3357_v43, %v3353_v49  ;;  %v980_v53 = vpop.xlane.xlu0 %979  ;;  %v1215_v43 = vsel %vm527_vm0, %v244_v33, 0.0  ;;  %v246_v49 = vld [vmem:[%s9469_s0 + $0x738] sm:$0xff] }
 0x1bd   :  { %v3367_v58 = vrot.slane %v983_v51, %v6260_v56  ;;  %v3362_v60 = vrot.slane %v980_v53, %v6263_v57  ;;  %v245_v51 = vld [vmem:[%s9469_s0 + $0x730] sm:$0xff] }
 0x1bf   :  { %v3363_v63 = vsel %vm2633_vm6, %v3362_v60, %v3358_v52  ;;  %1198 = vadd.xlane.f32.xlu1 %v1197_v54  ;;  %1195 = vadd.xlane.f32.xlu0 %v1194_v55  ;;  %v1221_v55 = vsel %vm527_vm0, %v246_v49, 0.0 }
 0x1c0   :  { %v989_v0 = vpop.xlane.xlu1 %988  ;;  %v3368_v2 = vsel %vm2640_vm7, %v3367_v58, %v3363_v63  ;;  %v986_v3 = vpop.xlane.xlu0 %985  ;;  %v1218_v58 = vsel %vm527_vm0, %v245_v51, 0.0  ;;  %v248_v63 = vld [vmem:[%s9469_s0 + $0x748] sm:$0xff]  ;;  %v254_v51 = vld [vmem:[%s9469_s0 + $0x778] sm:$0xff] }
 0x1c1   :  { %v3377_v10 = vrot.slane %v989_v0, %v6281_v7  ;;  %v3372_v11 = vrot.slane %v986_v3, %v6293_v13  ;;  %v247_v0 = vld [vmem:[%s9469_s0 + $0x740] sm:$0xff] }
 0x1c3   :  { %v3373_v17 = vsel %vm9474_vm8, %v3372_v11, %v3368_v2  ;;  %1204 = vadd.xlane.f32.xlu1 %v1203_v4  ;;  %1201 = vadd.xlane.f32.xlu0 %v1200_v9  ;;  %v1227_v9 = vsel %vm527_vm0, %v248_v63, 0.0 }
 0x1c4   :  { %v995_v20 = vpop.xlane.xlu1 %994  ;;  %v3378_v21 = vsel %vm2654_vm9, %v3377_v10, %v3373_v17  ;;  %v992_v24 = vpop.xlane.xlu0 %991  ;;  %v1224_v10 = vsel %vm527_vm0, %v247_v0, 0.0  ;;  %v250_v17 = vld [vmem:[%s9469_s0 + $0x758] sm:$0xff]  ;;  %v256_v0 = vld [vmem:[%s9469_s0 + $0x788] sm:$0xff] }
 0x1c5   :  { %v3387_v27 = vrot.slane %v995_v20, %v6301_v23  ;;  %v3382_v28 = vrot.slane %v992_v24, %v6313_v29  ;;  %v249_v20 = vld [vmem:[%s9469_s0 + $0x750] sm:$0xff] }
 0x1c7   :  { %v3383_v37 = vsel %vm9475_vm10, %v3382_v28, %v3378_v21  ;;  %1210 = vadd.xlane.f32.xlu1 %v1209_v25  ;;  %1207 = vadd.xlane.f32.xlu0 %v1206_v26  ;;  %v1233_v26 = vsel %vm527_vm0, %v250_v17, 0.0 }
 0x1c8   :  { %v1001_v38 = vpop.xlane.xlu1 %1000  ;;  %v3388_v39 = vsel %vm2668_vm11, %v3387_v27, %v3383_v37  ;;  %v998_v41 = vpop.xlane.xlu0 %997  ;;  %v1230_v27 = vsel %vm527_vm0, %v249_v20, 0.0  ;;  %v251_v37 = vld [vmem:[%s9469_s0 + $0x760] sm:$0xff] }
 0x1c9   :  { %v3397_v45 = vrot.slane %v1001_v38, %v6327_v46  ;;  %v3392_v47 = vrot.slane %v998_v41, %v6321_v42 }
 0x1cb   :  { %v3393_v52 = vsel %vm9473_vm12, %v3392_v47, %v3388_v39  ;;  %1216 = vadd.xlane.f32.xlu1 %v1215_v43  ;;  %1213 = vadd.xlane.f32.xlu0 %v1212_v44  ;;  %v1239_v44 = vsel %vm527_vm0, %v252_v34, 0.0 }
 0x1cc   :  { %v1007_v53 = vpop.xlane.xlu1 %1006  ;;  %v1004_v54 = vpop.xlane.xlu0 %1003  ;;  %v3398_v60 = vsel %vm2682_vm13, %v3397_v45, %v3393_v52  ;;  %v1236_v45 = vsel %vm527_vm0, %v251_v37, 0.0  ;;  %v253_v52 = vld [vmem:[%s9469_s0 + $0x770] sm:$0xff] }
 0x1cd   :  { %v3407_v15 = vrot.slane %v1007_v53, %v6346_v61  ;;  %v3402_v62 = vrot.slane %v1004_v54, %v6341_v59 }
 0x1cf   :  { %1222 = vadd.xlane.f32.xlu1 %v1221_v55  ;;  %1219 = vadd.xlane.f32.xlu0 %v1218_v58  ;;  %v3403_v2 = vsel %vm2689_vm14, %v3402_v62, %v3398_v60  ;;  %v1245_v60 = vsel %vm527_vm0, %v254_v51, 0.0 }
 0x1d0   :  { %v1013_v3 = vpop.xlane.xlu1 %1012  ;;  %v1010_v4 = vpop.xlane.xlu0 %1009  ;;  %v7243_v11 = vsel %vm2696_vm15, %v3407_v15, %v3403_v2  ;;  %v1242_v15 = vsel %vm527_vm0, %v253_v52, 0.0  ;;  %v255_v2 = vld [vmem:[%s9469_s0 + $0x780] sm:$0xff] }
 0x1d1   :  { %v3416_v14 = vrot.slane %v1013_v3, %v6226_v32  ;;  %v3412_v16 = vrot.slane %v1010_v4, %v6220_v30 }
 0x1d3   :  { %v3417_v21 = vsel %vm2598_vm1, %v3416_v14, %v3412_v16  ;;  %1228 = vadd.xlane.f32.xlu1 %v1227_v9  ;;  %1225 = vadd.xlane.f32.xlu0 %v1224_v10  ;;  %v1251_v14 = vsel %vm527_vm0, %v256_v0, 0.0  ;;  %v1248_v16 = vsel %vm527_vm0, %v255_v2, 0.0 }
 0x1d4   :  { %v1019_v24 = vpop.xlane.xlu1 %1018  ;;  %v1016_v25 = vpop.xlane.xlu0 %1015 }
 0x1d5   :  { %v3426_v28 = vrot.slane %v1019_v24, %v6223_v31  ;;  %v3421_v33 = vrot.slane %v1016_v25, %v6233_v35  ;;  %v257_v24 = vld [vmem:[%s9469_s0 + $0x790] sm:$0xff] }
 0x1d6   :  { %v1254_v34 = vsel %vm527_vm0, %v257_v24, 0.0 }
 0x1d7   :  { %v3422_v38 = vsel %vm2605_vm2, %v3421_v33, %v3417_v21  ;;  %1234 = vadd.xlane.f32.xlu1 %v1233_v26  ;;  %1231 = vadd.xlane.f32.xlu0 %v1230_v27  ;;  %v258_v21 = vld [vmem:[%s9469_s0 + $0x798] sm:$0xff] }
 0x1d8   :  { %v1025_v39 = vpop.xlane.xlu1 %1024  ;;  %v3427_v41 = vsel %vm2612_vm3, %v3426_v28, %v3422_v38  ;;  %v1022_v43 = vpop.xlane.xlu0 %1021  ;;  %v1257_v33 = vsel %vm527_vm0, %v258_v21, 0.0 }
 0x1d9   :  { %v3436_v47 = vrot.slane %v1025_v39, %v6238_v40  ;;  %v3431_v49 = vrot.slane %v1022_v43, %v6252_v48  ;;  %v260_v39 = vld [vmem:[%s9469_s0 + $0x7a8] sm:$0xff] }
 0x1db   :  { %v3432_v53 = vsel %vm2619_vm4, %v3431_v49, %v3427_v41  ;;  %1240 = vadd.xlane.f32.xlu1 %v1239_v44  ;;  %1237 = vadd.xlane.f32.xlu0 %v1236_v45  ;;  %v259_v41 = vld [vmem:[%s9469_s0 + $0x7a0] sm:$0xff]  ;;  %v1263_v49 = vsel %vm527_vm0, %v260_v39, 0.0 }
 0x1dc   :  { %v1031_v54 = vpop.xlane.xlu1 %1030  ;;  %v3437_v55 = vsel %vm9476_vm5, %v3436_v47, %v3432_v53  ;;  %v1028_v58 = vpop.xlane.xlu0 %1027  ;;  %v1260_v51 = vsel %vm527_vm0, %v259_v41, 0.0 }
 0x1dd   :  { %v3446_v62 = vrot.slane %v1031_v54, %v6260_v56  ;;  %v3441_v63 = vrot.slane %v1028_v58, %v6263_v57  ;;  %v262_v54 = vld [vmem:[%s9469_s0 + $0x7b8] sm:$0xff] }
 0x1df   :  { %v3442_v3 = vsel %vm2633_vm6, %v3441_v63, %v3437_v55  ;;  %1246 = vadd.xlane.f32.xlu1 %v1245_v60  ;;  %1243 = vadd.xlane.f32.xlu0 %v1242_v15  ;;  %v261_v55 = vld [vmem:[%s9469_s0 + $0x7b0] sm:$0xff]  ;;  %v1269_v63 = vsel %vm527_vm0, %v262_v54, 0.0 }
 0x1e0   :  { %v1037_v4 = vpop.xlane.xlu1 %1036  ;;  %v3447_v9 = vsel %vm2640_vm7, %v3446_v62, %v3442_v3  ;;  %v1034_v10 = vpop.xlane.xlu0 %1033  ;;  %v1266_v0 = vsel %vm527_vm0, %v261_v55, 0.0 }
 0x1e1   :  { %v3456_v17 = vrot.slane %v1037_v4, %v6281_v7  ;;  %v3451_v20 = vrot.slane %v1034_v10, %v6293_v13  ;;  %v264_v4 = vld [vmem:[%s9469_s0 + $0x7c8] sm:$0xff] }
 0x1e3   :  { %v3452_v25 = vsel %vm9474_vm8, %v3451_v20, %v3447_v9  ;;  %1252 = vadd.xlane.f32.xlu1 %v1251_v14  ;;  %1249 = vadd.xlane.f32.xlu0 %v1248_v16  ;;  %v263_v9 = vld [vmem:[%s9469_s0 + $0x7c0] sm:$0xff] }
 0x1e4   :  { %v1043_v26 = vpop.xlane.xlu1 %1042  ;;  %v3457_v27 = vsel %vm2654_vm9, %v3456_v17, %v3452_v25  ;;  %v1040_v28 = vpop.xlane.xlu0 %1039  ;;  %v1275_v17 = vsel %vm527_vm0, %v264_v4, 0.0  ;;  %v1272_v20 = vsel %vm527_vm0, %v263_v9, 0.0 }
 0x1e5   :  { %v3466_v37 = vrot.slane %v1043_v26, %v6301_v23  ;;  %v3461_v38 = vrot.slane %v1040_v28, %v6313_v29  ;;  %v266_v26 = vld [vmem:[%s9469_s0 + $0x7d8] sm:$0xff] }
 0x1e7   :  { %v3462_v43 = vsel %vm9475_vm10, %v3461_v38, %v3457_v27  ;;  %1258 = vadd.xlane.f32.xlu1 %v1257_v33  ;;  %1255 = vadd.xlane.f32.xlu0 %v1254_v34  ;;  %v265_v27 = vld [vmem:[%s9469_s0 + $0x7d0] sm:$0xff] }
 0x1e8   :  { %v1049_v44 = vpop.xlane.xlu1 %1048  ;;  %v3467_v45 = vsel %vm2668_vm11, %v3466_v37, %v3462_v43  ;;  %v1046_v47 = vpop.xlane.xlu0 %1045  ;;  %v1281_v37 = vsel %vm527_vm0, %v266_v26, 0.0  ;;  %v1278_v38 = vsel %vm527_vm0, %v265_v27, 0.0  ;;  %v268_v43 = vld [vmem:[%s9469_s0 + $0x7e8] sm:$0xff] }
 0x1e9   :  { %v3476_v52 = vrot.slane %v1049_v44, %v6327_v46  ;;  %v3471_v53 = vrot.slane %v1046_v47, %v6321_v42  ;;  %v267_v44 = vld [vmem:[%s9469_s0 + $0x7e0] sm:$0xff] }
 0x1eb   :  { %v3472_v58 = vsel %vm9473_vm12, %v3471_v53, %v3467_v45  ;;  %1264 = vadd.xlane.f32.xlu1 %v1263_v49  ;;  %1261 = vadd.xlane.f32.xlu0 %v1260_v51  ;;  %v1284_v53 = vsel %vm527_vm0, %v267_v44, 0.0 }
 0x1ec   :  { %v1055_v60 = vpop.xlane.xlu1 %1054  ;;  %v3477_v15 = vsel %vm2682_vm13, %v3476_v52, %v3472_v58  ;;  %v1052_v62 = vpop.xlane.xlu0 %1051  ;;  %v1287_v52 = vsel %vm527_vm0, %v268_v43, 0.0  ;;  %v270_v58 = vld [vmem:[%s9469_s0 + $0x7f8] sm:$0xff] }
 0x1ed   :  { %v3486_v2 = vrot.slane %v1055_v60, %v6346_v61  ;;  %v3481_v3 = vrot.slane %v1052_v62, %v6341_v59  ;;  %v269_v60 = vld [vmem:[%s9469_s0 + $0x7f0] sm:$0xff] }
 0x1ef   :  { %v3482_v10 = vsel %vm2689_vm14, %v3481_v3, %v3477_v15  ;;  %1270 = vadd.xlane.f32.xlu1 %v1269_v63  ;;  %1267 = vadd.xlane.f32.xlu0 %v1266_v0  ;;  %v1290_v3 = vsel %vm527_vm0, %v269_v60, 0.0 }
 0x1f0   :  { %v1061_v14 = vpop.xlane.xlu1 %1060  ;;  %v1058_v16 = vpop.xlane.xlu0 %1057  ;;  %v7340_v21 = vsel %vm2696_vm15, %v3486_v2, %v3482_v10  ;;  %v1293_v2 = vsel %vm527_vm0, %v270_v58, 0.0  ;;  %v272_v10 = vld [vmem:[%s9469_s0 + $0x808] sm:$0xff] }
 0x1f1   :  { %v3495_v24 = vrot.slane %v1061_v14, %v6226_v32  ;;  %v3491_v25 = vrot.slane %v1058_v16, %v6220_v30  ;;  %v271_v14 = vld [vmem:[%s9469_s0 + $0x800] sm:$0xff] }
 0x1f2   :  { %v1296_v26 = vsel %vm527_vm0, %v271_v14, 0.0 }
 0x1f3   :  { %v3496_v28 = vsel %vm2598_vm1, %v3495_v24, %v3491_v25  ;;  %1276 = vadd.xlane.f32.xlu1 %v1275_v17  ;;  %1273 = vadd.xlane.f32.xlu0 %v1272_v20  ;;  %v1299_v25 = vsel %vm527_vm0, %v272_v10, 0.0 }
 0x1f4   :  { %v1067_v33 = vpop.xlane.xlu1 %1066  ;;  %v1064_v34 = vpop.xlane.xlu0 %1063 }
 0x1f5   :  { %v3505_v39 = vrot.slane %v1067_v33, %v6223_v31  ;;  %v3500_v41 = vrot.slane %v1064_v34, %v6233_v35  ;;  %v274_v33 = vld [vmem:[%s9469_s0 + $0x818] sm:$0xff]  ;;  %v273_v34 = vld [vmem:[%s9469_s0 + $0x810] sm:$0xff] }
 0x1f6   :  { %v1305_v43 = vsel %vm527_vm0, %v274_v33, 0.0  ;;  %v1302_v44 = vsel %vm527_vm0, %v273_v34, 0.0 }
 0x1f7   :  { %v3501_v45 = vsel %vm2605_vm2, %v3500_v41, %v3496_v28  ;;  %1282 = vadd.xlane.f32.xlu1 %v1281_v37  ;;  %1279 = vadd.xlane.f32.xlu0 %v1278_v38 }
 0x1f8   :  { %v1073_v47 = vpop.xlane.xlu1 %1072  ;;  %v3506_v49 = vsel %vm2612_vm3, %v3505_v39, %v3501_v45  ;;  %v1070_v51 = vpop.xlane.xlu0 %1069 }
 0x1f9   :  { %v3515_v54 = vrot.slane %v1073_v47, %v6238_v40  ;;  %v3510_v55 = vrot.slane %v1070_v51, %v6252_v48  ;;  %v275_v51 = vld [vmem:[%s9469_s0 + $0x820] sm:$0xff] }
 0x1fa   :  { %v1308_v60 = vsel %vm527_vm0, %v275_v51, 0.0 }
 0x1fb   :  { %v3511_v15 = vsel %vm2619_vm4, %v3510_v55, %v3506_v49  ;;  %1288 = vadd.xlane.f32.xlu1 %v1287_v52  ;;  %1285 = vadd.xlane.f32.xlu0 %v1284_v53  ;;  %v276_v49 = vld [vmem:[%s9469_s0 + $0x828] sm:$0xff] }
 0x1fc   :  { %v1079_v62 = vpop.xlane.xlu1 %1078  ;;  %v3516_v63 = vsel %vm9476_vm5, %v3515_v54, %v3511_v15  ;;  %v1076_v0 = vpop.xlane.xlu0 %1075  ;;  %v1311_v58 = vsel %vm527_vm0, %v276_v49, 0.0 }
 0x1fd   :  { %v3525_v4 = vrot.slane %v1079_v62, %v6260_v56  ;;  %v3520_v9 = vrot.slane %v1076_v0, %v6263_v57  ;;  %v277_v0 = vld [vmem:[%s9469_s0 + $0x830] sm:$0xff] }
 0x1fe   :  { %v1314_v10 = vsel %vm527_vm0, %v277_v0, 0.0 }
 0x1ff   :  { %v3521_v16 = vsel %vm2633_vm6, %v3520_v9, %v3516_v63  ;;  %1294 = vadd.xlane.f32.xlu1 %v1293_v2  ;;  %1291 = vadd.xlane.f32.xlu0 %v1290_v3  ;;  %v278_v63 = vld [vmem:[%s9469_s0 + $0x838] sm:$0xff] }
 0x200   :  { %v1085_v17 = vpop.xlane.xlu1 %1084  ;;  %v3526_v20 = vsel %vm2640_vm7, %v3525_v4, %v3521_v16  ;;  %v1082_v24 = vpop.xlane.xlu0 %1081  ;;  %v1317_v9 = vsel %vm527_vm0, %v278_v63, 0.0 }
 0x201   :  { %v3535_v27 = vrot.slane %v1085_v17, %v6281_v7  ;;  %v3530_v28 = vrot.slane %v1082_v24, %v6293_v13  ;;  %v279_v24 = vld [vmem:[%s9469_s0 + $0x840] sm:$0xff] }
 0x202   :  { %v1320_v33 = vsel %vm527_vm0, %v279_v24, 0.0 }
 0x203   :  { %v3531_v37 = vsel %vm9474_vm8, %v3530_v28, %v3526_v20  ;;  %1300 = vadd.xlane.f32.xlu1 %v1299_v25  ;;  %1297 = vadd.xlane.f32.xlu0 %v1296_v26  ;;  %v280_v20 = vld [vmem:[%s9469_s0 + $0x848] sm:$0xff] }
 0x204   :  { %v1091_v38 = vpop.xlane.xlu1 %1090  ;;  %v3536_v39 = vsel %vm2654_vm9, %v3535_v27, %v3531_v37  ;;  %v1088_v41 = vpop.xlane.xlu0 %1087  ;;  %v1323_v28 = vsel %vm527_vm0, %v280_v20, 0.0 }
 0x205   :  { %v3545_v45 = vrot.slane %v1091_v38, %v6301_v23  ;;  %v3540_v47 = vrot.slane %v1088_v41, %v6313_v29  ;;  %v281_v41 = vld [vmem:[%s9469_s0 + $0x850] sm:$0xff] }
 0x206   :  { %v1326_v49 = vsel %vm527_vm0, %v281_v41, 0.0 }
 0x207   :  { %v3541_v52 = vsel %vm9475_vm10, %v3540_v47, %v3536_v39  ;;  %1306 = vadd.xlane.f32.xlu1 %v1305_v43  ;;  %1303 = vadd.xlane.f32.xlu0 %v1302_v44  ;;  %v282_v39 = vld [vmem:[%s9469_s0 + $0x858] sm:$0xff] }
 0x208   :  { %v1097_v53 = vpop.xlane.xlu1 %1096  ;;  %v3546_v54 = vsel %vm2668_vm11, %v3545_v45, %v3541_v52  ;;  %v1094_v55 = vpop.xlane.xlu0 %1093  ;;  %v1329_v47 = vsel %vm527_vm0, %v282_v39, 0.0 }
 0x209   :  { %v3555_v15 = vrot.slane %v1097_v53, %v6327_v46  ;;  %v3550_v62 = vrot.slane %v1094_v55, %v6321_v42  ;;  %v284_v53 = vld [vmem:[%s9469_s0 + $0x868] sm:$0xff] }
 0x20b   :  { %v3551_v2 = vsel %vm9473_vm12, %v3550_v62, %v3546_v54  ;;  %1312 = vadd.xlane.f32.xlu1 %v1311_v58  ;;  %1309 = vadd.xlane.f32.xlu0 %v1308_v60  ;;  %v283_v54 = vld [vmem:[%s9469_s0 + $0x860] sm:$0xff]  ;;  %v1335_v62 = vsel %vm527_vm0, %v284_v53, 0.0 }
 0x20c   :  { %v1103_v3 = vpop.xlane.xlu1 %1102  ;;  %v1100_v4 = vpop.xlane.xlu0 %1099  ;;  %v3556_v14 = vsel %vm2682_vm13, %v3555_v15, %v3551_v2  ;;  %v1332_v63 = vsel %vm527_vm0, %v283_v54, 0.0 }
 0x20d   :  { %v3565_v16 = vrot.slane %v1103_v3, %v6346_v61  ;;  %v3560_v17 = vrot.slane %v1100_v4, %v6341_v59  ;;  %v286_v3 = vld [vmem:[%s9469_s0 + $0x878] sm:$0xff]  ;;  %v285_v4 = vld [vmem:[%s9469_s0 + $0x870] sm:$0xff] }
 0x20e   :  { %v1338_v20 = vsel %vm527_vm0, %v285_v4, 0.0 }
 0x20f   :  { %1318 = vadd.xlane.f32.xlu1 %v1317_v9  ;;  %1315 = vadd.xlane.f32.xlu0 %v1314_v10  ;;  %v3561_v25 = vsel %vm2689_vm14, %v3560_v17, %v3556_v14  ;;  %v1341_v17 = vsel %vm527_vm0, %v286_v3, 0.0 }
 0x210   :  { %v1109_v26 = vpop.xlane.xlu1 %1108  ;;  %v1106_v27 = vpop.xlane.xlu0 %1105  ;;  %v7437_v34 = vsel %vm2696_vm15, %v3565_v16, %v3561_v25 }
 0x211   :  { %v3574_v37 = vrot.slane %v1109_v26, %v6226_v32  ;;  %v3570_v38 = vrot.slane %v1106_v27, %v6220_v30  ;;  %v288_v26 = vld [vmem:[%s9469_s0 + $0x888] sm:$0xff]  ;;  %v287_v27 = vld [vmem:[%s9469_s0 + $0x880] sm:$0xff] }
 0x212   :  { %v1347_v39 = vsel %vm527_vm0, %v288_v26, 0.0  ;;  %v1344_v41 = vsel %vm527_vm0, %v287_v27, 0.0 }
 0x213   :  { %v3575_v43 = vsel %vm2598_vm1, %v3574_v37, %v3570_v38  ;;  %1324 = vadd.xlane.f32.xlu1 %v1323_v28  ;;  %1321 = vadd.xlane.f32.xlu0 %v1320_v33 }
 0x214   :  { %v1115_v44 = vpop.xlane.xlu1 %1114  ;;  %v1112_v45 = vpop.xlane.xlu0 %1111 }
 0x215   :  { %v3584_v51 = vrot.slane %v1115_v44, %v6223_v31  ;;  %v3579_v52 = vrot.slane %v1112_v45, %v6233_v35  ;;  %v290_v45 = vld [vmem:[%s9469_s0 + $0x898] sm:$0xff] }
 0x216   :  { %v1353_v54 = vsel %vm527_vm0, %v290_v45, 0.0 }
 0x217   :  { %v3580_v55 = vsel %vm2605_vm2, %v3579_v52, %v3575_v43  ;;  %1330 = vadd.xlane.f32.xlu1 %v1329_v47  ;;  %1327 = vadd.xlane.f32.xlu0 %v1326_v49  ;;  %v289_v47 = vld [vmem:[%s9469_s0 + $0x890] sm:$0xff] }
 0x218   :  { %v1121_v58 = vpop.xlane.xlu1 %1120  ;;  %v3585_v60 = vsel %vm2612_vm3, %v3584_v51, %v3580_v55  ;;  %v1118_v15 = vpop.xlane.xlu0 %1117  ;;  %v1350_v55 = vsel %vm527_vm0, %v289_v47, 0.0 }
 0x219   :  { %v3594_v0 = vrot.slane %v1121_v58, %v6238_v40  ;;  %v3589_v2 = vrot.slane %v1118_v15, %v6252_v48  ;;  %v292_v15 = vld [vmem:[%s9469_s0 + $0x8a8] sm:$0xff] }
 0x21a   :  { %v1359_v4 = vsel %vm527_vm0, %v292_v15, 0.0 }
 0x21b   :  { %v3590_v9 = vsel %vm2619_vm4, %v3589_v2, %v3585_v60  ;;  %1336 = vadd.xlane.f32.xlu1 %v1335_v62  ;;  %1333 = vadd.xlane.f32.xlu0 %v1332_v63  ;;  %v291_v62 = vld [vmem:[%s9469_s0 + $0x8a0] sm:$0xff] }
 0x21c   :  { %v1127_v10 = vpop.xlane.xlu1 %1126  ;;  %v3595_v14 = vsel %vm9476_vm5, %v3594_v0, %v3590_v9  ;;  %v1124_v16 = vpop.xlane.xlu0 %1123  ;;  %v1356_v9 = vsel %vm527_vm0, %v291_v62, 0.0 }
 0x21d   :  { %v3604_v24 = vrot.slane %v1127_v10, %v6260_v56  ;;  %v3599_v25 = vrot.slane %v1124_v16, %v6263_v57  ;;  %v294_v16 = vld [vmem:[%s9469_s0 + $0x8b8] sm:$0xff] }
 0x21e   :  { %v1365_v27 = vsel %vm527_vm0, %v294_v16, 0.0 }
 0x21f   :  { %v3600_v28 = vsel %vm2633_vm6, %v3599_v25, %v3595_v14  ;;  %1342 = vadd.xlane.f32.xlu1 %v1341_v17  ;;  %1339 = vadd.xlane.f32.xlu0 %v1338_v20  ;;  %v293_v17 = vld [vmem:[%s9469_s0 + $0x8b0] sm:$0xff] }
 0x220   :  { %v1133_v33 = vpop.xlane.xlu1 %1132  ;;  %v3605_v37 = vsel %vm2640_vm7, %v3604_v24, %v3600_v28  ;;  %v1130_v38 = vpop.xlane.xlu0 %1129  ;;  %v1362_v28 = vsel %vm527_vm0, %v293_v17, 0.0 }
 0x221   :  { %v3614_v43 = vrot.slane %v1133_v33, %v6281_v7  ;;  %v3609_v44 = vrot.slane %v1130_v38, %v6293_v13  ;;  %v296_v38 = vld [vmem:[%s9469_s0 + $0x8c8] sm:$0xff] }
 0x222   :  { %v1371_v45 = vsel %vm527_vm0, %v296_v38, 0.0 }
 0x223   :  { %v3610_v49 = vsel %vm9474_vm8, %v3609_v44, %v3605_v37  ;;  %1348 = vadd.xlane.f32.xlu1 %v1347_v39  ;;  %1345 = vadd.xlane.f32.xlu0 %v1344_v41  ;;  %v295_v39 = vld [vmem:[%s9469_s0 + $0x8c0] sm:$0xff] }
 0x224   :  { %v1139_v51 = vpop.xlane.xlu1 %1138  ;;  %v3615_v52 = vsel %vm2654_vm9, %v3614_v43, %v3610_v49  ;;  %v1136_v53 = vpop.xlane.xlu0 %1135  ;;  %v1368_v47 = vsel %vm527_vm0, %v295_v39, 0.0 }
 0x225   :  { %v3624_v58 = vrot.slane %v1139_v51, %v6301_v23  ;;  %v3619_v60 = vrot.slane %v1136_v53, %v6313_v29  ;;  %v298_v53 = vld [vmem:[%s9469_s0 + $0x8d8] sm:$0xff] }
 0x226   :  { %v1377_v15 = vsel %vm527_vm0, %v298_v53, 0.0 }
 0x227   :  { %v3620_v63 = vsel %vm9475_vm10, %v3619_v60, %v3615_v52  ;;  %1354 = vadd.xlane.f32.xlu1 %v1353_v54  ;;  %1351 = vadd.xlane.f32.xlu0 %v1350_v55  ;;  %v297_v54 = vld [vmem:[%s9469_s0 + $0x8d0] sm:$0xff] }
 0x228   :  { %v1145_v0 = vpop.xlane.xlu1 %1144  ;;  %v3625_v2 = vsel %vm2668_vm11, %v3624_v58, %v3620_v63  ;;  %v1142_v3 = vpop.xlane.xlu0 %1141  ;;  %v1374_v62 = vsel %vm527_vm0, %v297_v54, 0.0 }
 0x229   :  { %v3634_v10 = vrot.slane %v1145_v0, %v6327_v46  ;;  %v3629_v14 = vrot.slane %v1142_v3, %v6321_v42  ;;  %v299_v3 = vld [vmem:[%s9469_s0 + $0x8e0] sm:$0xff] }
 0x22a   :  { %v1380_v17 = vsel %vm527_vm0, %v299_v3, 0.0 }
 0x22b   :  { %v3630_v20 = vsel %vm9473_vm12, %v3629_v14, %v3625_v2  ;;  %1360 = vadd.xlane.f32.xlu1 %v1359_v4  ;;  %1357 = vadd.xlane.f32.xlu0 %v1356_v9  ;;  %v300_v2 = vld [vmem:[%s9469_s0 + $0x8e8] sm:$0xff] }
 0x22c   :  { %v1151_v24 = vpop.xlane.xlu1 %1150  ;;  %v3635_v25 = vsel %vm2682_vm13, %v3634_v10, %v3630_v20  ;;  %v1148_v26 = vpop.xlane.xlu0 %1147  ;;  %v1383_v16 = vsel %vm527_vm0, %v300_v2, 0.0 }
 0x22d   :  { %v3644_v33 = vrot.slane %v1151_v24, %v6346_v61  ;;  %v3639_v37 = vrot.slane %v1148_v26, %v6341_v59  ;;  %v301_v26 = vld [vmem:[%s9469_s0 + $0x8f0] sm:$0xff] }
 0x22e   :  { %v1386_v39 = vsel %vm527_vm0, %v301_v26, 0.0 }
 0x22f   :  { %v3640_v41 = vsel %vm2689_vm14, %v3639_v37, %v3635_v25  ;;  %1366 = vadd.xlane.f32.xlu1 %v1365_v27  ;;  %1363 = vadd.xlane.f32.xlu0 %v1362_v28  ;;  %v302_v25 = vld [vmem:[%s9469_s0 + $0x8f8] sm:$0xff] }
 0x230   :  { %v1157_v43 = vpop.xlane.xlu1 %1156  ;;  %v1154_v44 = vpop.xlane.xlu0 %1153  ;;  %v7534_v49 = vsel %vm2696_vm15, %v3644_v33, %v3640_v41  ;;  %v1389_v38 = vsel %vm527_vm0, %v302_v25, 0.0 }
 0x231   :  { %9479 = vst [vmem:[#allocation7_spill] sm:$0xff] %v7534_v49  ;;  %v3653_v51 = vrot.slane %v1157_v43, %v6226_v32  ;;  %v3649_v52 = vrot.slane %v1154_v44, %v6220_v30  ;;  %v304_v44 = vld [vmem:[%s9469_s0 + $0x908] sm:$0xff] }
 0x232   :  { %v1395_v54 = vsel %vm527_vm0, %v304_v44, 0.0  ;;  %v309_v44 = vld [vmem:[%s9469_s0 + $0x930] sm:$0xff] }
 0x233   :  { %v3654_v55 = vsel %vm2598_vm1, %v3653_v51, %v3649_v52  ;;  %1372 = vadd.xlane.f32.xlu1 %v1371_v45  ;;  %1369 = vadd.xlane.f32.xlu0 %v1368_v47  ;;  %v303_v45 = vld [vmem:[%s9469_s0 + $0x900] sm:$0xff] }
 0x234   :  { %v1163_v58 = vpop.xlane.xlu1 %1162  ;;  %v1160_v60 = vpop.xlane.xlu0 %1159 }
 0x235   :  { %v3663_v63 = vrot.slane %v1163_v58, %v6223_v31  ;;  %v3658_v0 = vrot.slane %v1160_v60, %v6233_v35 }
 0x237   :  { %v3659_v4 = vsel %vm2605_vm2, %v3658_v0, %v3654_v55  ;;  %1378 = vadd.xlane.f32.xlu1 %v1377_v15  ;;  %1375 = vadd.xlane.f32.xlu0 %v1374_v62  ;;  %v1392_v55 = vsel %vm527_vm0, %v303_v45, 0.0  ;;  %v306_v15 = vld [vmem:[%s9469_s0 + $0x918] sm:$0xff]  ;;  %v305_v62 = vld [vmem:[%s9469_s0 + $0x910] sm:$0xff] }
 0x238   :  { %v1169_v9 = vpop.xlane.xlu1 %1168  ;;  %v3664_v10 = vsel %vm2612_vm3, %v3663_v63, %v3659_v4  ;;  %v1166_v14 = vpop.xlane.xlu0 %1165  ;;  %v1401_v4 = vsel %vm527_vm0, %v306_v15, 0.0 }
 0x239   :  { %v3673_v20 = vrot.slane %v1169_v9, %v6238_v40  ;;  %v3668_v24 = vrot.slane %v1166_v14, %v6252_v48  ;;  %v1398_v9 = vsel %vm527_vm0, %v305_v62, 0.0  ;;  %v312_v62 = vld [vmem:[%s9469_s0 + $0x948] sm:$0xff] }
 0x23b   :  { %v3669_v27 = vsel %vm2619_vm4, %v3668_v24, %v3664_v10  ;;  %1384 = vadd.xlane.f32.xlu1 %v1383_v16  ;;  %1381 = vadd.xlane.f32.xlu0 %v1380_v17  ;;  %v308_v16 = vld [vmem:[%s9469_s0 + $0x928] sm:$0xff]  ;;  %v307_v17 = vld [vmem:[%s9469_s0 + $0x920] sm:$0xff] }
 0x23c   :  { %v1175_v28 = vpop.xlane.xlu1 %1174  ;;  %v3674_v33 = vsel %vm9476_vm5, %v3673_v20, %v3669_v27  ;;  %v1172_v37 = vpop.xlane.xlu0 %1171  ;;  %v5889_v20 = vmov 1983009808  }
 0x23d   :  { %v3683_v41 = vrot.slane %v1175_v28, %v6260_v56  ;;  %v3678_v43 = vrot.slane %v1172_v37, %v6263_v57  ;;  %v5186_v24 = vunpack.c.l.s4 %v5889_v20  ;;  %v1407_v37 = vsel %vm527_vm0, %v308_v16, 0.0  ;;  %v314_v20 = vld [vmem:[%s9469_s0 + $0x958] sm:$0xff] }
 0x23f   :  { %v3679_v47 = vsel %vm2633_vm6, %v3678_v43, %v3674_v33  ;;  %1390 = vadd.xlane.f32.xlu1 %v1389_v38  ;;  %1387 = vadd.xlane.f32.xlu0 %v1386_v39  ;;  %v5187_v26 = vunpack.c.0.s8 %v5186_v24  ;;  %v1404_v38 = vsel %vm527_vm0, %v307_v17, 0.0  ;;  %v310_v43 = vld [vmem:[%s9469_s0 + $0x938] sm:$0xff]  ;;  %v313_v24 = vld [vmem:[%s9469_s0 + $0x950] sm:$0xff] }
 0x240   :  { %v1181_v51 = vpop.xlane.xlu1 %1180  ;;  %v3684_v52 = vsel %vm2640_vm7, %v3683_v41, %v3679_v47  ;;  %v1178_v53 = vpop.xlane.xlu0 %1177  ;;  %v7621_v47 = vld [vmem:[%s9470_s1] sm:$0xff] }
 0x241   :  { %v3693_v58 = vrot.slane %v1181_v51, %v6281_v7  ;;  %v3688_v60 = vrot.slane %v1178_v53, %v6293_v13  ;;  %v7616_v45 = vsub.s32 %v5187_v26, %v6201_v18 }
 0x243   :  { %v3689_v63 = vsel %vm9474_vm8, %v3688_v60, %v3684_v52  ;;  %1396 = vadd.xlane.f32.xlu1 %v1395_v54  ;;  %1393 = vadd.xlane.f32.xlu0 %v1392_v55  ;;  %v5191_v52 = vrot.slane %v7621_v47, %v7616_v45  ;;  %v1413_v55 = vsel %vm527_vm0, %v310_v43, 0.0 }
 0x244   :  { %v1187_v0 = vpop.xlane.xlu1 %1186  ;;  %v3694_v2 = vsel %vm2654_vm9, %v3693_v58, %v3689_v63  ;;  %v1184_v3 = vpop.xlane.xlu0 %1183  ;;  %v1410_v58 = vsel %vm527_vm0, %v309_v44, 0.0  ;;  %v311_v63 = vld [vmem:[%s9469_s0 + $0x940] sm:$0xff] }
 0x245   :  { %v3703_v10 = vrot.slane %v1187_v0, %v6301_v23  ;;  %v3698_v14 = vrot.slane %v1184_v3, %v6313_v29  ;;  %v5199_v0 = vcombine.high %v5191_v52, %v5191_v52 }
 0x247   :  { %v3699_v25 = vsel %vm9475_vm10, %v3698_v14, %v3694_v2  ;;  %1402 = vadd.xlane.f32.xlu1 %v1401_v4  ;;  %1399 = vadd.xlane.f32.xlu0 %v1398_v9  ;;  %v1419_v9 = vsel %vm527_vm0, %v312_v62, 0.0 }
 0x248   :  { %v1193_v27 = vpop.xlane.xlu1 %1192  ;;  %v3704_v28 = vsel %vm2668_vm11, %v3703_v10, %v3699_v25  ;;  %v1190_v33 = vpop.xlane.xlu0 %1189  ;;  %v1416_v10 = vsel %vm527_vm0, %v311_v63, 0.0  ;;  %5268 = vmatprep.subr.mxu1 %v5199_v0 }
 0x249   :  { %v3713_v39 = vrot.slane %v1193_v27, %v6327_v46  ;;  %v3708_v41 = vrot.slane %v1190_v33, %v6321_v42  ;;  %5269 = vmatpush1.xpose.msra.mxu1 %v5191_v52  ;;  %v1422_v33 = vsel %vm527_vm0, %v313_v24, 0.0 }
 0x24b   :  { %v3709_v51 = vsel %vm9473_vm12, %v3708_v41, %v3704_v28  ;;  %1408 = vadd.xlane.f32.xlu1 %v1407_v37  ;;  %1405 = vadd.xlane.f32.xlu0 %v1404_v38  ;;  %v1425_v28 = vsel %vm527_vm0, %v314_v20, 0.0  ;;  %v315_v41 = vld [vmem:[%s9469_s0 + $0x960] sm:$0xff] }
 0x24c   :  { %v1199_v53 = vpop.xlane.xlu1 %1198  ;;  %v1196_v54 = vpop.xlane.xlu0 %1195  ;;  %v3714_v18 = vsel %vm2682_vm13, %v3713_v39, %v3709_v51  ;;  %v316_v39 = vld [vmem:[%s9469_s0 + $0x968] sm:$0xff] }
 0x24d   :  { %v3723_v60 = vrot.slane %v1199_v53, %v6346_v61  ;;  %v3718_v15 = vrot.slane %v1196_v54, %v6341_v59  ;;  %v1431_v53 = vsel %vm527_vm0, %v316_v39, 0.0  ;;  %v1428_v54 = vsel %vm527_vm0, %v315_v41, 0.0 }
 0x24f   :  { %1414 = vadd.xlane.f32.xlu1 %v1413_v55  ;;  %1411 = vadd.xlane.f32.xlu0 %v1410_v58  ;;  %v3719_v2 = vsel %vm2689_vm14, %v3718_v15, %v3714_v18  ;;  %v318_v18 = vld [vmem:[%s9469_s0 + $0x978] sm:$0xff] }
 0x250   :  { %v1205_v3 = vpop.xlane.xlu1 %1204  ;;  %v1202_v4 = vpop.xlane.xlu0 %1201  ;;  %v7641_v14 = vsel %vm2696_vm15, %v3723_v60, %v3719_v2  ;;  %v317_v60 = vld [vmem:[%s9469_s0 + $0x970] sm:$0xff]  ;;  %v1437_v2 = vsel %vm527_vm0, %v318_v18, 0.0 }
 0x251   :  { %9480 = vst [vmem:[#allocation8_spill] sm:$0xff] %v7641_v14  ;;  %v3732_v16 = vrot.slane %v1205_v3, %v6226_v32  ;;  %v3728_v17 = vrot.slane %v1202_v4, %v6220_v30  ;;  %v1434_v3 = vsel %vm527_vm0, %v317_v60, 0.0 }
 0x253   :  { %v3733_v25 = vsel %vm2598_vm1, %v3732_v16, %v3728_v17  ;;  %1420 = vadd.xlane.f32.xlu1 %v1419_v9  ;;  %1417 = vadd.xlane.f32.xlu0 %v1416_v10  ;;  %v320_v10 = vld [vmem:[%s9469_s0 + $0x988] sm:$0xff]  ;;  %v319_v16 = vld [vmem:[%s9469_s0 + $0x980] sm:$0xff] }
 0x254   :  { %v1211_v26 = vpop.xlane.xlu1 %1210  ;;  %v1208_v27 = vpop.xlane.xlu0 %1207 }
 0x255   :  { %v3742_v37 = vrot.slane %v1211_v26, %v6223_v31  ;;  %v3737_v38 = vrot.slane %v1208_v27, %v6233_v35  ;;  %v1443_v26 = vsel %vm527_vm0, %v320_v10, 0.0  ;;  %v1440_v27 = vsel %vm527_vm0, %v319_v16, 0.0 }
 0x257   :  { %v3738_v43 = vsel %vm2605_vm2, %v3737_v38, %v3733_v25  ;;  %1426 = vadd.xlane.f32.xlu1 %v1425_v28  ;;  %1423 = vadd.xlane.f32.xlu0 %v1422_v33  ;;  %v321_v38 = vld [vmem:[%s9469_s0 + $0x990] sm:$0xff] }
 0x258   :  { %v1217_v44 = vpop.xlane.xlu1 %1216  ;;  %v3743_v51 = vsel %vm2612_vm3, %v3742_v37, %v3738_v43  ;;  %v1214_v52 = vpop.xlane.xlu0 %1213  ;;  %v322_v37 = vld [vmem:[%s9469_s0 + $0x998] sm:$0xff] }
 0x259   :  { %v3752_v55 = vrot.slane %v1217_v44, %v6238_v40  ;;  %v3747_v58 = vrot.slane %v1214_v52, %v6252_v48  ;;  %v1446_v52 = vsel %vm527_vm0, %v321_v38, 0.0 }
 0x25b   :  { %v3748_v15 = vsel %vm2619_vm4, %v3747_v58, %v3743_v51  ;;  %1432 = vadd.xlane.f32.xlu1 %v1431_v53  ;;  %1429 = vadd.xlane.f32.xlu0 %v1428_v54  ;;  %v1449_v51 = vsel %vm527_vm0, %v322_v37, 0.0  ;;  %v323_v58 = vld [vmem:[%s9469_s0 + $0x9a0] sm:$0xff] }
 0x25c   :  { %v1223_v62 = vpop.xlane.xlu1 %1222  ;;  %v3753_v63 = vsel %vm9476_vm5, %v3752_v55, %v3748_v15  ;;  %v1220_v0 = vpop.xlane.xlu0 %1219  ;;  %v324_v55 = vld [vmem:[%s9469_s0 + $0x9a8] sm:$0xff] }
 0x25d   :  { %v3762_v4 = vrot.slane %v1223_v62, %v6260_v56  ;;  %v3757_v9 = vrot.slane %v1220_v0, %v6263_v57  ;;  %v1452_v0 = vsel %vm527_vm0, %v323_v58, 0.0 }
 0x25f   :  { %v3758_v17 = vsel %vm2633_vm6, %v3757_v9, %v3753_v63  ;;  %1438 = vadd.xlane.f32.xlu1 %v1437_v2  ;;  %1435 = vadd.xlane.f32.xlu0 %v1434_v3  ;;  %v1455_v63 = vsel %vm527_vm0, %v324_v55, 0.0  ;;  %v325_v9 = vld [vmem:[%s9469_s0 + $0x9b0] sm:$0xff] }
 0x260   :  { %v1229_v20 = vpop.xlane.xlu1 %1228  ;;  %v3763_v24 = vsel %vm2640_vm7, %v3762_v4, %v3758_v17  ;;  %v1226_v25 = vpop.xlane.xlu0 %1225  ;;  %v326_v4 = vld [vmem:[%s9469_s0 + $0x9b8] sm:$0xff] }
 0x261   :  { %v3772_v28 = vrot.slane %v1229_v20, %v6281_v7  ;;  %v3767_v33 = vrot.slane %v1226_v25, %v6293_v13  ;;  %v1458_v25 = vsel %vm527_vm0, %v325_v9, 0.0 }
 0x263   :  { %v3768_v39 = vsel %vm9474_vm8, %v3767_v33, %v3763_v24  ;;  %1444 = vadd.xlane.f32.xlu1 %v1443_v26  ;;  %1441 = vadd.xlane.f32.xlu0 %v1440_v27  ;;  %v1461_v24 = vsel %vm527_vm0, %v326_v4, 0.0  ;;  %v327_v33 = vld [vmem:[%s9469_s0 + $0x9c0] sm:$0xff] }
 0x264   :  { %v1235_v41 = vpop.xlane.xlu1 %1234  ;;  %v3773_v43 = vsel %vm2654_vm9, %v3772_v28, %v3768_v39  ;;  %v1232_v44 = vpop.xlane.xlu0 %1231  ;;  %v328_v28 = vld [vmem:[%s9469_s0 + $0x9c8] sm:$0xff] }
 0x265   :  { %v3782_v53 = vrot.slane %v1235_v41, %v6301_v23  ;;  %v3777_v54 = vrot.slane %v1232_v44, %v6313_v29  ;;  %v1467_v41 = vsel %vm527_vm0, %v328_v28, 0.0 }
 0x267   :  { %v3778_v18 = vsel %vm9475_vm10, %v3777_v54, %v3773_v43  ;;  %1450 = vadd.xlane.f32.xlu1 %v1449_v51  ;;  %1447 = vadd.xlane.f32.xlu0 %v1446_v52  ;;  %v1464_v43 = vsel %vm527_vm0, %v327_v33, 0.0  ;;  %v329_v54 = vld [vmem:[%s9469_s0 + $0x9d0] sm:$0xff] }
 0x268   :  { %v1241_v60 = vpop.xlane.xlu1 %1240  ;;  %v3783_v15 = vsel %vm2668_vm11, %v3782_v53, %v3778_v18  ;;  %v1238_v62 = vpop.xlane.xlu0 %1237  ;;  %v330_v53 = vld [vmem:[%s9469_s0 + $0x9d8] sm:$0xff] }
 0x269   :  { %v3792_v2 = vrot.slane %v1241_v60, %v6327_v46  ;;  %v3787_v3 = vrot.slane %v1238_v62, %v6321_v42  ;;  %v1473_v60 = vsel %vm527_vm0, %v330_v53, 0.0 }
 0x26b   :  { %v3788_v10 = vsel %vm9473_vm12, %v3787_v3, %v3783_v15  ;;  %1456 = vadd.xlane.f32.xlu1 %v1455_v63  ;;  %1453 = vadd.xlane.f32.xlu0 %v1452_v0  ;;  %v1470_v15 = vsel %vm527_vm0, %v329_v54, 0.0  ;;  %v332_v0 = vld [vmem:[%s9469_s0 + $0x9e8] sm:$0xff] }
 0x26c   :  { %v1247_v16 = vpop.xlane.xlu1 %1246  ;;  %v3793_v17 = vsel %vm2682_vm13, %v3792_v2, %v3788_v10  ;;  %v1244_v20 = vpop.xlane.xlu0 %1243  ;;  %v331_v2 = vld [vmem:[%s9469_s0 + $0x9e0] sm:$0xff] }
 0x26d   :  { %v3802_v26 = vrot.slane %v1247_v16, %v6346_v61  ;;  %v3797_v27 = vrot.slane %v1244_v20, %v6341_v59  ;;  %v1479_v16 = vsel %vm527_vm0, %v332_v0, 0.0  ;;  %v337_v0 = vld [vmem:[%s9469_s0 + $0xa10] sm:$0xff] }
 0x26f   :  { %v3798_v37 = vsel %vm2689_vm14, %v3797_v27, %v3793_v17  ;;  %1462 = vadd.xlane.f32.xlu1 %v1461_v24  ;;  %1459 = vadd.xlane.f32.xlu0 %v1458_v25  ;;  %v1476_v17 = vsel %vm527_vm0, %v331_v2, 0.0  ;;  %v334_v25 = vld [vmem:[%s9469_s0 + $0x9f8] sm:$0xff] }
 0x270   :  { %v1253_v38 = vpop.xlane.xlu1 %1252  ;;  %v1250_v39 = vpop.xlane.xlu0 %1249  ;;  %v7738_v44 = vsel %vm2696_vm15, %v3802_v26, %v3798_v37  ;;  %v333_v26 = vld [vmem:[%s9469_s0 + $0x9f0] sm:$0xff] }
 0x271   :  { %9481 = vst [vmem:[#allocation9_spill] sm:$0xff] %v7738_v44  ;;  %v3811_v51 = vrot.slane %v1253_v38, %v6226_v32  ;;  %v3807_v52 = vrot.slane %v1250_v39, %v6220_v30  ;;  %v1485_v38 = vsel %vm527_vm0, %v334_v25, 0.0  ;;  %v1482_v39 = vsel %vm527_vm0, %v333_v26, 0.0  ;;  %v339_v25 = vld [vmem:[%s9469_s0 + $0xa20] sm:$0xff] }
 0x273   :  { %v3812_v55 = vsel %vm2598_vm1, %v3811_v51, %v3807_v52  ;;  %1468 = vadd.xlane.f32.xlu1 %v1467_v41  ;;  %1465 = vadd.xlane.f32.xlu0 %v1464_v43  ;;  %v336_v51 = vld [vmem:[%s9469_s0 + $0xa08] sm:$0xff]  ;;  %v335_v52 = vld [vmem:[%s9469_s0 + $0xa00] sm:$0xff] }
 0x274   :  { %v1259_v58 = vpop.xlane.xlu1 %1258  ;;  %v1256_v18 = vpop.xlane.xlu0 %1255 }
 0x275   :  { %v3821_v62 = vrot.slane %v1259_v58, %v6223_v31  ;;  %v3816_v63 = vrot.slane %v1256_v18, %v6233_v35  ;;  %v1491_v18 = vsel %vm527_vm0, %v336_v51, 0.0  ;;  %v342_v51 = vld [vmem:[%s9469_s0 + $0xa38] sm:$0xff] }
 0x277   :  { %v3817_v3 = vsel %vm2605_vm2, %v3816_v63, %v3812_v55  ;;  %1474 = vadd.xlane.f32.xlu1 %v1473_v60  ;;  %1471 = vadd.xlane.f32.xlu0 %v1470_v15  ;;  %v1488_v60 = vsel %vm527_vm0, %v335_v52, 0.0  ;;  %v338_v63 = vld [vmem:[%s9469_s0 + $0xa18] sm:$0xff]  ;;  %v341_v52 = vld [vmem:[%s9469_s0 + $0xa30] sm:$0xff] }
 0x278   :  { %v1265_v4 = vpop.xlane.xlu1 %1264  ;;  %v3822_v9 = vsel %vm2612_vm3, %v3821_v62, %v3817_v3  ;;  %v1262_v10 = vpop.xlane.xlu0 %1261 }
 0x279   :  { %v3831_v20 = vrot.slane %v1265_v4, %v6238_v40  ;;  %v3826_v24 = vrot.slane %v1262_v10, %v6252_v48  ;;  %v1497_v10 = vsel %vm527_vm0, %v338_v63, 0.0  ;;  %v344_v63 = vld [vmem:[%s9469_s0 + $0xa48] sm:$0xff] }
 0x27b   :  { %v3827_v27 = vsel %vm2619_vm4, %v3826_v24, %v3822_v9  ;;  %1480 = vadd.xlane.f32.xlu1 %v1479_v16  ;;  %1477 = vadd.xlane.f32.xlu0 %v1476_v17  ;;  %v1494_v16 = vsel %vm527_vm0, %v337_v0, 0.0  ;;  %v340_v24 = vld [vmem:[%s9469_s0 + $0xa28] sm:$0xff]  ;;  %v343_v0 = vld [vmem:[%s9469_s0 + $0xa40] sm:$0xff] }
 0x27c   :  { %v1271_v28 = vpop.xlane.xlu1 %1270  ;;  %v3832_v33 = vsel %vm9476_vm5, %v3831_v20, %v3827_v27  ;;  %v1268_v37 = vpop.xlane.xlu0 %1267 }
 0x27d   :  { %v3841_v41 = vrot.slane %v1271_v28, %v6260_v56  ;;  %v3836_v43 = vrot.slane %v1268_v37, %v6263_v57  ;;  %v1503_v37 = vsel %vm527_vm0, %v340_v24, 0.0  ;;  %v345_v24 = vld [vmem:[%s9469_s0 + $0xa50] sm:$0xff] }
 0x27f   :  { %v3837_v53 = vsel %vm2633_vm6, %v3836_v43, %v3832_v33  ;;  %1486 = vadd.xlane.f32.xlu1 %v1485_v38  ;;  %1483 = vadd.xlane.f32.xlu0 %v1482_v39  ;;  %v1500_v38 = vsel %vm527_vm0, %v339_v25, 0.0  ;;  %v5184_v39 = vcombine.high %v7621_v47, %v7621_v47  ;;  %v1509_v47 = vsel %vm527_vm0, %v342_v51, 0.0  ;;  %v350_v51 = vld [vmem:[%s9469_s0 + $0xa78] sm:$0xff] }
 0x280   :  { %v1277_v54 = vpop.xlane.xlu1 %1276  ;;  %v3842_v55 = vsel %vm2640_vm7, %v3841_v41, %v3837_v53  ;;  %v1274_v58 = vpop.xlane.xlu0 %1273 }
 0x281   :  { %v3851_v15 = vrot.slane %v1277_v54, %v6281_v7  ;;  %v3846_v62 = vrot.slane %v1274_v58, %v6293_v13  ;;  %v1506_v58 = vsel %vm527_vm0, %v341_v52, 0.0  ;;  %v349_v52 = vld [vmem:[%s9469_s0 + $0xa70] sm:$0xff] }
 0x283   :  { %v3847_v2 = vsel %vm9474_vm8, %v3846_v62, %v3842_v55  ;;  %1492 = vadd.xlane.f32.xlu1 %v1491_v18  ;;  %1489 = vadd.xlane.f32.xlu0 %v1488_v60  ;;  %v7825_v18 = vrot.slane %v5184_v39, %v7616_v45 }
 0x284   :  { %v1283_v3 = vpop.xlane.xlu1 %1282  ;;  %v3852_v4 = vsel %vm2654_vm9, %v3851_v15, %v3847_v2  ;;  %v1280_v9 = vpop.xlane.xlu0 %1279 }
 0x285   :  { %v3861_v17 = vrot.slane %v1283_v3, %v6301_v23  ;;  %v3856_v20 = vrot.slane %v1280_v9, %v6313_v29  ;;  %v5200_v2 = vcombine.high %v7825_v18, %v7825_v18 }
 0x287   :  { %v3857_v26 = vsel %vm9475_vm10, %v3856_v20, %v3852_v4  ;;  %1498 = vadd.xlane.f32.xlu1 %v1497_v10  ;;  %1495 = vadd.xlane.f32.xlu0 %v1494_v16  ;;  %v1515_v10 = vsel %vm527_vm0, %v344_v63, 0.0  ;;  %v1512_v16 = vsel %vm527_vm0, %v343_v0, 0.0  ;;  %v346_v20 = vld [vmem:[%s9469_s0 + $0xa58] sm:$0xff] }
 0x288   :  { %v1289_v27 = vpop.xlane.xlu1 %1288  ;;  %v3862_v28 = vsel %vm2668_vm11, %v3861_v17, %v3857_v26  ;;  %v1286_v33 = vpop.xlane.xlu0 %1285  ;;  %5338 = vmatprep.subr.mxu1 %v5200_v2  ;;  %v354_v2 = vld [vmem:[%s9469_s0 + $0xa98] sm:$0xff] }
 0x289   :  { %v3871_v41 = vrot.slane %v1289_v27, %v6327_v46  ;;  %v3866_v43 = vrot.slane %v1286_v33, %v6321_v42  ;;  %v1521_v27 = vsel %vm527_vm0, %v346_v20, 0.0  ;;  %v348_v33 = vld [vmem:[%s9469_s0 + $0xa68] sm:$0xff]  ;;  %v1545_v20 = vsel %vm527_vm0, %v354_v2, 0.0 }
 0x28b   :  { %v3867_v53 = vsel %vm9473_vm12, %v3866_v43, %v3862_v28  ;;  %1504 = vadd.xlane.f32.xlu1 %v1503_v37  ;;  %1501 = vadd.xlane.f32.xlu0 %v1500_v38  ;;  %v1518_v28 = vsel %vm527_vm0, %v345_v24, 0.0  ;;  %v347_v37 = vld [vmem:[%s9469_s0 + $0xa60] sm:$0xff] }
 0x28c   :  { %v1295_v54 = vpop.xlane.xlu1 %1294  ;;  %v1292_v55 = vpop.xlane.xlu0 %1291  ;;  %v3872_v60 = vsel %vm2682_vm13, %v3871_v41, %v3867_v53  ;;  %v1527_v41 = vsel %vm527_vm0, %v348_v33, 0.0  ;;  %v1524_v43 = vsel %vm527_vm0, %v347_v37, 0.0 }
 0x28d   :  { %v3881_v15 = vrot.slane %v1295_v54, %v6346_v61  ;;  %v3876_v62 = vrot.slane %v1292_v55, %v6341_v59  ;;  %v1533_v55 = vsel %vm527_vm0, %v350_v51, 0.0  ;;  %v358_v51 = vld [vmem:[%s9469_s0 + $0xab8] sm:$0xff] }
 0x28f   :  { %1510 = vadd.xlane.f32.xlu1 %v1509_v47  ;;  %1507 = vadd.xlane.f32.xlu0 %v1506_v58  ;;  %v3877_v3 = vsel %vm2689_vm14, %v3876_v62, %v3872_v60  ;;  %v1530_v47 = vsel %vm527_vm0, %v349_v52, 0.0  ;;  %v352_v58 = vld [vmem:[%s9469_s0 + $0xa88] sm:$0xff]  ;;  %v351_v60 = vld [vmem:[%s9469_s0 + $0xa80] sm:$0xff]  ;;  %v357_v52 = vld [vmem:[%s9469_s0 + $0xab0] sm:$0xff] }
 0x290   :  { %v7839_v4 = vpop.xlane.xlu1 %1300  ;;  %v7841_v9 = vpop.xlane.xlu0 %1297  ;;  %v7846_v17 = vsel %vm2696_vm15, %v3881_v15, %v3877_v3  ;;  %v1539_v63 = vsel %vm527_vm0, %v352_v58, 0.0  ;;  %v1536_v0 = vsel %vm527_vm0, %v351_v60, 0.0  ;;  %v353_v3 = vld [vmem:[%s9469_s0 + $0xa90] sm:$0xff]  ;;  %v1557_v58 = vsel %vm527_vm0, %v358_v51, 0.0 }
 0x291   :  { %9482 = vst [vmem:[#allocation10_spill] sm:$0xff] %v7846_v17  ;;  %v1542_v24 = vsel %vm527_vm0, %v353_v3, 0.0  ;;  %v1554_v60 = vsel %vm527_vm0, %v357_v52, 0.0  ;;  %v3890_v2 = vrot.slane %v7839_v4, %v6226_v32  ;;  %v3886_v3 = vrot.slane %v7841_v9, %v6220_v30  ;;  %v361_v4 = vld [vmem:[%s9469_s0 + $0xad0] sm:$0xff] }
 0x293   :  { %1516 = vadd.xlane.f32.xlu1 %v1515_v10  ;;  %1513 = vadd.xlane.f32.xlu0 %v1512_v16  ;;  %v3891_v52 = vsel %vm2598_vm1, %v3890_v2, %v3886_v3  ;;  %v399_v2 = vld [vmem:[%s9469_s0 + $0xc00] sm:$0xff] }
 0x294   :  { %v7854_v25 = vpop.xlane.xlu1 %1306  ;;  %v7856_v26 = vpop.xlane.xlu0 %1303 }
 0x297   :  { %1522 = vadd.xlane.f32.xlu1 %v1521_v27  ;;  %1519 = vadd.xlane.f32.xlu0 %v1518_v28  ;;  %v356_v27 = vld [vmem:[%s9469_s0 + $0xaa8] sm:$0xff]  ;;  %v355_v28 = vld [vmem:[%s9469_s0 + $0xaa0] sm:$0xff] }
 0x298   :  { %v7866_v38 = vpop.xlane.xlu1 %1312  ;;  %v7868_v39 = vpop.xlane.xlu0 %1309 }
 0x29b   :  { %1528 = vadd.xlane.f32.xlu1 %v1527_v41  ;;  %1525 = vadd.xlane.f32.xlu0 %v1524_v43  ;;  %v1551_v41 = vsel %vm527_vm0, %v356_v27, 0.0  ;;  %v1548_v43 = vsel %vm527_vm0, %v355_v28, 0.0 }
 0x29c   :  { %v7878_v53 = vpop.xlane.xlu1 %1318  ;;  %v7880_v54 = vpop.xlane.xlu0 %1315 }
 0x29f   :  { %1534 = vadd.xlane.f32.xlu1 %v1533_v55  ;;  %1531 = vadd.xlane.f32.xlu0 %v1530_v47 }
 0x2a0   :  { %v7890_v15 = vpop.xlane.xlu1 %1324  ;;  %v7892_v62 = vpop.xlane.xlu0 %1321 }
 0x2a3   :  { %1540 = vadd.xlane.f32.xlu1 %v1539_v63  ;;  %1537 = vadd.xlane.f32.xlu0 %v1536_v0  ;;  %v360_v63 = vld [vmem:[%s9469_s0 + $0xac8] sm:$0xff]  ;;  %v359_v0 = vld [vmem:[%s9469_s0 + $0xac0] sm:$0xff] }
 0x2a4   :  { %v7902_v10 = vpop.xlane.xlu1 %1330  ;;  %v7904_v16 = vpop.xlane.xlu0 %1327  ;;  %v1563_v27 = vsel %vm527_vm0, %v360_v63, 0.0  ;;  %v1560_v28 = vsel %vm527_vm0, %v359_v0, 0.0  ;;  %v1566_v0 = vsel %vm527_vm0, %v361_v4, 0.0 }
 0x2a7   :  { %1546 = vadd.xlane.f32.xlu1 %v1545_v20  ;;  %1543 = vadd.xlane.f32.xlu0 %v1542_v24 }
 0x2a8   :  { %v7914_v33 = vpop.xlane.xlu1 %1336  ;;  %v7916_v37 = vpop.xlane.xlu0 %1333 }
 0x2ab   :  { %1552 = vadd.xlane.f32.xlu1 %v1551_v41  ;;  %1549 = vadd.xlane.f32.xlu0 %v1548_v43  ;;  %v3895_v41 = vrot.slane %v7856_v26, %v6233_v35  ;;  %v415_v43 = vld [vmem:[%s9469_s0 + $0xc80] sm:$0xff] }
 0x2ac   :  { %v7926_v55 = vpop.xlane.xlu1 %1342  ;;  %v7928_v47 = vpop.xlane.xlu0 %1339  ;;  %v1728_v63 = vsel %vm527_vm0, %v415_v43, 0.0 }
 0x2ad   :  { %v3896_v44 = vsel %vm2605_vm2, %v3895_v41, %v3891_v52  ;;  %v1680_v52 = vsel %vm527_vm0, %v399_v2, 0.0 }
 0x2af   :  { %1558 = vadd.xlane.f32.xlu1 %v1557_v58  ;;  %1555 = vadd.xlane.f32.xlu0 %v1554_v60  ;;  %v3900_v58 = vrot.slane %v7854_v25, %v6223_v31  ;;  %v416_v25 = vld [vmem:[%s9469_s0 + $0xc88] sm:$0xff] }
 0x2b0   :  { %v1349_v20 = vpop.xlane.xlu1 %1348  ;;  %v1346_v24 = vpop.xlane.xlu0 %1345 }
 0x2b1   :  { %v3969_v51 = vrot.slane %v1349_v20, %v6226_v32  ;;  %v3965_v9 = vrot.slane %v1346_v24, %v6220_v30  ;;  %v3905_v20 = vrot.slane %v7868_v39, %v6252_v48  ;;  %v3910_v39 = vrot.slane %v7866_v38, %v6238_v40 }
 0x2b2   :  { %v3901_v41 = vsel %vm2612_vm3, %v3900_v58, %v3896_v44  ;;  %v400_v44 = vld [vmem:[%s9469_s0 + $0xc08] sm:$0xff] }
 0x2b3   :  { %1564 = vadd.xlane.f32.xlu1 %v1563_v27  ;;  %1561 = vadd.xlane.f32.xlu0 %v1560_v28  ;;  %v3970_v3 = vsel %vm2598_vm1, %v3969_v51, %v3965_v9  ;;  %v3906_v17 = vsel %vm2619_vm4, %v3905_v20, %v3901_v41  ;;  %v3915_v51 = vrot.slane %v7880_v54, %v6263_v57  ;;  %v418_v41 = vld [vmem:[%s9469_s0 + $0xc98] sm:$0xff] }
 0x2b4   :  { %v1355_v26 = vpop.xlane.xlu1 %1354  ;;  %v1352_v60 = vpop.xlane.xlu0 %1351  ;;  %v3920_v54 = vrot.slane %v7878_v53, %v6260_v56 }
 0x2b5   :  { %v3974_v24 = vrot.slane %v1352_v60, %v6233_v35  ;;  %v3979_v27 = vrot.slane %v1355_v26, %v6223_v31  ;;  %v1731_v60 = vsel %vm527_vm0, %v416_v25, 0.0  ;;  %v417_v26 = vld [vmem:[%s9469_s0 + $0xc90] sm:$0xff]  ;;  %v1683_v25 = vsel %vm527_vm0, %v400_v44, 0.0 }
 0x2b6   :  { %v1734_v2 = vsel %vm527_vm0, %v417_v26, 0.0  ;;  %v3935_v44 = vrot.slane %v7904_v16, %v6313_v29  ;;  %v3940_v16 = vrot.slane %v7902_v10, %v6301_v23  ;;  %v403_v10 = vld [vmem:[%s9469_s0 + $0xc20] sm:$0xff] }
 0x2b7   :  { %v3975_v28 = vsel %vm2605_vm2, %v3974_v24, %v3970_v3  ;;  %1729 = vadd.xlane.f32.xlu1 %v1728_v63  ;;  %1567 = vadd.xlane.f32.xlu0 %v1566_v0  ;;  %v3911_v0 = vsel %vm9476_vm5, %v3910_v39, %v3906_v17  ;;  %v401_v17 = vld [vmem:[%s9469_s0 + $0xc10] sm:$0xff] }
 0x2b8   :  { %v1361_v43 = vpop.xlane.xlu1 %1360  ;;  %v1358_v4 = vpop.xlane.xlu0 %1357  ;;  %v3980_v58 = vsel %vm2612_vm3, %v3979_v27, %v3975_v28  ;;  %v3916_v3 = vsel %vm2633_vm6, %v3915_v51, %v3911_v0  ;;  %v3925_v27 = vrot.slane %v7892_v62, %v6293_v13  ;;  %v3930_v62 = vrot.slane %v7890_v15, %v6281_v7  ;;  %v402_v15 = vld [vmem:[%s9469_s0 + $0xc18] sm:$0xff] }
 0x2b9   :  { %v3984_v9 = vrot.slane %v1358_v4, %v6252_v48  ;;  %v3989_v38 = vrot.slane %v1361_v43, %v6238_v40  ;;  %v3921_v4 = vsel %vm2640_vm7, %v3920_v54, %v3916_v3  ;;  %v1737_v51 = vsel %vm527_vm0, %v418_v41, 0.0 }
 0x2ba   :  { %v3926_v26 = vsel %vm9474_vm8, %v3925_v27, %v3921_v4  ;;  %v1689_v3 = vsel %vm527_vm0, %v402_v15, 0.0 }
 0x2bb   :  { %v3985_v63 = vsel %vm2619_vm4, %v3984_v9, %v3980_v58  ;;  %1681 = vadd.xlane.f32.xlu1 %v1680_v52  ;;  %1732 = vadd.xlane.f32.xlu0 %v1731_v60  ;;  %v1686_v9 = vsel %vm527_vm0, %v401_v17, 0.0  ;;  %v419_v58 = vld [vmem:[%s9469_s0 + $0xca0] sm:$0xff]  ;;  %v420_v17 = vld [vmem:[%s9469_s0 + $0xca8] sm:$0xff] }
 0x2bc   :  { %v1367_v20 = vpop.xlane.xlu1 %1366  ;;  %v1364_v24 = vpop.xlane.xlu0 %1363  ;;  %v3990_v39 = vsel %vm9476_vm5, %v3989_v38, %v3985_v63 }
 0x2bd   :  { %v3994_v28 = vrot.slane %v1364_v24, %v6263_v57  ;;  %v3999_v53 = vrot.slane %v1367_v20, %v6260_v56  ;;  %v3931_v20 = vsel %vm2654_vm9, %v3930_v62, %v3926_v26  ;;  %v3955_v26 = vrot.slane %v7928_v47, %v6341_v59 }
 0x2be   :  { %v3936_v27 = vsel %vm9475_vm10, %v3935_v44, %v3931_v20  ;;  %v3960_v47 = vrot.slane %v7926_v55, %v6346_v61  ;;  %v405_v55 = vld [vmem:[%s9469_s0 + $0xc30] sm:$0xff] }
 0x2bf   :  { %v3995_v43 = vsel %vm2633_vm6, %v3994_v28, %v3990_v39  ;;  %1735 = vadd.xlane.f32.xlu1 %v1734_v2  ;;  %1684 = vadd.xlane.f32.xlu0 %v1683_v25  ;;  %v1740_v25 = vsel %vm527_vm0, %v419_v58, 0.0  ;;  %v3945_v28 = vrot.slane %v7916_v37, %v6321_v42  ;;  %v3950_v37 = vrot.slane %v7914_v33, %v6327_v46  ;;  %v404_v33 = vld [vmem:[%s9469_s0 + $0xc28] sm:$0xff] }
 0x2c0   :  { %v1373_v52 = vpop.xlane.xlu1 %1372  ;;  %v1370_v60 = vpop.xlane.xlu0 %1369  ;;  %v4000_v54 = vsel %vm2640_vm7, %v3999_v53, %v3995_v43  ;;  %v3941_v62 = vsel %vm2668_vm11, %v3940_v16, %v3936_v27  ;;  %v1695_v20 = vsel %vm527_vm0, %v404_v33, 0.0 }
 0x2c1   :  { %v4004_v38 = vrot.slane %v1370_v60, %v6293_v13  ;;  %v4009_v63 = vrot.slane %v1373_v52, %v6281_v7  ;;  %v1743_v60 = vsel %vm527_vm0, %v420_v17, 0.0 }
 0x2c3   :  { %v4005_v0 = vsel %vm9474_vm8, %v4004_v38, %v4000_v54  ;;  %1738 = vadd.xlane.f32.xlu1 %v1737_v51  ;;  %1687 = vadd.xlane.f32.xlu0 %v1686_v9  ;;  %v1692_v51 = vsel %vm527_vm0, %v403_v10, 0.0  ;;  %v3946_v9 = vsel %vm9473_vm12, %v3945_v28, %v3941_v62  ;;  %v421_v38 = vld [vmem:[%s9469_s0 + $0xcb0] sm:$0xff] }
 0x2c4   :  { %v1379_v24 = vpop.xlane.xlu1 %1378  ;;  %v1376_v2 = vpop.xlane.xlu0 %1375  ;;  %v4010_v39 = vsel %vm2654_vm9, %v4009_v63, %v4005_v0  ;;  %v1746_v16 = vsel %vm527_vm0, %v421_v38, 0.0  ;;  %v407_v38 = vld [vmem:[%s9469_s0 + $0xc40] sm:$0xff] }
 0x2c5   :  { %v4014_v41 = vrot.slane %v1376_v2, %v6313_v29  ;;  %v4019_v53 = vrot.slane %v1379_v24, %v6301_v23  ;;  %v3951_v24 = vsel %vm2682_vm13, %v3950_v37, %v3946_v9 }
 0x2c6   :  { %v3956_v27 = vsel %vm2689_vm14, %v3955_v26, %v3951_v24  ;;  %v408_v24 = vld [vmem:[%s9469_s0 + $0xc48] sm:$0xff] }
 0x2c7   :  { %v4015_v43 = vsel %vm9475_vm10, %v4014_v41, %v4010_v39  ;;  %1741 = vadd.xlane.f32.xlu1 %v1740_v25  ;;  %1690 = vadd.xlane.f32.xlu0 %v1689_v3  ;;  %v422_v3 = vld [vmem:[%s9469_s0 + $0xcb8] sm:$0xff]  ;;  %v3961_v37 = vsel %vm2696_vm15, %v3960_v47, %v3956_v27  ;;  %v447_v47 = vld [vmem:[%s9469_s0 + $0xd80] sm:$0xff]  ;;  %v432_v27 = vld [vmem:[%s9469_s0 + $0xd08] sm:$0xff] }
 0x2c8   :  { %v1385_v4 = vpop.xlane.xlu1 %1384  ;;  %v1382_v52 = vpop.xlane.xlu0 %1381  ;;  %v4020_v15 = vsel %vm2668_vm11, %v4019_v53, %v4015_v43  ;;  %v1749_v39 = vsel %vm527_vm0, %v422_v3, 0.0  ;;  %v1698_v43 = vsel %vm527_vm0, %v405_v55, 0.0  ;;  %v1707_v55 = vsel %vm527_vm0, %v408_v24, 0.0 }
 0x2c9   :  { %v4024_v44 = vrot.slane %v1382_v52, %v6321_v42  ;;  %v4029_v58 = vrot.slane %v1385_v4, %v6327_v46  ;;  %v423_v4 = vld [vmem:[%s9469_s0 + $0xcc0] sm:$0xff]  ;;  %v406_v52 = vld [vmem:[%s9469_s0 + $0xc38] sm:$0xff] }
 0x2ca   :  { %v1701_v26 = vsel %vm527_vm0, %v406_v52, 0.0 }
 0x2cb   :  { %v4025_v63 = vsel %vm9473_vm12, %v4024_v44, %v4020_v15  ;;  %1744 = vadd.xlane.f32.xlu1 %v1743_v60  ;;  %1693 = vadd.xlane.f32.xlu0 %v1692_v51  ;;  %vm5147_vm12 = vcmask 1041409   ;;  %v424_v44 = vld [vmem:[%s9469_s0 + $0xcc8] sm:$0xff]  ;;  %v1704_v15 = vsel %vm527_vm0, %v407_v38, 0.0 }
 0x2cc   :  { %v1391_v54 = vpop.xlane.xlu1 %1390  ;;  %v1388_v0 = vpop.xlane.xlu0 %1387  ;;  %v4030_v28 = vsel %vm2682_vm13, %v4029_v58, %v4025_v63  ;;  %v5148_v60 = vsel %vm5147_vm12, %v3961_v37, %v6370_v19  ;;  %v1755_v58 = vsel %vm527_vm0, %v424_v44, 0.0  ;;  %v448_v63 = vld [vmem:[%s9469_s0 + $0xd88] sm:$0xff]  ;;  %v409_v37 = vld [vmem:[%s9469_s0 + $0xc50] sm:$0xff]  ;;  %v426_v44 = vld [vmem:[%s9469_s0 + $0xcd8] sm:$0xff] }
 0x2cd   :  { %v4039_v2 = vrot.slane %v1391_v54, %v6346_v61  ;;  %v4034_v25 = vrot.slane %v1388_v0, %v6341_v59  ;;  %v1827_v0 = vsel %vm527_vm0, %v448_v63, 0.0  ;;  %v1761_v63 = vsel %vm527_vm0, %v426_v44, 0.0 }
 0x2cf   :  { %1747 = vadd.xlane.f32.xlu1 %v1746_v16  ;;  %1696 = vadd.xlane.f32.xlu0 %v1695_v20  ;;  %v4035_v41 = vsel %vm2689_vm14, %v4034_v25, %v4030_v28  ;;  %v1824_v16 = vsel %vm527_vm0, %v447_v47, 0.0  ;;  %v425_v20 = vld [vmem:[%s9469_s0 + $0xcd0] sm:$0xff]  ;;  %v431_v28 = vld [vmem:[%s9469_s0 + $0xd00] sm:$0xff]  ;;  %v410_v47 = vld [vmem:[%s9469_s0 + $0xc58] sm:$0xff] }
 0x2d0   :  { %v8078_v17 = vpop.xlane.xlu1 %1396  ;;  %v8080_v10 = vpop.xlane.xlu0 %1393  ;;  %v4040_v53 = vsel %vm2696_vm15, %v4039_v2, %v4035_v41  ;;  %v1758_v3 = vsel %vm527_vm0, %v425_v20, 0.0 }
 0x2d1   :  { %v5149_v62 = vsel %vm5147_vm12, %v4040_v53, %v6467_v1  ;;  %v1752_v1 = vsel %vm527_vm0, %v423_v4, 0.0  ;;  %v4044_v20 = vrot.slane %v8080_v10, %v6220_v30 }
 0x2d2   :  { %5332 = vmatprep.mubr.f32.mxu1 %v5149_v62  ;;  %v449_v62 = vld [vmem:[%s9469_s0 + $0xd90] sm:$0xff] }
 0x2d3   :  { %1750 = vadd.xlane.f32.xlu1 %v1749_v39  ;;  %1699 = vadd.xlane.f32.xlu0 %v1698_v43  ;;  %v1779_v39 = vsel %vm527_vm0, %v432_v27, 0.0  ;;  %v1776_v43 = vsel %vm527_vm0, %v431_v28, 0.0 }
 0x2d4   :  { %5333 = vmatmul.mubr.f32.vlgmr.msra.gmra.mrb[0].mxu1 %v5148_v60  ;;  %v8096_v51 = vpop.xlane.xlu1 %1402  ;;  %v8098_v9 = vpop.xlane.xlu0 %1399  ;;  %v1710_v60 = vsel %vm527_vm0, %v409_v37, 0.0 }
 0x2d5   :  { %5339 = vmatpush1.xpose.msra.mxu1 %v7825_v18  ;;  %v4053_v28 = vrot.slane %v8098_v9, %v6233_v35 }
 0x2d7   :  { %1753 = vadd.xlane.f32.xlu1 %v1752_v1  ;;  %1702 = vadd.xlane.f32.xlu0 %v1701_v26  ;;  %v1830_v1 = vsel %vm527_vm0, %v449_v62, 0.0  ;;  %v433_v26 = vld [vmem:[%s9469_s0 + $0xd10] sm:$0xff]  ;;  %v4058_v62 = vrot.slane %v8096_v51, %v6223_v31  ;;  %v451_v51 = vld [vmem:[%s9469_s0 + $0xda0] sm:$0xff] }
 0x2d8   :  { %v8109_v19 = vpop.xlane.xlu1 %1408  ;;  %v8111_v33 = vpop.xlane.xlu0 %1405 }
 0x2db   :  { %1756 = vadd.xlane.f32.xlu1 %v1755_v58  ;;  %1705 = vadd.xlane.f32.xlu0 %v1704_v15  ;;  %v1782_v15 = vsel %vm527_vm0, %v433_v26, 0.0 }
 0x2dc   :  { %v8121_v18 = vpop.xlane.xlu1 %1414  ;;  %v8123_v54 = vpop.xlane.xlu0 %1411 }
 0x2df   :  { %1828 = vadd.xlane.f32.xlu1 %v1827_v0  ;;  %1825 = vadd.xlane.f32.xlu0 %v1824_v16  ;;  %v450_v0 = vld [vmem:[%s9469_s0 + $0xd98] sm:$0xff]  ;;  %v4048_v16 = vrot.slane %v8078_v17, %v6226_v32  ;;  %v427_v17 = vld [vmem:[%s9469_s0 + $0xce0] sm:$0xff] }
 0x2e0   :  { %v8133_v2 = vpop.xlane.xlu1 %1420  ;;  %v8135_v25 = vpop.xlane.xlu0 %1417  ;;  %v1833_v27 = vsel %vm527_vm0, %v450_v0, 0.0  ;;  %v1764_v26 = vsel %vm527_vm0, %v427_v17, 0.0  ;;  %v4073_v17 = vrot.slane %v8123_v54, %v6263_v57  ;;  %v4078_v54 = vrot.slane %v8121_v18, %v6260_v56  ;;  %v452_v18 = vld [vmem:[%s9469_s0 + $0xda8] sm:$0xff] }
 0x2e1   :  { %v4049_v37 = vsel %vm2598_vm1, %v4048_v16, %v4044_v20 }
 0x2e2   :  { %v4054_v44 = vsel %vm2605_vm2, %v4053_v28, %v4049_v37  ;;  %v1836_v28 = vsel %vm527_vm0, %v451_v51, 0.0 }
 0x2e3   :  { %1759 = vadd.xlane.f32.xlu1 %v1758_v3  ;;  %1708 = vadd.xlane.f32.xlu0 %v1707_v55  ;;  %v1713_v55 = vsel %vm527_vm0, %v410_v47, 0.0  ;;  %v411_v47 = vld [vmem:[%s9469_s0 + $0xc60] sm:$0xff] }
 0x2e4   :  { %v8145_v41 = vpop.xlane.xlu1 %1426  ;;  %v8147_v53 = vpop.xlane.xlu0 %1423 }
 0x2e7   :  { %1780 = vadd.xlane.f32.xlu1 %v1779_v39  ;;  %1777 = vadd.xlane.f32.xlu0 %v1776_v43  ;;  %v434_v39 = vld [vmem:[%s9469_s0 + $0xd18] sm:$0xff] }
 0x2e8   :  { %v8157_v4 = vpop.xlane.xlu1 %1432  ;;  %v8159_v52 = vpop.xlane.xlu0 %1429 }
 0x2eb   :  { %1711 = vadd.xlane.f32.xlu1 %v1710_v60  ;;  %1831 = vadd.xlane.f32.xlu0 %v1830_v1  ;;  %v1785_v1 = vsel %vm527_vm0, %v434_v39, 0.0 }
 0x2ec   :  { %v8169_v38 = vpop.xlane.xlu1 %1438  ;;  %v8171_v58 = vpop.xlane.xlu0 %1435 }
 0x2ef   :  { %1783 = vadd.xlane.f32.xlu1 %v1782_v15  ;;  %1762 = vadd.xlane.f32.xlu0 %v1761_v63  ;;  %v4063_v15 = vrot.slane %v8111_v33, %v6252_v48  ;;  %v4068_v33 = vrot.slane %v8109_v19, %v6238_v40  ;;  %v428_v19 = vld [vmem:[%s9469_s0 + $0xce8] sm:$0xff] }
 0x2f0   :  { %v1445_v24 = vpop.xlane.xlu1 %1444  ;;  %v1442_v3 = vpop.xlane.xlu0 %1441 }
 0x2f1   :  { %v4127_v43 = vrot.slane %v1445_v24, %v6226_v32  ;;  %v4123_v10 = vrot.slane %v1442_v3, %v6220_v30  ;;  %v4059_v24 = vsel %vm2612_vm3, %v4058_v62, %v4054_v44 }
 0x2f2   :  { %v4064_v39 = vsel %vm2619_vm4, %v4063_v15, %v4059_v24  ;;  %v1767_v15 = vsel %vm527_vm0, %v428_v19, 0.0 }
 0x2f3   :  { %1714 = vadd.xlane.f32.xlu1 %v1713_v55  ;;  %1834 = vadd.xlane.f32.xlu0 %v1833_v27  ;;  %v4128_v0 = vsel %vm2598_vm1, %v4127_v43, %v4123_v10  ;;  %v1716_v27 = vsel %vm527_vm0, %v411_v47, 0.0  ;;  %v435_v10 = vld [vmem:[%s9469_s0 + $0xd20] sm:$0xff]  ;;  %v4083_v47 = vrot.slane %v8135_v25, %v6293_v13  ;;  %v4088_v25 = vrot.slane %v8133_v2, %v6281_v7  ;;  %v429_v2 = vld [vmem:[%s9469_s0 + $0xcf0] sm:$0xff] }
 0x2f4   :  { %v1451_v9 = vpop.xlane.xlu1 %1450  ;;  %v1448_v60 = vpop.xlane.xlu0 %1447  ;;  %v1788_v44 = vsel %vm527_vm0, %v435_v10, 0.0  ;;  %v436_v10 = vld [vmem:[%s9469_s0 + $0xd28] sm:$0xff] }
 0x2f5   :  { %v4132_v63 = vrot.slane %v1448_v60, %v6233_v35  ;;  %v4137_v16 = vrot.slane %v1451_v9, %v6223_v31  ;;  %v4069_v60 = vsel %vm9476_vm5, %v4068_v33, %v4064_v39 }
 0x2f7   :  { %v4133_v20 = vsel %vm2605_vm2, %v4132_v63, %v4128_v0  ;;  %1786 = vadd.xlane.f32.xlu1 %v1785_v1  ;;  %1765 = vadd.xlane.f32.xlu0 %v1764_v26  ;;  %v4074_v63 = vsel %vm2633_vm6, %v4073_v17, %v4069_v60  ;;  %v412_v0 = vld [vmem:[%s9469_s0 + $0xc68] sm:$0xff]  ;;  %v4093_v17 = vrot.slane %v8147_v53, %v6313_v29 }
 0x2f8   :  { %v1457_v3 = vpop.xlane.xlu1 %1456  ;;  %v1454_v55 = vpop.xlane.xlu0 %1453  ;;  %v4138_v62 = vsel %vm2612_vm3, %v4137_v16, %v4133_v20  ;;  %v4079_v24 = vsel %vm2640_vm7, %v4078_v54, %v4074_v63  ;;  %v4098_v53 = vrot.slane %v8145_v41, %v6301_v23  ;;  %v453_v41 = vld [vmem:[%s9469_s0 + $0xdb0] sm:$0xff] }
 0x2f9   :  { %v4142_v43 = vrot.slane %v1454_v55, %v6252_v48  ;;  %v4147_v37 = vrot.slane %v1457_v3, %v6238_v40  ;;  %v4084_v39 = vsel %vm9474_vm8, %v4083_v47, %v4079_v24  ;;  %v413_v47 = vld [vmem:[%s9469_s0 + $0xc70] sm:$0xff]  ;;  %v1842_v24 = vsel %vm527_vm0, %v453_v41, 0.0 }
 0x2fb   :  { %v4143_v9 = vsel %vm2619_vm4, %v4142_v43, %v4138_v62  ;;  %1717 = vadd.xlane.f32.xlu1 %v1716_v27  ;;  %1837 = vadd.xlane.f32.xlu0 %v1836_v28  ;;  %v1719_v27 = vsel %vm527_vm0, %v412_v0, 0.0  ;;  %v1839_v28 = vsel %vm527_vm0, %v452_v18, 0.0 }
 0x2fc   :  { %v1463_v1 = vpop.xlane.xlu1 %1462  ;;  %v1460_v26 = vpop.xlane.xlu0 %1459  ;;  %v4148_v20 = vsel %vm9476_vm5, %v4147_v37, %v4143_v9  ;;  %v4089_v9 = vsel %vm2654_vm9, %v4088_v25, %v4084_v39  ;;  %v1722_v25 = vsel %vm527_vm0, %v413_v47, 0.0 }
 0x2fd   :  { %v4152_v51 = vrot.slane %v1460_v26, %v6263_v57  ;;  %v4157_v16 = vrot.slane %v1463_v1, %v6260_v56  ;;  %v1791_v1 = vsel %vm527_vm0, %v436_v10, 0.0  ;;  %v1770_v26 = vsel %vm527_vm0, %v429_v2, 0.0 }
 0x2ff   :  { %v4153_v33 = vsel %vm2633_vm6, %v4152_v51, %v4148_v20  ;;  %1789 = vadd.xlane.f32.xlu1 %v1788_v44  ;;  %1768 = vadd.xlane.f32.xlu0 %v1767_v15  ;;  %v4094_v44 = vsel %vm9475_vm10, %v4093_v17, %v4089_v9  ;;  %v4103_v15 = vrot.slane %v8159_v52, %v6321_v42 }
 0x300   :  { %v1469_v3 = vpop.xlane.xlu1 %1468  ;;  %v1466_v55 = vpop.xlane.xlu0 %1465  ;;  %v4158_v37 = vsel %vm2640_vm7, %v4157_v16, %v4153_v33  ;;  %v4108_v52 = vrot.slane %v8157_v4, %v6327_v46  ;;  %v4099_v16 = vsel %vm2668_vm11, %v4098_v53, %v4094_v44  ;;  %v430_v4 = vld [vmem:[%s9469_s0 + $0xcf8] sm:$0xff] }
 0x301   :  { %v4162_v43 = vrot.slane %v1466_v55, %v6293_v13  ;;  %v4167_v19 = vrot.slane %v1469_v3, %v6281_v7  ;;  %v4113_v55 = vrot.slane %v8171_v58, %v6341_v59  ;;  %v4118_v58 = vrot.slane %v8169_v38, %v6346_v61  ;;  %v454_v38 = vld [vmem:[%s9469_s0 + $0xdb8] sm:$0xff] }
 0x302   :  { %v1845_v41 = vsel %vm527_vm0, %v454_v38, 0.0 }
 0x303   :  { %v4163_v62 = vsel %vm9474_vm8, %v4162_v43, %v4158_v37  ;;  %1720 = vadd.xlane.f32.xlu1 %v1719_v27  ;;  %1840 = vadd.xlane.f32.xlu0 %v1839_v28  ;;  %vm9483_vm8 = vcmask 851712   ;;  %v437_v28 = vld [vmem:[%s9469_s0 + $0xd30] sm:$0xff] }
 0x304   :  { %v1475_v54 = vpop.xlane.xlu1 %1474  ;;  %v1472_v60 = vpop.xlane.xlu0 %1471  ;;  %v4168_v0 = vsel %vm2654_vm9, %v4167_v19, %v4163_v62  ;;  %v4104_v3 = vsel %vm9483_vm8, %v4103_v15, %v4099_v16  ;;  %v1794_v37 = vsel %vm527_vm0, %v437_v28, 0.0  ;;  %v1773_v62 = vsel %vm527_vm0, %v430_v4, 0.0  ;;  %v455_v16 = vld [vmem:[%s9469_s0 + $0xdc0] sm:$0xff]  ;;  %v456_v4 = vld [vmem:[%s9469_s0 + $0xdc8] sm:$0xff] }
 0x305   :  { %v4172_v63 = vrot.slane %v1472_v60, %v6313_v29  ;;  %v4177_v51 = vrot.slane %v1475_v54, %v6301_v23  ;;  %v4109_v10 = vsel %vm2682_vm13, %v4108_v52, %v4104_v3  ;;  %v414_v60 = vld [vmem:[%s9469_s0 + $0xc78] sm:$0xff] }
 0x306   :  { %v4114_v53 = vsel %vm2689_vm14, %v4113_v55, %v4109_v10  ;;  %v1725_v47 = vsel %vm527_vm0, %v414_v60, 0.0  ;;  %v1851_v10 = vsel %vm527_vm0, %v456_v4, 0.0 }
 0x307   :  { %v4173_v18 = vsel %vm9475_vm10, %v4172_v63, %v4168_v0  ;;  %1792 = vadd.xlane.f32.xlu1 %v1791_v1  ;;  %1771 = vadd.xlane.f32.xlu0 %v1770_v26  ;;  %vm9484_vm10 = vmmov %vm9483_vm8  ;;  %vm9485_vm8 = vcmask 589312  }
 0x308   :  { %v1481_v20 = vpop.xlane.xlu1 %1480  ;;  %v1478_v33 = vpop.xlane.xlu0 %1477  ;;  %v4178_v17 = vsel %vm2668_vm11, %v4177_v51, %v4173_v18  ;;  %v4119_v51 = vsel %vm2696_vm15, %v4118_v58, %v4114_v53  ;;  %v479_v53 = vld [vmem:[%s9469_s0 + $0xe80] sm:$0xff] }
 0x309   :  { %v4182_v27 = vrot.slane %v1478_v33, %v6321_v42  ;;  %v4187_v39 = vrot.slane %v1481_v20, %v6327_v46  ;;  %v438_v20 = vld [vmem:[%s9469_s0 + $0xd38] sm:$0xff] }
 0x30a   :  { %v1797_v55 = vsel %vm527_vm0, %v438_v20, 0.0 }
 0x30b   :  { %v4183_v43 = vsel %vm9484_vm10, %v4182_v27, %v4178_v17  ;;  %1723 = vadd.xlane.f32.xlu1 %v1722_v25  ;;  %1843 = vadd.xlane.f32.xlu0 %v1842_v24  ;;  %v5150_v25 = vsel %vm5147_vm12, %v4119_v51, %v6564_v50  ;;  %vm9486_vm10 = vcmask 720512  }
 0x30c   :  { %v1487_v2 = vpop.xlane.xlu1 %1486  ;;  %v1484_v19 = vpop.xlane.xlu0 %1483  ;;  %v4188_v1 = vsel %vm2682_vm13, %v4187_v39, %v4183_v43  ;;  %v439_v39 = vld [vmem:[%s9469_s0 + $0xd40] sm:$0xff] }
 0x30d   :  { %v4197_v9 = vrot.slane %v1487_v2, %v6346_v61  ;;  %v4192_v54 = vrot.slane %v1484_v19, %v6341_v59  ;;  %v1800_v2 = vsel %vm527_vm0, %v439_v39, 0.0 }
 0x30f   :  { %1795 = vadd.xlane.f32.xlu1 %v1794_v37  ;;  %1774 = vadd.xlane.f32.xlu0 %v1773_v62  ;;  %v4193_v26 = vsel %vm2689_vm14, %v4192_v54, %v4188_v1  ;;  %v480_v62 = vld [vmem:[%s9469_s0 + $0xe88] sm:$0xff] }
 0x310   :  { %v1493_v44 = vpop.xlane.xlu1 %1492  ;;  %v1490_v15 = vpop.xlane.xlu0 %1489  ;;  %v4198_v63 = vsel %vm2696_vm15, %v4197_v9, %v4193_v26  ;;  %v1923_v1 = vsel %vm527_vm0, %v480_v62, 0.0  ;;  %v1920_v26 = vsel %vm527_vm0, %v479_v53, 0.0 }
 0x311   :  { %v4206_v0 = vrot.slane %v1493_v44, %v6226_v32  ;;  %v4202_v18 = vrot.slane %v1490_v15, %v6220_v30  ;;  %v5151_v52 = vsel %vm5147_vm12, %v4198_v63, %v6661_v36  ;;  %v1848_v36 = vsel %vm527_vm0, %v455_v16, 0.0  ;;  %v457_v63 = vld [vmem:[%s9469_s0 + $0xdd0] sm:$0xff] }
 0x312   :  { %5402 = vmatprep.mubr.f32.mxu1 %v5151_v52  ;;  %v1854_v20 = vsel %vm527_vm0, %v457_v63, 0.0 }
 0x313   :  { %v4207_v33 = vsel %vm2598_vm1, %v4206_v0, %v4202_v18  ;;  %1726 = vadd.xlane.f32.xlu1 %v1725_v47  ;;  %1846 = vadd.xlane.f32.xlu0 %v1845_v41  ;;  %v440_v47 = vld [vmem:[%s9469_s0 + $0xd48] sm:$0xff]  ;;  %v8375_v41 = vld [vmem:[%s9470_s1 + $0x10] sm:$0xff] }
 0x314   :  { %5403 = vmatmul.mubr.f32.vlgmr.msra.gmra.mrb[0].mxu1 %v5150_v25  ;;  %v1499_v24 = vpop.xlane.xlu1 %1498  ;;  %v1496_v3 = vpop.xlane.xlu0 %1495  ;;  %v5225_v51 = vrot.slane %v8375_v41, %v7616_v45 }
 0x315   :  { %v4216_v27 = vrot.slane %v1499_v24, %v6223_v31  ;;  %v4211_v28 = vrot.slane %v1496_v3, %v6233_v35 }
 0x316   :  { %v5233_v25 = vcombine.high %v5225_v51, %v5225_v51 }
 0x317   :  { %v4212_v50 = vsel %vm2605_vm2, %v4211_v28, %v4207_v33  ;;  %1849 = vadd.xlane.f32.xlu1 %v1848_v36  ;;  %1798 = vadd.xlane.f32.xlu0 %v1797_v55  ;;  %v1803_v33 = vsel %vm527_vm0, %v440_v47, 0.0  ;;  %v464_v36 = vld [vmem:[%s9469_s0 + $0xe08] sm:$0xff]  ;;  %v463_v55 = vld [vmem:[%s9469_s0 + $0xe00] sm:$0xff] }
 0x318   :  { %v1505_v17 = vpop.xlane.xlu1 %1504  ;;  %v4217_v43 = vsel %vm2612_vm3, %v4216_v27, %v4212_v50  ;;  %v1502_v58 = vpop.xlane.xlu0 %1501  ;;  %5548 = vmatprep.subr.mxu0 %v5233_v25  ;;  %v1875_v50 = vsel %vm527_vm0, %v464_v36, 0.0 }
 0x319   :  { %v4226_v19 = vrot.slane %v1505_v17, %v6238_v40  ;;  %v4221_v37 = vrot.slane %v1502_v58, %v6252_v48  ;;  %v1872_v17 = vsel %vm527_vm0, %v463_v55, 0.0  ;;  %5549 = vmatpush1.xpose.msra.mxu0 %v5225_v51 }
 0x31b   :  { %v4222_v9 = vsel %vm2619_vm4, %v4221_v37, %v4217_v43  ;;  %1852 = vadd.xlane.f32.xlu1 %v1851_v10  ;;  %1801 = vadd.xlane.f32.xlu0 %v1800_v2  ;;  %v441_v10 = vld [vmem:[%s9469_s0 + $0xd50] sm:$0xff] }
 0x31c   :  { %v1511_v54 = vpop.xlane.xlu1 %1510  ;;  %v4227_v60 = vsel %vm9476_vm5, %v4226_v19, %v4222_v9  ;;  %v1508_v38 = vpop.xlane.xlu0 %1507  ;;  %v481_v2 = vld [vmem:[%s9469_s0 + $0xe90] sm:$0xff]  ;;  %v1806_v9 = vsel %vm527_vm0, %v441_v10, 0.0 }
 0x31d   :  { %v4236_v44 = vrot.slane %v1511_v54, %v6260_v56  ;;  %v4231_v15 = vrot.slane %v1508_v38, %v6263_v57  ;;  %v1926_v54 = vsel %vm527_vm0, %v481_v2, 0.0 }
 0x31f   :  { %v4232_v0 = vsel %vm2633_vm6, %v4231_v15, %v4227_v60  ;;  %1924 = vadd.xlane.f32.xlu1 %v1923_v1  ;;  %1921 = vadd.xlane.f32.xlu0 %v1920_v26  ;;  %v465_v1 = vld [vmem:[%s9469_s0 + $0xe10] sm:$0xff]  ;;  %v458_v26 = vld [vmem:[%s9469_s0 + $0xdd8] sm:$0xff] }
 0x320   :  { %v1517_v18 = vpop.xlane.xlu1 %1516  ;;  %v4237_v52 = vsel %vm2640_vm7, %v4236_v44, %v4232_v0  ;;  %v1514_v16 = vpop.xlane.xlu0 %1513  ;;  %v1878_v51 = vsel %vm527_vm0, %v465_v1, 0.0  ;;  %v1857_v0 = vsel %vm527_vm0, %v458_v26, 0.0 }
 0x321   :  { %v4246_v24 = vrot.slane %v1517_v18, %v6281_v7  ;;  %v4241_v3 = vrot.slane %v1514_v16, %v6293_v13  ;;  %v442_v16 = vld [vmem:[%s9469_s0 + $0xd58] sm:$0xff] }
 0x323   :  { %v4242_v27 = vsel %vm9485_vm8, %v4241_v3, %v4237_v52  ;;  %1855 = vadd.xlane.f32.xlu1 %v1854_v20  ;;  %1804 = vadd.xlane.f32.xlu0 %v1803_v33  ;;  %vm9487_vm8 = vcmask 851712   ;;  %v482_v20 = vld [vmem:[%s9469_s0 + $0xe98] sm:$0xff]  ;;  %v1809_v3 = vsel %vm527_vm0, %v442_v16, 0.0 }
 0x324   :  { %v1523_v28 = vpop.xlane.xlu1 %1522  ;;  %v4247_v4 = vsel %vm2654_vm9, %v4246_v24, %v4242_v27  ;;  %v1520_v39 = vpop.xlane.xlu0 %1519  ;;  %v1929_v36 = vsel %vm527_vm0, %v482_v20, 0.0 }
 0x325   :  { %v4256_v43 = vrot.slane %v1523_v28, %v6301_v23  ;;  %v4251_v58 = vrot.slane %v1520_v39, %v6313_v29  ;;  %v459_v39 = vld [vmem:[%s9469_s0 + $0xde0] sm:$0xff] }
 0x326   :  { %v1860_v2 = vsel %vm527_vm0, %v459_v39, 0.0 }
 0x327   :  { %v4252_v19 = vsel %vm9486_vm10, %v4251_v58, %v4247_v4  ;;  %1876 = vadd.xlane.f32.xlu1 %v1875_v50  ;;  %1873 = vadd.xlane.f32.xlu0 %v1872_v17  ;;  %v466_v4 = vld [vmem:[%s9469_s0 + $0xe18] sm:$0xff]  ;;  %vm9488_vm10 = vcmask 589312  }
 0x328   :  { %v1529_v37 = vpop.xlane.xlu1 %1528  ;;  %v4257_v62 = vsel %vm2668_vm11, %v4256_v43, %v4252_v19  ;;  %v1526_v53 = vpop.xlane.xlu0 %1525  ;;  %v1881_v10 = vsel %vm527_vm0, %v466_v4, 0.0 }
 0x329   :  { %v4266_v60 = vrot.slane %v1529_v37, %v6327_v46  ;;  %v4261_v38 = vrot.slane %v1526_v53, %v6321_v42 }
 0x32b   :  { %v4262_v44 = vsel %vm9487_vm8, %v4261_v38, %v4257_v62  ;;  %1807 = vadd.xlane.f32.xlu1 %v1806_v9  ;;  %1927 = vadd.xlane.f32.xlu0 %v1926_v54  ;;  %v443_v62 = vld [vmem:[%s9469_s0 + $0xd60] sm:$0xff]  ;;  %vm9489_vm8 = vcmask 720512  }
 0x32c   :  { %v1535_v15 = vpop.xlane.xlu1 %1534  ;;  %v4267_v63 = vsel %vm2682_vm13, %v4266_v60, %v4262_v44  ;;  %v1532_v47 = vpop.xlane.xlu0 %1531  ;;  %v1812_v38 = vsel %vm527_vm0, %v443_v62, 0.0 }
 0x32d   :  { %v4276_v18 = vrot.slane %v1535_v15, %v6346_v61  ;;  %v4271_v52 = vrot.slane %v1532_v47, %v6341_v59  ;;  %v467_v15 = vld [vmem:[%s9469_s0 + $0xe20] sm:$0xff] }
 0x32f   :  { %v4272_v33 = vsel %vm2689_vm14, %v4271_v52, %v4267_v63  ;;  %1879 = vadd.xlane.f32.xlu1 %v1878_v51  ;;  %1858 = vadd.xlane.f32.xlu0 %v1857_v0  ;;  %v460_v63 = vld [vmem:[%s9469_s0 + $0xde8] sm:$0xff]  ;;  %v1884_v52 = vsel %vm527_vm0, %v467_v15, 0.0 }
 0x330   :  { %v1541_v25 = vpop.xlane.xlu1 %1540  ;;  %v1538_v24 = vpop.xlane.xlu0 %1537  ;;  %v4277_v55 = vsel %vm2696_vm15, %v4276_v18, %v4272_v33  ;;  %v1863_v16 = vsel %vm527_vm0, %v460_v63, 0.0 }
 0x331   :  { %v4285_v27 = vrot.slane %v1541_v25, %v6226_v32  ;;  %v4281_v28 = vrot.slane %v1538_v24, %v6220_v30  ;;  %v8441_v50 = vsel %vm5147_vm12, %v4277_v55, %v6758_v22  ;;  %v483_v22 = vld [vmem:[%s9469_s0 + $0xea0] sm:$0xff]  ;;  %v444_v25 = vld [vmem:[%s9469_s0 + $0xd68] sm:$0xff] }
 0x332   :  { %v1932_v1 = vsel %vm527_vm0, %v483_v22, 0.0  ;;  %v484_v24 = vld [vmem:[%s9469_s0 + $0xea8] sm:$0xff] }
 0x333   :  { %v4286_v17 = vsel %vm2598_vm1, %v4285_v27, %v4281_v28  ;;  %1810 = vadd.xlane.f32.xlu1 %v1809_v3  ;;  %1930 = vadd.xlane.f32.xlu0 %v1929_v36  ;;  %v1815_v28 = vsel %vm527_vm0, %v444_v25, 0.0  ;;  %v1935_v4 = vsel %vm527_vm0, %v484_v24, 0.0 }
 0x334   :  { %v1547_v43 = vpop.xlane.xlu1 %1546  ;;  %v1544_v58 = vpop.xlane.xlu0 %1543 }
 0x335   :  { %v4295_v19 = vrot.slane %v1547_v43, %v6223_v31  ;;  %v4290_v37 = vrot.slane %v1544_v58, %v6233_v35  ;;  %v468_v43 = vld [vmem:[%s9469_s0 + $0xe28] sm:$0xff]  ;;  %v461_v58 = vld [vmem:[%s9469_s0 + $0xdf0] sm:$0xff] }
 0x336   :  { %v1887_v62 = vsel %vm527_vm0, %v468_v43, 0.0  ;;  %v1866_v22 = vsel %vm527_vm0, %v461_v58, 0.0 }
 0x337   :  { %v4291_v53 = vsel %vm2605_vm2, %v4290_v37, %v4286_v17  ;;  %1882 = vadd.xlane.f32.xlu1 %v1881_v10  ;;  %1861 = vadd.xlane.f32.xlu0 %v1860_v2 }
 0x338   :  { %v1553_v9 = vpop.xlane.xlu1 %1552  ;;  %v4296_v54 = vsel %vm2612_vm3, %v4295_v19, %v4291_v53  ;;  %v1550_v60 = vpop.xlane.xlu0 %1549 }
 0x339   :  { %v4305_v26 = vrot.slane %v1553_v9, %v6238_v40  ;;  %v4300_v44 = vrot.slane %v1550_v60, %v6252_v48  ;;  %v383_v9 = vld [vmem:[%s9469_s0 + $0xb80] sm:$0xff] }
 0x33b   :  { %v4301_v47 = vsel %vm2619_vm4, %v4300_v44, %v4296_v54  ;;  %1813 = vadd.xlane.f32.xlu1 %v1812_v38  ;;  %1933 = vadd.xlane.f32.xlu0 %v1932_v1  ;;  %v485_v54 = vld [vmem:[%s9469_s0 + $0xeb0] sm:$0xff] }
 0x33c   :  { %v1559_v51 = vpop.xlane.xlu1 %1558  ;;  %v4306_v0 = vsel %vm9476_vm5, %v4305_v26, %v4301_v47  ;;  %v1556_v18 = vpop.xlane.xlu0 %1555  ;;  %v1632_v26 = vsel %vm527_vm0, %v383_v9, 0.0  ;;  %v1938_v44 = vsel %vm527_vm0, %v485_v54, 0.0  ;;  %v445_v47 = vld [vmem:[%s9469_s0 + $0xd70] sm:$0xff] }
 0x33d   :  { %v4315_v20 = vrot.slane %v1559_v51, %v6260_v56  ;;  %v4310_v33 = vrot.slane %v1556_v18, %v6263_v57  ;;  %v384_v51 = vld [vmem:[%s9469_s0 + $0xb88] sm:$0xff] }
 0x33f   :  { %v4311_v3 = vsel %vm2633_vm6, %v4310_v33, %v4306_v0  ;;  %1885 = vadd.xlane.f32.xlu1 %v1884_v52  ;;  %1864 = vadd.xlane.f32.xlu0 %v1863_v16  ;;  %v1818_v16 = vsel %vm527_vm0, %v445_v47, 0.0 }
 0x340   :  { %v1565_v36 = vpop.xlane.xlu1 %1564  ;;  %v4316_v55 = vsel %vm2640_vm7, %v4315_v20, %v4311_v3  ;;  %v1562_v27 = vpop.xlane.xlu0 %1561  ;;  %v1635_v20 = vsel %vm527_vm0, %v384_v51, 0.0  ;;  %v469_v3 = vld [vmem:[%s9469_s0 + $0xe30] sm:$0xff]  ;;  %v470_v51 = vld [vmem:[%s9469_s0 + $0xe38] sm:$0xff] }
 0x341   :  { %v4325_v39 = vrot.slane %v1565_v36, %v6281_v7  ;;  %v4320_v17 = vrot.slane %v1562_v27, %v6293_v13  ;;  %v462_v36 = vld [vmem:[%s9469_s0 + $0xdf8] sm:$0xff] }
 0x343   :  { %v4321_v10 = vsel %vm9488_vm10, %v4320_v17, %v4316_v55  ;;  %1816 = vadd.xlane.f32.xlu1 %v1815_v28  ;;  %1936 = vadd.xlane.f32.xlu0 %v1935_v4  ;;  %v1869_v17 = vsel %vm527_vm0, %v462_v36, 0.0 }
 0x344   :  { %v1730_v2 = vpop.xlane.xlu1 %1729  ;;  %v4326_v19 = vsel %vm2654_vm9, %v4325_v39, %v4321_v10  ;;  %v1568_v37 = vpop.xlane.xlu0 %1567  ;;  %v1890_v39 = vsel %vm527_vm0, %v469_v3, 0.0  ;;  %v367_v10 = vld [vmem:[%s9469_s0 + $0xb00] sm:$0xff] }
 0x345   :  { %v4330_v53 = vrot.slane %v1568_v37, %v6313_v29  ;;  %v4597_v15 = vrot.slane %v1730_v2, %v6220_v30  ;;  %v486_v2 = vld [vmem:[%s9469_s0 + $0xeb8] sm:$0xff] }
 0x346   :  { %v1941_v9 = vsel %vm527_vm0, %v486_v2, 0.0  ;;  %v5218_v2 = vcombine.high %v8375_v41, %v8375_v41 }
 0x347   :  { %v8502_v60 = vsel %vm9489_vm8, %v4330_v53, %v4326_v19  ;;  %1888 = vadd.xlane.f32.xlu1 %v1887_v62  ;;  %1867 = vadd.xlane.f32.xlu0 %v1866_v22  ;;  %v1584_v53 = vsel %vm527_vm0, %v367_v10, 0.0  ;;  %v471_v10 = vld [vmem:[%s9469_s0 + $0xe40] sm:$0xff] }
 0x348   :  { %v1682_v38 = vpop.xlane.xlu1 %1681  ;;  %v1733_v1 = vpop.xlane.xlu0 %1732  ;;  %v8619_v41 = vrot.slane %v5218_v2, %v7616_v45 }
 0x349   :  { %v4601_v63 = vrot.slane %v1733_v1, %v6226_v32  ;;  %v4518_v33 = vrot.slane %v1682_v38, %v6220_v30  ;;  %v385_v38 = vld [vmem:[%s9469_s0 + $0xb90] sm:$0xff]  ;;  %v368_v1 = vld [vmem:[%s9469_s0 + $0xb08] sm:$0xff] }
 0x34a   :  { %v1587_v47 = vsel %vm527_vm0, %v368_v1, 0.0 }
 0x34b   :  { %v4602_v0 = vsel %vm2598_vm1, %v4601_v63, %v4597_v15  ;;  %1633 = vadd.xlane.f32.xlu1 %v1632_v26  ;;  %1939 = vadd.xlane.f32.xlu0 %v1938_v44  ;;  %v1638_v63 = vsel %vm527_vm0, %v385_v38, 0.0  ;;  %v511_v38 = vld [vmem:[%s9469_s0 + $0xf80] sm:$0xff] }
 0x34c   :  { %v1736_v18 = vpop.xlane.xlu1 %1735  ;;  %v1685_v52 = vpop.xlane.xlu0 %1684 }
 0x34d   :  { %v4606_v25 = vrot.slane %v1736_v18, %v6233_v35  ;;  %v4522_v24 = vrot.slane %v1685_v52, %v6226_v32 }
 0x34f   :  { %v4607_v55 = vsel %vm2605_vm2, %v4606_v25, %v4602_v0  ;;  %v4523_v27 = vsel %vm2598_vm1, %v4522_v24, %v4518_v33  ;;  %1819 = vadd.xlane.f32.xlu1 %v1818_v16  ;;  %1636 = vadd.xlane.f32.xlu0 %v1635_v20  ;;  %v446_v0 = vld [vmem:[%s9469_s0 + $0xd78] sm:$0xff]  ;;  %v1893_v16 = vsel %vm527_vm0, %v470_v51, 0.0  ;;  %v487_v25 = vld [vmem:[%s9469_s0 + $0xec0] sm:$0xff]  ;;  %v2016_v51 = vsel %vm527_vm0, %v511_v38, 0.0 }
 0x350   :  { %v1739_v28 = vpop.xlane.xlu1 %1738  ;;  %v1688_v4 = vpop.xlane.xlu0 %1687  ;;  %v1821_v20 = vsel %vm527_vm0, %v446_v0, 0.0  ;;  %v362_v33 = vld [vmem:[%s9469_s0 + $0xad8] sm:$0xff]  ;;  %v5234_v0 = vcombine.high %v8619_v41, %v8619_v41 }
 0x351   :  { %v4611_v43 = vrot.slane %v1739_v28, %v6223_v31  ;;  %v4527_v58 = vrot.slane %v1688_v4, %v6233_v35  ;;  %v1569_v36 = vsel %vm527_vm0, %v362_v33, 0.0  ;;  %v369_v28 = vld [vmem:[%s9469_s0 + $0xb10] sm:$0xff]  ;;  %v370_v33 = vld [vmem:[%s9469_s0 + $0xb18] sm:$0xff] }
 0x352   :  { %5618 = vmatprep.subr.mxu0 %v5234_v0 }
 0x353   :  { %v8539_v19 = vsel %vm2612_vm3, %v4611_v43, %v4607_v55  ;;  %v4528_v37 = vsel %vm2605_vm2, %v4527_v58, %v4523_v27  ;;  %1891 = vadd.xlane.f32.xlu1 %v1890_v39  ;;  %1870 = vadd.xlane.f32.xlu0 %v1869_v17  ;;  %v1944_v55 = vsel %vm527_vm0, %v487_v25, 0.0  ;;  %v386_v27 = vld [vmem:[%s9469_s0 + $0xb98] sm:$0xff]  ;;  %v1590_v43 = vsel %vm527_vm0, %v369_v28, 0.0  ;;  %v488_v58 = vld [vmem:[%s9469_s0 + $0xec8] sm:$0xff]  ;;  %v363_v25 = vld [vmem:[%s9469_s0 + $0xae0] sm:$0xff] }
 0x354   :  { %v8542_v62 = vpop.xlane.xlu1 %1741  ;;  %v1691_v22 = vpop.xlane.xlu0 %1690  ;;  %v1641_v17 = vsel %vm527_vm0, %v386_v27, 0.0  ;;  %v1593_v28 = vsel %vm527_vm0, %v370_v33, 0.0 }
 0x355   :  { %v4532_v54 = vrot.slane %v1691_v22, %v6223_v31 }
 0x357   :  { %v8554_v26 = vsel %vm2612_vm3, %v4532_v54, %v4528_v37  ;;  %1585 = vadd.xlane.f32.xlu1 %v1584_v53  ;;  %1942 = vadd.xlane.f32.xlu0 %v1941_v9  ;;  %v1947_v53 = vsel %vm527_vm0, %v488_v58, 0.0  ;;  %v1896_v9 = vsel %vm527_vm0, %v471_v10, 0.0  ;;  %v512_v54 = vld [vmem:[%s9469_s0 + $0xf88] sm:$0xff]  ;;  %v387_v58 = vld [vmem:[%s9469_s0 + $0xba0] sm:$0xff] }
 0x358   :  { %v8556_v44 = vpop.xlane.xlu1 %1744  ;;  %v8558_v15 = vpop.xlane.xlu0 %1693 }
 0x35b   :  { %1639 = vadd.xlane.f32.xlu1 %v1638_v63  ;;  %1588 = vadd.xlane.f32.xlu0 %v1587_v47  ;;  %v2019_v47 = vsel %vm527_vm0, %v512_v54, 0.0 }
 0x35c   :  { %v8568_v18 = vpop.xlane.xlu1 %1747  ;;  %v8570_v52 = vpop.xlane.xlu0 %1696 }
 0x35f   :  { %1894 = vadd.xlane.f32.xlu1 %v1893_v16  ;;  %1822 = vadd.xlane.f32.xlu0 %v1821_v20 }
 0x360   :  { %v8580_v24 = vpop.xlane.xlu1 %1750  ;;  %v8582_v3 = vpop.xlane.xlu0 %1699 }
 0x363   :  { %1570 = vadd.xlane.f32.xlu1 %v1569_v36  ;;  %1945 = vadd.xlane.f32.xlu0 %v1944_v55 }
 0x364   :  { %v8592_v4 = vpop.xlane.xlu1 %1753  ;;  %v8594_v39 = vpop.xlane.xlu0 %1702 }
 0x367   :  { %1642 = vadd.xlane.f32.xlu1 %v1641_v17  ;;  %1591 = vadd.xlane.f32.xlu0 %v1590_v43  ;;  %v1572_v17 = vsel %vm527_vm0, %v363_v25, 0.0  ;;  %v472_v43 = vld [vmem:[%s9469_s0 + $0xe48] sm:$0xff]  ;;  %v513_v25 = vld [vmem:[%s9469_s0 + $0xf90] sm:$0xff] }
 0x368   :  { %v8606_v37 = vpop.xlane.xlu1 %1756  ;;  %v8608_v22 = vpop.xlane.xlu0 %1705 }
 0x36b   :  { %1948 = vadd.xlane.f32.xlu1 %v1947_v53  ;;  %1897 = vadd.xlane.f32.xlu0 %v1896_v9  ;;  %v1899_v53 = vsel %vm527_vm0, %v472_v43, 0.0  ;;  %v1644_v9 = vsel %vm527_vm0, %v387_v58, 0.0 }
 0x36c   :  { %v1829_v1 = vpop.xlane.xlu1 %1828  ;;  %v1826_v63 = vpop.xlane.xlu0 %1825 }
 0x36d   :  { %v4759_v16 = vrot.slane %v1829_v1, %v6226_v32  ;;  %v4755_v20 = vrot.slane %v1826_v63, %v6220_v30  ;;  %v495_v1 = vld [vmem:[%s9469_s0 + $0xf00] sm:$0xff]  ;;  %v489_v63 = vld [vmem:[%s9469_s0 + $0xed0] sm:$0xff] }
 0x36f   :  { %v4760_v36 = vsel %vm2598_vm1, %v4759_v16, %v4755_v20  ;;  %2020 = vadd.xlane.f32.xlu1 %v2019_v47  ;;  %2017 = vadd.xlane.f32.xlu0 %v2016_v51  ;;  %v1968_v16 = vsel %vm527_vm0, %v495_v1, 0.0  ;;  %v1950_v20 = vsel %vm527_vm0, %v489_v63, 0.0 }
 0x370   :  { %v8634_v55 = vpop.xlane.xlu1 %1759  ;;  %v8636_v27 = vpop.xlane.xlu0 %1708 }
 0x373   :  { %1594 = vadd.xlane.f32.xlu1 %v1593_v28  ;;  %1573 = vadd.xlane.f32.xlu0 %v1572_v17  ;;  %v496_v28 = vld [vmem:[%s9469_s0 + $0xf08] sm:$0xff] }
 0x374   :  { %v1781_v10 = vpop.xlane.xlu1 %1780  ;;  %v1778_v2 = vpop.xlane.xlu0 %1777 }
 0x375   :  { %v4680_v54 = vrot.slane %v1781_v10, %v6226_v32  ;;  %v4676_v38 = vrot.slane %v1778_v2, %v6220_v30  ;;  %v2022_v10 = vsel %vm527_vm0, %v513_v25, 0.0  ;;  %v1971_v2 = vsel %vm527_vm0, %v496_v28, 0.0 }
 0x377   :  { %v4681_v47 = vsel %vm2598_vm1, %v4680_v54, %v4676_v38  ;;  %1900 = vadd.xlane.f32.xlu1 %v1899_v53  ;;  %1645 = vadd.xlane.f32.xlu0 %v1644_v9  ;;  %v371_v9 = vld [vmem:[%s9469_s0 + $0xb20] sm:$0xff]  ;;  %v364_v54 = vld [vmem:[%s9469_s0 + $0xae8] sm:$0xff] }
 0x378   :  { %v8657_v51 = vpop.xlane.xlu1 %1711  ;;  %v1832_v0 = vpop.xlane.xlu0 %1831  ;;  %v1596_v63 = vsel %vm527_vm0, %v371_v9, 0.0  ;;  %v490_v9 = vld [vmem:[%s9469_s0 + $0xed8] sm:$0xff] }
 0x379   :  { %v4764_v33 = vrot.slane %v1832_v0, %v6233_v35  ;;  %v1575_v0 = vsel %vm527_vm0, %v364_v54, 0.0 }
 0x37b   :  { %v4765_v17 = vsel %vm2605_vm2, %v4764_v33, %v4760_v36  ;;  %1969 = vadd.xlane.f32.xlu1 %v1968_v16  ;;  %1951 = vadd.xlane.f32.xlu0 %v1950_v20  ;;  %v473_v20 = vld [vmem:[%s9469_s0 + $0xe50] sm:$0xff]  ;;  %v388_v33 = vld [vmem:[%s9469_s0 + $0xba8] sm:$0xff] }
 0x37c   :  { %v1784_v43 = vpop.xlane.xlu1 %1783  ;;  %v8669_v58 = vpop.xlane.xlu0 %1762 }
 0x37d   :  { %v4685_v53 = vrot.slane %v1784_v43, %v6233_v35  ;;  %v1902_v43 = vsel %vm527_vm0, %v473_v20, 0.0  ;;  %v365_v20 = vld [vmem:[%s9469_s0 + $0xaf0] sm:$0xff] }
 0x37f   :  { %v4686_v36 = vsel %vm2605_vm2, %v4685_v53, %v4681_v47  ;;  %2023 = vadd.xlane.f32.xlu1 %v2022_v10  ;;  %1972 = vadd.xlane.f32.xlu0 %v1971_v2  ;;  %v1647_v10 = vsel %vm527_vm0, %v388_v33, 0.0  ;;  %v497_v53 = vld [vmem:[%s9469_s0 + $0xf10] sm:$0xff]  ;;  %v514_v33 = vld [vmem:[%s9469_s0 + $0xf98] sm:$0xff] }
 0x380   :  { %v8681_v38 = vpop.xlane.xlu1 %1714  ;;  %v1835_v1 = vpop.xlane.xlu0 %1834 }
 0x381   :  { %v4769_v16 = vrot.slane %v1835_v1, %v6223_v31 }
 0x383   :  { %v4770_v47 = vsel %vm2612_vm3, %v4769_v16, %v4765_v17  ;;  %1597 = vadd.xlane.f32.xlu1 %v1596_v63  ;;  %1576 = vadd.xlane.f32.xlu0 %v1575_v0  ;;  %v1974_v63 = vsel %vm527_vm0, %v497_v53, 0.0  ;;  %v1953_v0 = vsel %vm527_vm0, %v490_v9, 0.0  ;;  %v389_v9 = vld [vmem:[%s9469_s0 + $0xbb0] sm:$0xff] }
 0x384   :  { %v1787_v25 = vpop.xlane.xlu1 %1786  ;;  %v8693_v28 = vpop.xlane.xlu0 %1765 }
 0x385   :  { %v4690_v2 = vrot.slane %v1787_v25, %v6223_v31 }
 0x387   :  { %v4691_v17 = vsel %vm2612_vm3, %v4690_v2, %v4686_v36  ;;  %1903 = vadd.xlane.f32.xlu1 %v1902_v43  ;;  %1648 = vadd.xlane.f32.xlu0 %v1647_v10  ;;  %v1578_v10 = vsel %vm527_vm0, %v365_v20, 0.0  ;;  %v2025_v2 = vsel %vm527_vm0, %v514_v33, 0.0  ;;  %v1650_v33 = vsel %vm527_vm0, %v389_v9, 0.0 }
 0x388   :  { %v8705_v54 = vpop.xlane.xlu1 %1717  ;;  %v1838_v1 = vpop.xlane.xlu0 %1837 }
 0x389   :  { %v4774_v16 = vrot.slane %v1838_v1, %v6252_v48  ;;  %v372_v1 = vld [vmem:[%s9469_s0 + $0xb28] sm:$0xff] }
 0x38b   :  { %v4775_v36 = vsel %vm2619_vm4, %v4774_v16, %v4770_v47  ;;  %1975 = vadd.xlane.f32.xlu1 %v1974_v63  ;;  %1954 = vadd.xlane.f32.xlu0 %v1953_v0  ;;  %v4616_v47 = vrot.slane %v8542_v62, %v6252_v48  ;;  %v4621_v0 = vrot.slane %v8556_v44, %v6238_v40  ;;  %v474_v62 = vld [vmem:[%s9469_s0 + $0xe58] sm:$0xff] }
 0x38c   :  { %v1790_v25 = vpop.xlane.xlu1 %1789  ;;  %v8717_v43 = vpop.xlane.xlu0 %1768 }
 0x38d   :  { %v4695_v53 = vrot.slane %v1790_v25, %v6252_v48  ;;  %v1599_v25 = vsel %vm527_vm0, %v372_v1, 0.0  ;;  %v4617_v9 = vsel %vm2619_vm4, %v4616_v47, %v8539_v19  ;;  %v4547_v47 = vrot.slane %v8582_v3, %v6263_v57 }
 0x38e   :  { %v4622_v5 = vsel %vm9476_vm5, %v4621_v0, %v4617_v9  ;;  %v4641_v0 = vrot.slane %v8606_v37, %v6281_v7  ;;  %v4651_v3 = vrot.slane %v8669_v58, %v6301_v23  ;;  %v373_v58 = vld [vmem:[%s9469_s0 + $0xb30] sm:$0xff]  ;;  %v4567_v9 = vrot.slane %v8657_v51, %v6313_v29 }
 0x38f   :  { %v4696_v63 = vsel %vm2619_vm4, %v4695_v53, %v4691_v17  ;;  %1579 = vadd.xlane.f32.xlu1 %v1578_v10  ;;  %2026 = vadd.xlane.f32.xlu0 %v2025_v2  ;;  %v4626_v17 = vrot.slane %v8568_v18, %v6263_v57  ;;  %v515_v10 = vld [vmem:[%s9469_s0 + $0xfa0] sm:$0xff]  ;;  %v4537_v2 = vrot.slane %v8558_v15, %v6252_v48  ;;  %v1956_v18 = vsel %vm527_vm0, %v491_v8, 0.0 }
 0x390   :  { %v8733_v16 = vpop.xlane.xlu1 %1720  ;;  %v1841_v20 = vpop.xlane.xlu0 %1840  ;;  %v4631_v53 = vrot.slane %v8580_v24, %v6260_v56  ;;  %v4542_v15 = vrot.slane %v8570_v52, %v6238_v40  ;;  %v4636_v24 = vrot.slane %v8592_v4, %v6293_v13  ;;  %v2028_v19 = vsel %vm527_vm0, %v515_v10, 0.0 }
 0x391   :  { %v4779_v44 = vrot.slane %v1841_v20, %v6238_v40  ;;  %v1905_v20 = vsel %vm527_vm0, %v474_v62, 0.0  ;;  %v4627_v8 = vsel %vm2633_vm6, %v4626_v17, %v4622_v5  ;;  %v4538_v4 = vsel %vm2619_vm4, %v4537_v2, %v8554_v26 }
 0x392   :  { %v4646_v62 = vrot.slane %v8634_v55, %v6313_v29  ;;  %v4557_v5 = vrot.slane %v8608_v22, %v6293_v13  ;;  %v4543_v26 = vsel %vm9476_vm5, %v4542_v15, %v4538_v4  ;;  %v4656_v55 = vrot.slane %v8693_v28, %v6321_v42 }
 0x393   :  { %v8756_v1 = vsel %vm9476_vm5, %v4779_v44, %v4775_v36  ;;  %1651 = vadd.xlane.f32.xlu1 %v1650_v33  ;;  %1600 = vadd.xlane.f32.xlu0 %v1599_v25  ;;  %v498_v36 = vld [vmem:[%s9469_s0 + $0xf18] sm:$0xff]  ;;  %v4632_v33 = vsel %vm2640_vm7, %v4631_v53, %v4627_v8  ;;  %v4552_v25 = vrot.slane %v8594_v39, %v6260_v56 }
 0x394   :  { %v1793_v49 = vpop.xlane.xlu1 %1792  ;;  %v1772_v14 = vpop.xlane.xlu0 %1771  ;;  %v4637_v17 = vsel %vm9488_vm10, %v4636_v24, %v4632_v33  ;;  %v4562_v39 = vrot.slane %v8636_v27, %v6281_v7  ;;  %v4661_v2 = vrot.slane %v8717_v43, %v6327_v46  ;;  %v366_v27 = vld [vmem:[%s9469_s0 + $0xaf8] sm:$0xff]  ;;  %v4572_v43 = vrot.slane %v8681_v38, %v6301_v23  ;;  %v475_v33 = vld [vmem:[%s9469_s0 + $0xe60] sm:$0xff] }
 0x395   :  { %v4700_v52 = vrot.slane %v1793_v49, %v6238_v40  ;;  %v1977_v49 = vsel %vm527_vm0, %v498_v36, 0.0  ;;  %v4642_v10 = vsel %vm2654_vm9, %v4641_v0, %v4637_v17  ;;  %v1602_v24 = vsel %vm527_vm0, %v373_v58, 0.0 }
 0x396   :  { %v4647_v53 = vsel %vm9489_vm8, %v4646_v62, %v4642_v10  ;;  %v4577_v51 = vrot.slane %v8705_v54, %v6321_v42  ;;  %v1581_v0 = vsel %vm527_vm0, %v366_v27, 0.0  ;;  %v4582_v38 = vrot.slane %v8733_v16, %v6327_v46  ;;  %v390_v54 = vld [vmem:[%s9469_s0 + $0xbb8] sm:$0xff]  ;;  %v499_v10 = vld [vmem:[%s9469_s0 + $0xf20] sm:$0xff] }
 0x397   :  { %v4701_v37 = vsel %vm9476_vm5, %v4700_v52, %v4696_v63  ;;  %1957 = vadd.xlane.f32.xlu1 %v1956_v18  ;;  %1906 = vadd.xlane.f32.xlu0 %v1905_v20  ;;  %v4548_v63 = vsel %vm2633_vm6, %v4547_v47, %v4543_v26  ;;  %v4666_v18 = vrot.slane %v1772_v14, %v6341_v59  ;;  %vm9490_vm5 = vcmask 851712  }
 0x398   :  { %v1724_v22 = vpop.xlane.xlu1 %1723  ;;  %v8794_v44 = vpop.xlane.xlu0 %1843  ;;  %v4553_v28 = vsel %vm2640_vm7, %v4552_v25, %v4548_v63  ;;  %v4652_v15 = vsel %vm2668_vm11, %v4651_v3, %v4647_v53  ;;  %v1653_v58 = vsel %vm527_vm0, %v390_v54, 0.0 }
 0x399   :  { %v4558_v20 = vsel %vm9488_vm10, %v4557_v5, %v4553_v28  ;;  %v4657_v8 = vsel %vm9490_vm5, %v4656_v55, %v4652_v15  ;;  %vm9491_vm5 = vmmov %vm9489_vm8  ;;  %v4587_v62 = vrot.slane %v1724_v22, %v6341_v59  ;;  %vm9492_vm8 = vcmask 851712  }
 0x39a   :  { %v4563_v36 = vsel %vm2654_vm9, %v4562_v39, %v4558_v20  ;;  %v4662_v52 = vsel %vm2682_vm13, %v4661_v2, %v4657_v8  ;;  %v1908_v22 = vsel %vm527_vm0, %v475_v33, 0.0  ;;  %v492_v2 = vld [vmem:[%s9469_s0 + $0xee8] sm:$0xff]  ;;  %vm9493_vm10 = vcmask 392512  }
 0x39b   :  { %2029 = vadd.xlane.f32.xlu1 %v2028_v19  ;;  %1978 = vadd.xlane.f32.xlu0 %v1977_v49  ;;  %v4568_v25 = vsel %vm9491_vm5, %v4567_v9, %v4563_v36  ;;  %v4667_v5 = vsel %vm2689_vm14, %v4666_v18, %v4662_v52  ;;  %v1980_v18 = vsel %vm527_vm0, %v499_v10, 0.0  ;;  %v1959_v20 = vsel %vm527_vm0, %v492_v2, 0.0  ;;  %vm9494_vm5 = vmmov %vm9493_vm10 }
 0x39c   :  { %v1796_v47 = vpop.xlane.xlu1 %1795  ;;  %v1775_v14 = vpop.xlane.xlu0 %1774  ;;  %v4573_v16 = vsel %vm2668_vm11, %v4572_v43, %v4568_v25  ;;  %v374_v43 = vld [vmem:[%s9469_s0 + $0xb38] sm:$0xff] }
 0x39d   :  { %v4705_v19 = vrot.slane %v1796_v47, %v6263_v57  ;;  %v4671_v4 = vrot.slane %v1775_v14, %v6346_v61  ;;  %v4578_v26 = vsel %vm9492_vm8, %v4577_v51, %v4573_v16  ;;  %v1605_v51 = vsel %vm527_vm0, %v374_v43, 0.0  ;;  %v476_v14 = vld [vmem:[%s9469_s0 + $0xe68] sm:$0xff] }
 0x39e   :  { %v4583_v63 = vsel %vm2682_vm13, %v4582_v38, %v4578_v26  ;;  %vm9495_vm8 = vcmask 589312  }
 0x39f   :  { %v4706_v3 = vsel %vm2633_vm6, %v4705_v19, %v4701_v37  ;;  %1603 = vadd.xlane.f32.xlu1 %v1602_v24  ;;  %1582 = vadd.xlane.f32.xlu0 %v1581_v0  ;;  %v4672_v49 = vsel %vm2696_vm15, %v4671_v4, %v4667_v5  ;;  %v4588_v27 = vsel %vm2689_vm14, %v4587_v62, %v4583_v63  ;;  %v516_v24 = vld [vmem:[%s9469_s0 + $0xfa8] sm:$0xff]  ;;  %v1911_v4 = vsel %vm527_vm0, %v476_v14, 0.0  ;;  %v493_v5 = vld [vmem:[%s9469_s0 + $0xef0] sm:$0xff]  ;;  %v494_v14 = vld [vmem:[%s9469_s0 + $0xef8] sm:$0xff] }
 0x3a0   :  { %v1727_v17 = vpop.xlane.xlu1 %1726  ;;  %v8839_v39 = vpop.xlane.xlu0 %1846  ;;  %v5157_v55 = vsel %vm5147_vm12, %v4672_v49, %v7243_v11  ;;  %v2031_v47 = vsel %vm527_vm0, %v516_v24, 0.0  ;;  %v8887_v0 = vld [vmem:[%s9470_s1 + $0x8] sm:$0xff] }
 0x3a1   :  { %v4592_v37 = vrot.slane %v1727_v17, %v6346_v61  ;;  %5612 = vmatprep.mubr.f32.mxu0 %v5157_v55  ;;  %v5208_v52 = vrot.slane %v8887_v0, %v7616_v45  ;;  %v500_v62 = vld [vmem:[%s9469_s0 + $0xf28] sm:$0xff]  ;;  %v1962_v55 = vsel %vm527_vm0, %v493_v5, 0.0 }
 0x3a2   :  { %v1983_v17 = vsel %vm527_vm0, %v500_v62, 0.0 }
 0x3a3   :  { %1909 = vadd.xlane.f32.xlu1 %v1908_v22  ;;  %1654 = vadd.xlane.f32.xlu0 %v1653_v58  ;;  %v4593_v11 = vsel %vm2696_vm15, %v4592_v37, %v4588_v27  ;;  %v5216_v16 = vcombine.high %v5208_v52, %v5208_v52  ;;  %v375_v22 = vld [vmem:[%s9469_s0 + $0xb40] sm:$0xff]  ;;  %v517_v58 = vld [vmem:[%s9469_s0 + $0xfb0] sm:$0xff] }
 0x3a4   :  { %v8855_v28 = vpop.xlane.xlu1 %1849  ;;  %v1799_v53 = vpop.xlane.xlu0 %1798  ;;  %v5156_v9 = vsel %vm5147_vm12, %v4593_v11, %v7146_v6  ;;  %v1608_v10 = vsel %vm527_vm0, %v375_v22, 0.0  ;;  %v2034_v2 = vsel %vm527_vm0, %v517_v58, 0.0  ;;  %v478_v22 = vld [vmem:[%s9469_s0 + $0xe78] sm:$0xff]  ;;  %v393_v58 = vld [vmem:[%s9469_s0 + $0xbd0] sm:$0xff] }
 0x3a5   :  { %v4710_v15 = vrot.slane %v1799_v53, %v6260_v56  ;;  %5613 = vmatmul.mubr.f32.vlgmr.msra.gmra.mrb[0].mxu0 %v5156_v9  ;;  %5408 = vmatprep.subr.mxu1 %v5216_v16  ;;  %v477_v53 = vld [vmem:[%s9469_s0 + $0xe70] sm:$0xff]  ;;  %v392_v9 = vld [vmem:[%s9469_s0 + $0xbc8] sm:$0xff] }
 0x3a6   :  { %5619 = vmatpush1.xpose.msra.mxu0 %v8619_v41  ;;  %v391_v41 = vld [vmem:[%s9469_s0 + $0xbc0] sm:$0xff]  ;;  %5409 = vmatpush1.xpose.msra.mxu1 %v5208_v52  ;;  %v1914_v43 = vsel %vm527_vm0, %v477_v53, 0.0  ;;  %v1659_v24 = vsel %vm527_vm0, %v392_v9, 0.0  ;;  %v502_v9 = vld [vmem:[%s9469_s0 + $0xf38] sm:$0xff] }
 0x3a7   :  { %v8870_v36 = vsel %vm2640_vm7, %v4710_v15, %v4706_v3  ;;  %1981 = vadd.xlane.f32.xlu1 %v1980_v18  ;;  %1960 = vadd.xlane.f32.xlu0 %v1959_v20  ;;  %v1656_v33 = vsel %vm527_vm0, %v391_v41, 0.0  ;;  %v519_v53 = vld [vmem:[%s9469_s0 + $0xfc0] sm:$0xff] }
 0x3a8   :  { %v8872_v6 = vpop.xlane.xlu1 %1852  ;;  %v8874_v8 = vpop.xlane.xlu0 %1801 }
 0x3ab   :  { %1606 = vadd.xlane.f32.xlu1 %v1605_v51  ;;  %2032 = vadd.xlane.f32.xlu0 %v2031_v47  ;;  %v501_v47 = vld [vmem:[%s9469_s0 + $0xf30] sm:$0xff] }
 0x3ac   :  { %v1925_v38 = vpop.xlane.xlu1 %1924  ;;  %v1922_v19 = vpop.xlane.xlu0 %1921 }
 0x3ad   :  { %v4917_v54 = vrot.slane %v1925_v38, %v6226_v32  ;;  %v4913_v25 = vrot.slane %v1922_v19, %v6220_v30  ;;  %v1986_v19 = vsel %vm527_vm0, %v501_v47, 0.0 }
 0x3af   :  { %v4918_v3 = vsel %vm2598_vm1, %v4917_v54, %v4913_v25  ;;  %1912 = vadd.xlane.f32.xlu1 %v1911_v4  ;;  %1657 = vadd.xlane.f32.xlu0 %v1656_v33  ;;  %v1965_v4 = vsel %vm527_vm0, %v494_v14, 0.0  ;;  %v376_v54 = vld [vmem:[%s9469_s0 + $0xb48] sm:$0xff]  ;;  %v518_v25 = vld [vmem:[%s9469_s0 + $0xfb8] sm:$0xff] }
 0x3b0   :  { %v8902_v49 = vpop.xlane.xlu1 %1855  ;;  %v8904_v26 = vpop.xlane.xlu0 %1804  ;;  %v394_v14 = vld [vmem:[%s9469_s0 + $0xbd8] sm:$0xff] }
 0x3b3   :  { %1984 = vadd.xlane.f32.xlu1 %v1983_v17  ;;  %1963 = vadd.xlane.f32.xlu0 %v1962_v55  ;;  %v2037_v17 = vsel %vm527_vm0, %v518_v25, 0.0 }
 0x3b4   :  { %v1877_v63 = vpop.xlane.xlu1 %1876  ;;  %v1874_v37 = vpop.xlane.xlu0 %1873 }
 0x3b5   :  { %v4838_v27 = vrot.slane %v1877_v63, %v6226_v32  ;;  %v4834_v11 = vrot.slane %v1874_v37, %v6220_v30 }
 0x3b7   :  { %v4839_v18 = vsel %vm2598_vm1, %v4838_v27, %v4834_v11  ;;  %1609 = vadd.xlane.f32.xlu1 %v1608_v10  ;;  %2035 = vadd.xlane.f32.xlu0 %v2034_v2  ;;  %v1917_v2 = vsel %vm527_vm0, %v478_v22, 0.0  ;;  %v1662_v27 = vsel %vm527_vm0, %v393_v58, 0.0 }
 0x3b8   :  { %v8925_v20 = vpop.xlane.xlu1 %1807  ;;  %v1928_v15 = vpop.xlane.xlu0 %1927 }
 0x3b9   :  { %v4922_v51 = vrot.slane %v1928_v15, %v6233_v35 }
 0x3bb   :  { %v4923_v41 = vsel %vm2605_vm2, %v4922_v51, %v4918_v3  ;;  %1915 = vadd.xlane.f32.xlu1 %v1914_v43  ;;  %1660 = vadd.xlane.f32.xlu0 %v1659_v24  ;;  %v1611_v3 = vsel %vm527_vm0, %v376_v54, 0.0  ;;  %v2040_v24 = vsel %vm527_vm0, %v519_v53, 0.0  ;;  %v1989_v51 = vsel %vm527_vm0, %v502_v9, 0.0 }
 0x3bc   :  { %v1880_v52 = vpop.xlane.xlu1 %1879  ;;  %v8937_v38 = vpop.xlane.xlu0 %1858 }
 0x3bd   :  { %v4843_v33 = vrot.slane %v1880_v52, %v6233_v35 }
 0x3bf   :  { %v4844_v62 = vsel %vm2605_vm2, %v4843_v33, %v4839_v18  ;;  %1987 = vadd.xlane.f32.xlu1 %v1986_v19  ;;  %1966 = vadd.xlane.f32.xlu0 %v1965_v4  ;;  %v1665_v33 = vsel %vm527_vm0, %v394_v14, 0.0  ;;  %v521_v14 = vld [vmem:[%s9469_s0 + $0xfd0] sm:$0xff] }
 0x3c0   :  { %v8949_v5 = vpop.xlane.xlu1 %1810  ;;  %v1931_v16 = vpop.xlane.xlu0 %1930 }
 0x3c1   :  { %v4927_v55 = vrot.slane %v1931_v16, %v6223_v31  ;;  %v503_v16 = vld [vmem:[%s9469_s0 + $0xf40] sm:$0xff] }
 0x3c2   :  { %v1992_v58 = vsel %vm527_vm0, %v503_v16, 0.0  ;;  %v2046_v16 = vsel %vm527_vm0, %v521_v14, 0.0  ;;  %v505_v14 = vld [vmem:[%s9469_s0 + $0xf50] sm:$0xff] }
 0x3c3   :  { %v4928_v63 = vsel %vm2612_vm3, %v4927_v55, %v4923_v41  ;;  %1612 = vadd.xlane.f32.xlu1 %v1611_v3  ;;  %2038 = vadd.xlane.f32.xlu0 %v2037_v17  ;;  %v377_v41 = vld [vmem:[%s9469_s0 + $0xb50] sm:$0xff] }
 0x3c4   :  { %v1883_v37 = vpop.xlane.xlu1 %1882  ;;  %v8961_v10 = vpop.xlane.xlu0 %1861  ;;  %v1614_v54 = vsel %vm527_vm0, %v377_v41, 0.0  ;;  %v504_v41 = vld [vmem:[%s9469_s0 + $0xf48] sm:$0xff] }
 0x3c5   :  { %v4848_v11 = vrot.slane %v1883_v37, %v6223_v31  ;;  %v395_v37 = vld [vmem:[%s9469_s0 + $0xbe0] sm:$0xff] }
 0x3c7   :  { %v4849_v18 = vsel %vm2612_vm3, %v4848_v11, %v4844_v62  ;;  %1918 = vadd.xlane.f32.xlu1 %v1917_v2  ;;  %1663 = vadd.xlane.f32.xlu0 %v1662_v27  ;;  %v520_v62 = vld [vmem:[%s9469_s0 + $0xfc8] sm:$0xff]  ;;  %v378_v2 = vld [vmem:[%s9469_s0 + $0xb58] sm:$0xff] }
 0x3c8   :  { %v8973_v15 = vpop.xlane.xlu1 %1813  ;;  %v1934_v43 = vpop.xlane.xlu0 %1933  ;;  %v2043_v22 = vsel %vm527_vm0, %v520_v62, 0.0  ;;  %v9011_v27 = vld [vmem:[%s9470_s1 + $0x18] sm:$0xff] }
 0x3c9   :  { %v4932_v47 = vrot.slane %v1934_v43, %v6252_v48  ;;  %v9015_v11 = vrot.slane %v9011_v27, %v7616_v45  ;;  %v1668_v43 = vsel %vm527_vm0, %v395_v37, 0.0 }
 0x3cb   :  { %v4933_v52 = vsel %vm2619_vm4, %v4932_v47, %v4928_v63  ;;  %2041 = vadd.xlane.f32.xlu1 %v2040_v24  ;;  %1990 = vadd.xlane.f32.xlu0 %v1989_v51  ;;  %v1617_v24 = vsel %vm527_vm0, %v378_v2, 0.0  ;;  %v5250_v51 = vcombine.high %v9015_v11, %v9015_v11 }
 0x3cc   :  { %v1886_v19 = vpop.xlane.xlu1 %1885  ;;  %v8985_v4 = vpop.xlane.xlu0 %1864 }
 0x3cd   :  { %v4853_v25 = vrot.slane %v1886_v19, %v6252_v48  ;;  %5688 = vmatprep.subr.mxu0 %v5250_v51  ;;  %v4789_v19 = vrot.slane %v8839_v39, %v6260_v56  ;;  %v396_v39 = vld [vmem:[%s9469_s0 + $0xbe8] sm:$0xff] }
 0x3cf   :  { %v4854_v3 = vsel %vm2619_vm4, %v4853_v25, %v4849_v18  ;;  %1666 = vadd.xlane.f32.xlu1 %v1665_v33  ;;  %1615 = vadd.xlane.f32.xlu0 %v1614_v54  ;;  %v4794_v54 = vrot.slane %v8855_v28, %v6293_v13 }
 0x3d0   :  { %v8997_v17 = vpop.xlane.xlu1 %1816  ;;  %v1937_v55 = vpop.xlane.xlu0 %1936 }
 0x3d1   :  { %v4937_v63 = vrot.slane %v1937_v55, %v6238_v40  ;;  %v1995_v55 = vsel %vm527_vm0, %v504_v41, 0.0 }
 0x3d3   :  { %v4938_v53 = vsel %vm9493_vm10, %v4937_v63, %v4933_v52  ;;  %2044 = vadd.xlane.f32.xlu1 %v2043_v22  ;;  %1993 = vadd.xlane.f32.xlu0 %v1992_v58  ;;  %v4784_v52 = vrot.slane %v8794_v44, %v6263_v57  ;;  %v4799_v44 = vrot.slane %v8872_v6, %v6281_v7  ;;  %vm9496_vm10 = vcmask 720512  }
 0x3d4   :  { %v1889_v9 = vpop.xlane.xlu1 %1888  ;;  %v1868_v18 = vpop.xlane.xlu0 %1867  ;;  %v4804_v58 = vrot.slane %v8902_v49, %v6313_v29  ;;  %v4809_v6 = vrot.slane %v8937_v38, %v6301_v23  ;;  %v4819_v38 = vrot.slane %v8985_v4, %v6327_v46 }
 0x3d5   :  { %v4858_v47 = vrot.slane %v1889_v9, %v6238_v40  ;;  %v4785_v28 = vsel %vm2633_vm6, %v4784_v52, %v8756_v1  ;;  %v4814_v9 = vrot.slane %v8961_v10, %v6321_v42  ;;  %v522_v10 = vld [vmem:[%s9469_s0 + $0xfd8] sm:$0xff]  ;;  %v4824_v52 = vrot.slane %v1868_v18, %v6341_v59 }
 0x3d6   :  { %v4790_v63 = vsel %vm2640_vm7, %v4789_v19, %v4785_v28 }
 0x3d7   :  { %v4859_v33 = vsel %vm9494_vm5, %v4858_v47, %v4854_v3  ;;  %1669 = vadd.xlane.f32.xlu1 %v1668_v43  ;;  %1618 = vadd.xlane.f32.xlu0 %v1617_v24  ;;  %v379_v3 = vld [vmem:[%s9469_s0 + $0xb60] sm:$0xff]  ;;  %v4795_v2 = vsel %vm9495_vm8, %v4794_v54, %v4790_v63  ;;  %v1671_v24 = vsel %vm527_vm0, %v396_v39, 0.0  ;;  %vm9497_vm5 = vcmask 851712   ;;  %v397_v39 = vld [vmem:[%s9469_s0 + $0xbf0] sm:$0xff] }
 0x3d8   :  { %v1634_v25 = vpop.xlane.xlu1 %1633  ;;  %v1940_v62 = vpop.xlane.xlu0 %1939  ;;  %v1620_v49 = vsel %vm527_vm0, %v379_v3, 0.0  ;;  %v4800_v51 = vsel %vm2654_vm9, %v4799_v44, %v4795_v2  ;;  %v380_v3 = vld [vmem:[%s9469_s0 + $0xb68] sm:$0xff]  ;;  %v4720_v2 = vrot.slane %v8904_v26, %v6281_v7  ;;  %v506_v26 = vld [vmem:[%s9469_s0 + $0xf58] sm:$0xff] }
 0x3d9   :  { %v4942_v22 = vrot.slane %v1940_v62, %v6263_v57  ;;  %v4805_v41 = vsel %vm9496_vm10, %v4804_v58, %v4800_v51  ;;  %v4715_v58 = vrot.slane %v8874_v8, %v6293_v13  ;;  %v1623_v51 = vsel %vm527_vm0, %v380_v3, 0.0 }
 0x3da   :  { %v4810_v19 = vsel %vm2668_vm11, %v4809_v6, %v4805_v41 }
 0x3db   :  { %v4943_v37 = vsel %vm2633_vm6, %v4942_v22, %v4938_v53  ;;  %2047 = vadd.xlane.f32.xlu1 %v2046_v16  ;;  %1996 = vadd.xlane.f32.xlu0 %v1995_v55  ;;  %v4439_v53 = vrot.slane %v1634_v25, %v6220_v30  ;;  %v4815_v54 = vsel %vm9497_vm5, %v4814_v9, %v4810_v19  ;;  %v2049_v16 = vsel %vm527_vm0, %v522_v10, 0.0 }
 0x3dc   :  { %v9058_v43 = vpop.xlane.xlu1 %1819  ;;  %v1637_v1 = vpop.xlane.xlu0 %1636  ;;  %v1998_v55 = vsel %vm527_vm0, %v505_v14, 0.0  ;;  %v4820_v44 = vsel %vm2682_vm13, %v4819_v38, %v4815_v54  ;;  %v4725_v38 = vrot.slane %v8925_v20, %v6313_v29  ;;  %v4735_v14 = vrot.slane %v8973_v15, %v6321_v42  ;;  %v381_v15 = vld [vmem:[%s9469_s0 + $0xb70] sm:$0xff] }
 0x3dd   :  { %v4443_v47 = vrot.slane %v1637_v1, %v6226_v32  ;;  %v4825_v28 = vsel %vm2689_vm14, %v4824_v52, %v4820_v44  ;;  %v2001_v20 = vsel %vm527_vm0, %v506_v26, 0.0 }
 0x3df   :  { %v4444_v4 = vsel %vm2598_vm1, %v4443_v47, %v4439_v53  ;;  %1672 = vadd.xlane.f32.xlu1 %v1671_v24  ;;  %1621 = vadd.xlane.f32.xlu0 %v1620_v49  ;;  %v1674_v49 = vsel %vm527_vm0, %v397_v39, 0.0  ;;  %v4730_v53 = vrot.slane %v8949_v5, %v6301_v23 }
 0x3e0   :  { %v1892_v25 = vpop.xlane.xlu1 %1891  ;;  %v1871_v62 = vpop.xlane.xlu0 %1870 }
 0x3e1   :  { %v4863_v22 = vrot.slane %v1892_v25, %v6263_v57  ;;  %v4829_v18 = vrot.slane %v1871_v62, %v6346_v61  ;;  %v398_v25 = vld [vmem:[%s9469_s0 + $0xbf8] sm:$0xff] }
 0x3e2   :  { %v1677_v3 = vsel %vm527_vm0, %v398_v25, 0.0 }
 0x3e3   :  { %v4864_v63 = vsel %vm2633_vm6, %v4863_v22, %v4859_v33  ;;  %2050 = vadd.xlane.f32.xlu1 %v2049_v16  ;;  %1999 = vadd.xlane.f32.xlu0 %v1998_v55  ;;  %v4830_v6 = vsel %vm2696_vm15, %v4829_v18, %v4825_v28  ;;  %v523_v33 = vld [vmem:[%s9469_s0 + $0xfe0] sm:$0xff]  ;;  %v4745_v16 = vrot.slane %v9058_v43, %v6341_v59  ;;  %v1626_v28 = vsel %vm527_vm0, %v381_v15, 0.0 }
 0x3e4   :  { %v1586_v9 = vpop.xlane.xlu1 %1585  ;;  %v1943_v1 = vpop.xlane.xlu0 %1942  ;;  %v5159_v24 = vsel %vm5147_vm12, %v4830_v6, %v7437_v34  ;;  %v4716_v34 = vsel %vm9495_vm8, %v4715_v58, %v8870_v36  ;;  %v2052_v19 = vsel %vm527_vm0, %v523_v33, 0.0  ;;  %v4740_v36 = vrot.slane %v8997_v17, %v6327_v46 }
 0x3e5   :  { %v4947_v8 = vrot.slane %v1943_v1, %v6260_v56  ;;  %5682 = vmatprep.mubr.f32.mxu0 %v5159_v24  ;;  %v4721_v10 = vsel %vm2654_vm9, %v4720_v2, %v4716_v34  ;;  %v4360_v5 = vrot.slane %v1586_v9, %v6220_v30  ;;  %v507_v2 = vld [vmem:[%s9469_s0 + $0xf60] sm:$0xff]  ;;  %v382_v34 = vld [vmem:[%s9469_s0 + $0xb78] sm:$0xff] }
 0x3e6   :  { %v4726_v62 = vsel %vm9496_vm10, %v4725_v38, %v4721_v10  ;;  %v2004_v26 = vsel %vm527_vm0, %v507_v2, 0.0  ;;  %vm9498_vm10 = vmmov %vm9495_vm8  ;;  %v5201_v2 = vcombine.high %v8887_v0, %v8887_v0 }
 0x3e7   :  { %v4948_v47 = vsel %vm2640_vm7, %v4947_v8, %v4943_v37  ;;  %1675 = vadd.xlane.f32.xlu1 %v1674_v49  ;;  %1624 = vadd.xlane.f32.xlu0 %v1623_v51  ;;  %v4731_v17 = vsel %vm2668_vm11, %v4730_v53, %v4726_v62 }
 0x3e8   :  { %v1640_v41 = vpop.xlane.xlu1 %1639  ;;  %v1589_v52 = vpop.xlane.xlu0 %1588  ;;  %v4736_v22 = vsel %vm9497_vm5, %v4735_v14, %v4731_v17  ;;  %v526_v17 = vld [vmem:[%s9469_s0 + $0xff8] sm:$0xff] }
 0x3e9   :  { %v4448_v37 = vrot.slane %v1640_v41, %v6233_v35  ;;  %v4364_v54 = vrot.slane %v1589_v52, %v6226_v32  ;;  %v4741_v58 = vsel %vm2682_vm13, %v4740_v36, %v4736_v22  ;;  %v1629_v41 = vsel %vm527_vm0, %v382_v34, 0.0 }
 0x3ea   :  { %v4746_v9 = vsel %vm2689_vm14, %v4745_v16, %v4741_v58  ;;  %v510_v16 = vld [vmem:[%s9469_s0 + $0xf78] sm:$0xff] }
 0x3eb   :  { %v4449_v55 = vsel %vm2605_vm2, %v4448_v37, %v4444_v4  ;;  %v4365_v44 = vsel %vm2598_vm1, %v4364_v54, %v4360_v5  ;;  %2053 = vadd.xlane.f32.xlu1 %v2052_v19  ;;  %2002 = vadd.xlane.f32.xlu0 %v2001_v20  ;;  %v524_v4 = vld [vmem:[%s9469_s0 + $0xfe8] sm:$0xff]  ;;  %v509_v20 = vld [vmem:[%s9469_s0 + $0xf70] sm:$0xff] }
 0x3ec   :  { %v1895_v18 = vpop.xlane.xlu1 %1894  ;;  %v1823_v39 = vpop.xlane.xlu0 %1822  ;;  %v2055_v33 = vsel %vm527_vm0, %v524_v4, 0.0  ;;  %v2010_v54 = vsel %vm527_vm0, %v509_v20, 0.0 }
 0x3ed   :  { %v4868_v43 = vrot.slane %v1895_v18, %v6260_v56  ;;  %v4750_v6 = vrot.slane %v1823_v39, %v6346_v61  ;;  %v2013_v39 = vsel %vm527_vm0, %v510_v16, 0.0 }
 0x3ef   :  { %v4869_v1 = vsel %vm2640_vm7, %v4868_v43, %v4864_v63  ;;  %v4751_v24 = vsel %vm2696_vm15, %v4750_v6, %v4746_v9  ;;  %1678 = vadd.xlane.f32.xlu1 %v1677_v3  ;;  %1627 = vadd.xlane.f32.xlu0 %v1626_v28  ;;  %v508_v63 = vld [vmem:[%s9469_s0 + $0xf68] sm:$0xff]  ;;  %v2061_v3 = vsel %vm527_vm0, %v526_v17, 0.0 }
 0x3f0   :  { %v9151_v49 = vpop.xlane.xlu1 %1570  ;;  %v1946_v51 = vpop.xlane.xlu0 %1945  ;;  %v5158_v8 = vsel %vm5147_vm12, %v4751_v24, %v7340_v21  ;;  %v2007_v14 = vsel %vm527_vm0, %v508_v63, 0.0 }
 0x3f1   :  { %v4952_v38 = vrot.slane %v1946_v51, %v6293_v13  ;;  %5683 = vmatmul.mubr.f32.vlgmr.msra.gmra.mrb[0].mxu0 %v5158_v8 }
 0x3f2   :  { %5689 = vmatpush1.xpose.msra.mxu0 %v9015_v11  ;;  %v525_v11 = vld [vmem:[%s9469_s0 + $0xff0] sm:$0xff] }
 0x3f3   :  { %v4953_v53 = vsel %vm9495_vm8, %v4952_v38, %v4948_v47  ;;  %2056 = vadd.xlane.f32.xlu1 %v2055_v33  ;;  %2005 = vadd.xlane.f32.xlu0 %v2004_v26  ;;  %v2058_v25 = vsel %vm527_vm0, %v525_v11, 0.0  ;;  %vm9499_vm0 = vcmask 392512  }
 0x3f4   :  { %v1643_v21 = vpop.xlane.xlu1 %1642  ;;  %v1592_v10 = vpop.xlane.xlu0 %1591 }
 0x3f5   :  { %v4453_v52 = vrot.slane %v1643_v21, %v6223_v31  ;;  %v4369_v19 = vrot.slane %v1592_v10, %v6233_v35  ;;  %v5235_v21 = vcombine.high %v9011_v27, %v9011_v27 }
 0x3f7   :  { %v4454_v47 = vsel %vm2612_vm3, %v4453_v52, %v4449_v55  ;;  %v4370_v36 = vsel %vm2605_vm2, %v4369_v19, %v4365_v44  ;;  %2008 = vadd.xlane.f32.xlu1 %v2007_v14  ;;  %1630 = vadd.xlane.f32.xlu0 %v1629_v41  ;;  %v9219_v10 = vrot.slane %v5235_v21, %v7616_v45 }
 0x3f8   :  { %v1949_v5 = vpop.xlane.xlu1 %1948  ;;  %v1898_v37 = vpop.xlane.xlu0 %1897 }
 0x3f9   :  { %v4957_v15 = vrot.slane %v1949_v5, %v6281_v7  ;;  %v4873_v62 = vrot.slane %v1898_v37, %v6293_v13  ;;  %v5251_v11 = vcombine.high %v9219_v10, %v9219_v10 }
 0x3fb   :  { %v9189_v55 = vsel %vm2654_vm9, %v4957_v15, %v4953_v53  ;;  %v4874_v44 = vsel %vm9498_vm10, %v4873_v62, %v4869_v1  ;;  %2011 = vadd.xlane.f32.xlu1 %v2010_v54  ;;  %2059 = vadd.xlane.f32.xlu0 %v2058_v25  ;;  %v9203_v1 = vrot.slane %v5201_v2, %v7616_v45 }
 0x3fc   :  { %v2021_v22 = vpop.xlane.xlu1 %2020  ;;  %v2018_v18 = vpop.xlane.xlu0 %2017  ;;  %5758 = vmatprep.subr.mxu0 %v5251_v11 }
 0x3fd   :  { %v5075_v28 = vrot.slane %v2021_v22, %v6226_v32  ;;  %v5071_v58 = vrot.slane %v2018_v18, %v6220_v30  ;;  %v5217_v33 = vcombine.high %v9203_v1, %v9203_v1 }
 0x3ff   :  { %v5076_v43 = vsel %vm2598_vm1, %v5075_v28, %v5071_v58  ;;  %2014 = vadd.xlane.f32.xlu1 %v2013_v39  ;;  %2062 = vadd.xlane.f32.xlu0 %v2061_v3 }
 0x400   :  { %v1595_v6 = vpop.xlane.xlu1 %1594  ;;  %v9197_v4 = vpop.xlane.xlu0 %1573  ;;  %5478 = vmatprep.subr.mxu1 %v5217_v33 }
 0x401   :  { %v4374_v9 = vrot.slane %v1595_v6, %v6223_v31 }
 0x403   :  { %v4375_v24 = vsel %vm2612_vm3, %v4374_v9, %v4370_v36 }
 0x404   :  { %v1901_v51 = vpop.xlane.xlu1 %1900  ;;  %v1646_v8 = vpop.xlane.xlu0 %1645 }
 0x405   :  { %v4878_v26 = vrot.slane %v1901_v51, %v6281_v7  ;;  %v4458_v38 = vrot.slane %v1646_v8, %v6252_v48  ;;  %v4340_v51 = vrot.slane %v9197_v4, %v6321_v42 }
 0x407   :  { %v9211_v63 = vsel %vm2654_vm9, %v4878_v26, %v4874_v44  ;;  %v4459_v0 = vsel %vm2619_vm4, %v4458_v38, %v4454_v47 }
 0x408   :  { %v1970_v34 = vpop.xlane.xlu1 %1969  ;;  %v9214_v53 = vpop.xlane.xlu0 %1951 }
 0x409   :  { %v4992_v52 = vrot.slane %v1970_v34, %v6220_v30 }
 0x40c   :  { %v2024_v14 = vpop.xlane.xlu1 %2023  ;;  %v1973_v41 = vpop.xlane.xlu0 %1972 }
 0x40d   :  { %v5080_v19 = vrot.slane %v2024_v14, %v6233_v35  ;;  %v4996_v20 = vrot.slane %v1973_v41, %v6226_v32 }
 0x40f   :  { %v5081_v47 = vsel %vm2605_vm2, %v5080_v19, %v5076_v43  ;;  %v4997_v36 = vsel %vm2598_vm1, %v4996_v20, %v4992_v52  ;;  %vm9500_vm1 = vmmov %vm9499_vm0 }
 0x410   :  { %v1598_v27 = vpop.xlane.xlu1 %1597  ;;  %v1577_v5 = vpop.xlane.xlu0 %1576 }
 0x411   :  { %v4379_v45 = vrot.slane %v1598_v27, %v6252_v48  ;;  %v4345_v26 = vrot.slane %v1577_v5, %v6327_v46 }
 0x413   :  { %v4380_v37 = vsel %vm2619_vm4, %v4379_v45, %v4375_v24  ;;  %v4335_v24 = vrot.slane %v9151_v49, %v6301_v23 }
 0x414   :  { %v9230_v54 = vpop.xlane.xlu1 %1903  ;;  %v1649_v30 = vpop.xlane.xlu0 %1648 }
 0x415   :  { %v4463_v25 = vrot.slane %v1649_v30, %v6238_v40  ;;  %v4336_v21 = vsel %vm2668_vm11, %v4335_v24, %v8502_v60 }
 0x417   :  { %v4464_v32 = vsel %vm9499_vm0, %v4463_v25, %v4459_v0 }
 0x418   :  { %v1976_v15 = vpop.xlane.xlu1 %1975  ;;  %v9234_v62 = vpop.xlane.xlu0 %1954 }
 0x419   :  { %v5001_v16 = vrot.slane %v1976_v15, %v6233_v35 }
 0x41b   :  { %v5002_v17 = vsel %vm2605_vm2, %v5001_v16, %v4997_v36  ;;  %vm9501_vm2 = vmmov %vm9497_vm5  ;;  %vm9504_vm5 = vcmask 720512  }
 0x41c   :  { %v1580_v44 = vpop.xlane.xlu1 %1579  ;;  %v2027_v22 = vpop.xlane.xlu0 %2026  ;;  %v4341_v41 = vsel %vm9501_vm2, %v4340_v51, %v4336_v21  ;;  %vm9505_vm8 = vmmov %vm9501_vm2  ;;  %v4883_v21 = vrot.slane %v9230_v54, %v6313_v29 }
 0x41d   :  { %v5085_v18 = vrot.slane %v2027_v22, %v6223_v31  ;;  %v4350_v34 = vrot.slane %v1580_v44, %v6341_v59  ;;  %v4346_v19 = vsel %vm2682_vm13, %v4345_v26, %v4341_v41  ;;  %vm9507_vm10 = vmmov %vm9504_vm5 }
 0x41e   :  { %v4884_v54 = vsel %vm9507_vm10, %v4883_v21, %v9211_v63  ;;  %v9509_v63 = vld [vmem:[#allocation7_spill] sm:$0xff] }
 0x41f   :  { %v5086_v39 = vsel %vm2612_vm3, %v5085_v18, %v5081_v47 }
 0x420   :  { %v1652_v3 = vpop.xlane.xlu1 %1651  ;;  %v1601_v28 = vpop.xlane.xlu0 %1600 }
 0x421   :  { %v4468_v58 = vrot.slane %v1652_v3, %v6263_v57  ;;  %v4384_v43 = vrot.slane %v1601_v28, %v6238_v40 }
 0x423   :  { %v4469_v6 = vsel %vm2633_vm6, %v4468_v58, %v4464_v32  ;;  %v4385_v2 = vsel %vm9500_vm1, %v4384_v43, %v4380_v37  ;;  %vm9510_vm1 = vcmask 589312  }
 0x424   :  { %v1958_v9 = vpop.xlane.xlu1 %1957  ;;  %v9244_v35 = vpop.xlane.xlu0 %1906  ;;  %vm9518_vm10 = vmmov %vm9510_vm1 }
 0x425   :  { %v4972_v24 = vrot.slane %v1958_v9, %v6321_v42 }
 0x428   :  { %v2030_v8 = vpop.xlane.xlu1 %2029  ;;  %v1979_v33 = vpop.xlane.xlu0 %1978 }
 0x429   :  { %v5090_v38 = vrot.slane %v2030_v8, %v6252_v48  ;;  %v5006_v0 = vrot.slane %v1979_v33, %v6223_v31  ;;  %v4351_v31 = vsel %vm2689_vm14, %v4350_v34, %v4346_v19  ;;  %v9506_v19 = vld [vmem:[#allocation8_spill] sm:$0xff] }
 0x42b   :  { %v5091_v14 = vsel %vm2619_vm4, %v5090_v38, %v5086_v39  ;;  %v5007_v49 = vsel %vm2612_vm3, %v5006_v0, %v5002_v17  ;;  %vm9502_vm3 = vmmov %vm9499_vm0 }
 0x42c   :  { %v1604_v4 = vpop.xlane.xlu1 %1603  ;;  %v1583_v52 = vpop.xlane.xlu0 %1582 }
 0x42d   :  { %v4389_v20 = vrot.slane %v1604_v4, %v6263_v57  ;;  %v4355_v11 = vrot.slane %v1583_v52, %v6346_v61 }
 0x42f   :  { %v4390_v47 = vsel %vm2633_vm6, %v4389_v20, %v4385_v2  ;;  %v4356_v60 = vsel %vm2696_vm15, %v4355_v11, %v4351_v31  ;;  %v4967_v2 = vrot.slane %v9234_v62, %v6301_v23 }
 0x430   :  { %v1910_v36 = vpop.xlane.xlu1 %1909  ;;  %v1655_v27 = vpop.xlane.xlu0 %1654  ;;  %v5153_v5 = vsel %vm5147_vm12, %v4356_v60, %v6855_v12 }
 0x431   :  { %v4473_v45 = vrot.slane %v1655_v27, %v6260_v56  ;;  %5472 = vmatprep.mubr.f32.mxu1 %v5153_v5  ;;  %v4893_v41 = vrot.slane %v1910_v36, %v6321_v42 }
 0x432   :  { %5473 = vmatmul.mubr.f32.vlgmr.msra.gmra.mrb[0].mxu1 %v8441_v50 }
 0x433   :  { %v9270_v37 = vsel %vm2640_vm7, %v4473_v45, %v4469_v6  ;;  %5479 = vmatpush1.xpose.msra.mxu1 %v9203_v1  ;;  %v4962_v6 = vrot.slane %v9214_v53, %v6313_v29 }
 0x434   :  { %v1982_v30 = vpop.xlane.xlu1 %1981  ;;  %v1961_v25 = vpop.xlane.xlu0 %1960 }
 0x435   :  { %v5011_v32 = vrot.slane %v1982_v30, %v6252_v48  ;;  %v4977_v33 = vrot.slane %v1961_v25, %v6327_v46 }
 0x437   :  { %v5012_v15 = vsel %vm2619_vm4, %v5011_v32, %v5007_v49  ;;  %vm9503_vm4 = vmmov %vm9499_vm0 }
 0x438   :  { %v1607_v16 = vpop.xlane.xlu1 %1606  ;;  %v2033_v17 = vpop.xlane.xlu0 %2032  ;;  %vm9508_vm0 = vmmov %vm9501_vm2 }
 0x439   :  { %v4394_v12 = vrot.slane %v1607_v16, %v6260_v56  ;;  %v5095_v44 = vrot.slane %v2033_v17, %v6238_v40  ;;  %vm9511_vm2 = vmmov %vm9504_vm5 }
 0x43b   :  { %v9278_v22 = vsel %vm2640_vm7, %v4394_v12, %v4390_v47  ;;  %v9281_v50 = vsel %vm9502_vm3, %v5095_v44, %v5091_v14  ;;  %vm9512_vm3 = vmmov %vm9508_vm0 }
 0x43c   :  { %v1913_v18 = vpop.xlane.xlu1 %1912  ;;  %v9283_v1 = vpop.xlane.xlu0 %1657 }
 0x43d   :  { %v4898_v11 = vrot.slane %v1913_v18, %v6327_v46 }
 0x440   :  { %v1985_v39 = vpop.xlane.xlu1 %1984  ;;  %v1964_v3 = vpop.xlane.xlu0 %1963 }
 0x441   :  { %v5016_v48 = vrot.slane %v1985_v39, %v6238_v40  ;;  %v4963_v40 = vsel %vm9504_vm5, %v4962_v6, %v9189_v55  ;;  %v4982_v26 = vrot.slane %v1964_v3, %v6341_v59  ;;  %v4888_v55 = vrot.slane %v9244_v35, %v6301_v23  ;;  %vm9515_vm5 = vmmov %vm9511_vm2 }
 0x442   :  { %v4968_v38 = vsel %vm2668_vm11, %v4967_v2, %v4963_v40 }
 0x443   :  { %v9287_v28 = vsel %vm9503_vm4, %v5016_v48, %v5012_v15  ;;  %v4973_v0 = vsel %vm9505_vm8, %v4972_v24, %v4968_v38  ;;  %v4889_v35 = vsel %vm2668_vm11, %v4888_v55, %v4884_v54  ;;  %vm9513_vm4 = vmmov %vm9510_vm1 }
 0x444   :  { %v9289_v58 = vpop.xlane.xlu1 %1609  ;;  %v9291_v43 = vpop.xlane.xlu0 %2035  ;;  %v4978_v62 = vsel %vm2682_vm13, %v4977_v33, %v4973_v0  ;;  %v4894_v47 = vsel %vm9508_vm0, %v4893_v41, %v4889_v35  ;;  %vm9516_vm8 = vmmov %vm9508_vm0 }
 0x445   :  { %v4983_v14 = vsel %vm2689_vm14, %v4982_v26, %v4978_v62  ;;  %v4899_v27 = vsel %vm2682_vm13, %v4898_v11, %v4894_v47  ;;  %vm9521_vm0 = vmmov %vm9511_vm2 }
 0x448   :  { %v1916_v51 = vpop.xlane.xlu1 %1915  ;;  %v1661_v8 = vpop.xlane.xlu0 %1660 }
 0x449   :  { %v4903_v31 = vrot.slane %v1916_v51, %v6341_v59  ;;  %v4483_v26 = vrot.slane %v1661_v8, %v6281_v7 }
 0x44b   :  { %v4904_v45 = vsel %vm2689_vm14, %v4903_v31, %v4899_v27 }
 0x44c   :  { %v9304_v34 = vpop.xlane.xlu1 %1987  ;;  %v1967_v53 = vpop.xlane.xlu0 %1966 }
 0x44d   :  { %v4987_v9 = vrot.slane %v1967_v53, %v6346_v61 }
 0x44f   :  { %v4988_v49 = vsel %vm2696_vm15, %v4987_v9, %v4983_v14 }
 0x450   :  { %v9315_v4 = vpop.xlane.xlu1 %1612  ;;  %v9317_v52 = vpop.xlane.xlu0 %2038  ;;  %v5161_v20 = vsel %vm5147_vm12, %v4988_v49, %v9506_v19  ;;  %v4399_v49 = vrot.slane %v9289_v58, %v6293_v13 }
 0x451   :  { %5752 = vmatprep.mubr.f32.mxu0 %v5161_v20  ;;  %v4404_v11 = vrot.slane %v9315_v4, %v6281_v7  ;;  %v5021_v4 = vrot.slane %v9304_v34, %v6263_v57 }
 0x452   :  { %v4400_v58 = vsel %vm9513_vm4, %v4399_v49, %v9278_v22 }
 0x454   :  { %v1919_v60 = vpop.xlane.xlu1 %1918  ;;  %v1664_v36 = vpop.xlane.xlu0 %1663 }
 0x455   :  { %v4908_v5 = vrot.slane %v1919_v60, %v6346_v61  ;;  %v4488_v38 = vrot.slane %v1664_v36, %v6313_v29  ;;  %v5100_v60 = vrot.slane %v9291_v43, %v6263_v57 }
 0x457   :  { %v4909_v30 = vsel %vm2696_vm15, %v4908_v5, %v4904_v45  ;;  %v5105_v5 = vrot.slane %v9317_v52, %v6260_v56  ;;  %v5101_v52 = vsel %vm2633_vm6, %v5100_v60, %v9281_v50 }
 0x458   :  { %v9331_v25 = vpop.xlane.xlu1 %2041  ;;  %v9333_v32 = vpop.xlane.xlu0 %1990  ;;  %v5160_v15 = vsel %vm5147_vm12, %v4909_v30, %v9509_v63 }
 0x459   :  { %5753 = vmatmul.mubr.f32.vlgmr.msra.gmra.mrb[0].mxu0 %v5160_v15  ;;  %v9514_v15 = vld [vmem:[#allocation6_spill] sm:$0xff] }
 0x45a   :  { %5759 = vmatpush1.xpose.msra.mxu0 %v9219_v10  ;;  %v4478_v10 = vrot.slane %v9283_v1, %v6293_v13 }
 0x45c   :  { %v1667_v16 = vpop.xlane.xlu1 %1666  ;;  %v1616_v17 = vpop.xlane.xlu0 %1615  ;;  %v4479_v53 = vsel %vm9510_vm1, %v4478_v10, %v9270_v37 }
 0x45d   :  { %v4493_v0 = vrot.slane %v1667_v16, %v6301_v23  ;;  %v4484_v14 = vsel %vm2654_vm9, %v4483_v26, %v4479_v53  ;;  %v4409_v35 = vrot.slane %v1616_v17, %v6313_v29  ;;  %v4405_v16 = vsel %vm2654_vm9, %v4404_v11, %v4400_v58 }
 0x45e   :  { %v4489_v55 = vsel %vm9511_vm2, %v4488_v38, %v4484_v14  ;;  %v5110_v17 = vrot.slane %v9331_v25, %v6293_v13  ;;  %v9519_v14 = vld [vmem:[#allocation5_spill] sm:$0xff] }
 0x45f   :  { %v4494_v41 = vsel %vm2668_vm11, %v4493_v0, %v4489_v55  ;;  %v4410_v57 = vsel %vm9515_vm5, %v4409_v35, %v4405_v16 }
 0x460   :  { %v9338_v12 = vpop.xlane.xlu1 %2044  ;;  %v9340_v44 = vpop.xlane.xlu0 %1993 }
 0x461   :  { %v5031_v25 = vrot.slane %v9340_v44, %v6293_v13  ;;  %v5115_v50 = vrot.slane %v9338_v12, %v6281_v7 }
 0x464   :  { %v1670_v18 = vpop.xlane.xlu1 %1669  ;;  %v1619_v39 = vpop.xlane.xlu0 %1618 }
 0x465   :  { %v4498_v62 = vrot.slane %v1670_v18, %v6321_v42  ;;  %v4414_v36 = vrot.slane %v1619_v39, %v6301_v23  ;;  %v5026_v18 = vrot.slane %v9333_v32, %v6260_v56 }
 0x467   :  { %v4499_v37 = vsel %vm9512_vm3, %v4498_v62, %v4494_v41  ;;  %v4415_v39 = vsel %vm2668_vm11, %v4414_v36, %v4410_v57 }
 0x468   :  { %v9342_v3 = vpop.xlane.xlu1 %2047  ;;  %v9344_v48 = vpop.xlane.xlu0 %1996 }
 0x469   :  { %v5036_v56 = vrot.slane %v9344_v48, %v6281_v7  ;;  %v5120_v38 = vrot.slane %v9342_v3, %v6313_v29 }
 0x46c   :  { %v1673_v6 = vpop.xlane.xlu1 %1672  ;;  %v1622_v2 = vpop.xlane.xlu0 %1621 }
 0x46d   :  { %v4503_v1 = vrot.slane %v1673_v6, %v6327_v46  ;;  %v4419_v45 = vrot.slane %v1622_v2, %v6321_v42  ;;  %v5022_v6 = vsel %vm2633_vm6, %v5021_v4, %v9287_v28  ;;  %v5106_v2 = vsel %vm2640_vm7, %v5105_v5, %v5101_v52  ;;  %vm9517_vm6 = vmmov %vm9510_vm1  ;;  %v9525_v5 = vld [vmem:[#allocation9_spill] sm:$0xff] }
 0x46e   :  { %v5111_v28 = vsel %vm9517_vm6, %v5110_v17, %v5106_v2  ;;  %v5027_v0 = vsel %vm2640_vm7, %v5026_v18, %v5022_v6  ;;  %vm9520_vm7 = vmmov %vm9511_vm2 }
 0x46f   :  { %v4504_v54 = vsel %vm2682_vm13, %v4503_v1, %v4499_v37  ;;  %v4420_v10 = vsel %vm9516_vm8, %v4419_v45, %v4415_v39  ;;  %v5032_v53 = vsel %vm9518_vm10, %v5031_v25, %v5027_v0  ;;  %v5116_v55 = vsel %vm2654_vm9, %v5115_v50, %v5111_v28  ;;  %vm9522_vm1 = vmmov %vm9512_vm3 }
 0x470   :  { %v9346_v24 = vpop.xlane.xlu1 %2050  ;;  %v9348_v51 = vpop.xlane.xlu0 %1999 }
 0x471   :  { %v5041_v13 = vrot.slane %v9348_v51, %v6313_v29  ;;  %v5125_v12 = vrot.slane %v9346_v24, %v6301_v23  ;;  %v5037_v24 = vsel %vm2654_vm9, %v5036_v56, %v5032_v53  ;;  %vm9523_vm9 = vmmov %vm9522_vm1 }
 0x474   :  { %v1676_v33 = vpop.xlane.xlu1 %1675  ;;  %v1625_v40 = vpop.xlane.xlu0 %1624 }
 0x475   :  { %v4508_v8 = vrot.slane %v1676_v33, %v6341_v59  ;;  %v4424_v43 = vrot.slane %v1625_v40, %v6327_v46 }
 0x477   :  { %v4509_v47 = vsel %vm2689_vm14, %v4508_v8, %v4504_v54  ;;  %v4425_v32 = vsel %vm2682_vm13, %v4424_v43, %v4420_v10  ;;  %v5121_v8 = vsel %vm9520_vm7, %v5120_v38, %v5116_v55 }
 0x478   :  { %v9358_v9 = vpop.xlane.xlu1 %2053  ;;  %v9360_v21 = vpop.xlane.xlu0 %2002  ;;  %v5126_v41 = vsel %vm2668_vm11, %v5125_v12, %v5121_v8 }
 0x479   :  { %v5046_v7 = vrot.slane %v9360_v21, %v6301_v23  ;;  %v5130_v3 = vrot.slane %v9358_v9, %v6321_v42  ;;  %v5042_v9 = vsel %vm9521_vm0, %v5041_v13, %v5037_v24 }
 0x47b   :  { %v5047_v37 = vsel %vm2668_vm11, %v5046_v7, %v5042_v9  ;;  %vm5828_vm11 = vcmask 9216  }
 0x47c   :  { %v1679_v19 = vpop.xlane.xlu1 %1678  ;;  %v1628_v20 = vpop.xlane.xlu0 %1627 }
 0x47d   :  { %v4513_v31 = vrot.slane %v1679_v19, %v6346_v61  ;;  %v4429_v34 = vrot.slane %v1628_v20, %v6341_v59  ;;  %v5131_v19 = vsel %vm9522_vm1, %v5130_v3, %v5126_v41 }
 0x47f   :  { %v4514_v27 = vsel %vm2696_vm15, %v4513_v31, %v4509_v47  ;;  %v4430_v44 = vsel %vm2689_vm14, %v4429_v34, %v4425_v32 }
 0x480   :  { %v2057_v30 = vpop.xlane.xlu1 %2056  ;;  %v2006_v63 = vpop.xlane.xlu0 %2005  ;;  %v5155_v22 = vsel %vm5147_vm12, %v4514_v27, %v9514_v15  ;;  %v9524_v27 = vld [vmem:[#allocation10_spill] sm:$0xff] }
 0x481   :  { %5542 = vmatprep.mubr.f32.mxu1 %v5155_v22  ;;  %v5051_v62 = vrot.slane %v2006_v63, %v6321_v42  ;;  %v5135_v23 = vrot.slane %v2057_v30, %v6327_v46 }
 0x483   :  { %v5052_v20 = vsel %vm9523_vm9, %v5051_v62, %v5047_v37 }
 0x484   :  { %v2009_v33 = vpop.xlane.xlu1 %2008  ;;  %v1631_v40 = vpop.xlane.xlu0 %1630 }
 0x485   :  { %v4434_v26 = vrot.slane %v1631_v40, %v6346_v61  ;;  %v5056_v21 = vrot.slane %v2009_v33, %v6327_v46  ;;  %v5136_v46 = vsel %vm2682_vm13, %v5135_v23, %v5131_v19 }
 0x487   :  { %v4435_v48 = vsel %vm2696_vm15, %v4434_v26, %v4430_v44  ;;  %v5057_v31 = vsel %vm2682_vm13, %v5056_v21, %v5052_v20 }
 0x488   :  { %v2012_v29 = vpop.xlane.xlu1 %2011  ;;  %v2060_v51 = vpop.xlane.xlu0 %2059  ;;  %v5154_v1 = vsel %vm5147_vm12, %v4435_v48, %v9519_v14 }
 0x489   :  { %5543 = vmatmul.mubr.f32.vlgmr.msra.gmra.mrb[0].mxu1 %v5154_v1  ;;  %v5061_v42 = vrot.slane %v2012_v29, %v6341_v59  ;;  %v5140_v49 = vrot.slane %v2060_v51, %v6341_v59 }
 0x48b   :  { %v5062_v59 = vsel %vm2689_vm14, %v5061_v42, %v5057_v31  ;;  %v5141_v58 = vsel %vm2689_vm14, %v5140_v49, %v5136_v46 }
 0x48c   :  { %v2015_v11 = vpop.xlane.xlu1 %2014  ;;  %v2063_v54 = vpop.xlane.xlu0 %2062 }
 0x48d   :  { %v5066_v35 = vrot.slane %v2015_v11, %v6346_v61  ;;  %v5145_v47 = vrot.slane %v2063_v54, %v6346_v61  ;;  %v5844_v61 = vld [vmem:[%s9471_s2] ss:$0 sm:$0xff] }
 0x48f   :  { %v5067_v60 = vsel %vm2696_vm15, %v5066_v35, %v5062_v59  ;;  %v5146_v36 = vsel %vm2696_vm15, %v5145_v47, %v5141_v58 }
 0x490   :  { %v5163_v4 = vsel %vm5147_vm12, %v5146_v36, %v9524_v27  ;;  %v5162_v45 = vsel %vm5147_vm12, %v5067_v60, %v9525_v5 }
 0x491   :  { %5822 = vmatprep.mubr.f32.mxu0 %v5163_v4 }
 0x492   :  { %5823 = vmatmul.mubr.f32.vlgmr.msra.gmra.mrb[0].mxu0 %v5162_v45 }
 0x55c   :  { %v5544_v30 = vpop.f32.mrb[0].mxu1 }
 0x55d   :  { %v5546_v63 = vpop.f32.mrb[1].mxu1  ;;  %v5845_v15 = vadd.f32 %v5844_v61, %v5544_v30 }
 0x565   :  { %v5824_v22 = vpop.f32.mrb[0].mxu0 }
 0x566   :  { %v5846_v16 = vadd.f32 %v5845_v15, %v5824_v22  ;;  %v5826_v43 = vpop.f32.mrb[1].mxu0 }
 0x568   :  { %5829 = vst.msk [vmem:[#allocation2] sm:$0x3] %vm5828_vm11, %v5846_v16 }
 0x569   :  { %5876 = shalt.err (!%p5873_p4)
}
 0x56a   :  { %s5877_s2 = scalar_lea.hbm %s9472_s3, 32 }
 0x56b   :  { %p5878_p5 = scmp.ne.s32.totalorder %s9472_s3, %s5877_s2  ;;  %p5881_p6 = scmp.lt.u32.totalorder %s5877_s2, %s9472_s3 }
 0x56d   :  { %p5883_p7 = pnand %p5881_p6, %p5878_p5 }
 0x56f   :  { %5886 = shalt.err (!%p5883_p7)
}
 0x570   :  { %5839 = dma.vmem_to_hbm [thread:$0]  %s5837_s18, 32, %s9472_s3, [#allocation3]  }
 0x571   :  { %5887 = dma.done.wait [#allocation3], 32  }
 0x572   :  { %5888 = vsyncadd [#allocation3], 4294967264 }
 0x573   :  { %5843 = vsyncpa [#allocation3], 1 }

</bundles_post_ra>
